<compile_context>
chip_gen: v5e
topology: v5e:2x2
jax: 0.10.0
libtpu: 0.0.40
codegen_flags: <defaults>
</compile_context>

<pallas_src>
import jax
import jax.numpy as jnp
from jax.experimental import pallas as pl
from jax.experimental.pallas import tpu as pltpu

NEG_SLOPE = 0.01   # nn.LeakyReLU default
BN_EPS = 1e-5      # nn.BatchNorm2d default
LANE = 128         # TPU lane width


def conv_bn_lrelu_kernel(x_ref, w_ref, scale_ref, shift_ref, o_ref):
    """One (batch, H-tile, Cout-tile) block of fused conv + BN + LeakyReLU.

    x_ref:     (TH+2, W+2, Cin_p)   bf16 zero-padded input tile (2-row H halo)
    w_ref:     (3, 3, Cin_p, Cout_p) bf16 conv weights, HWIO, fully VMEM-resident
    scale_ref: (1, Cout_p)           f32 folded BN scale, resident
    shift_ref: (1, Cout_p)           f32 folded BN shift (includes conv bias), resident
    o_ref:     (TH, W, TCO)          f32 output tile; also the conv accumulator
    """
    th, wout, tco = o_ref.shape
    co0 = pl.multiple_of(pl.program_id(2) * tco, tco)   # lane-aligned Cout offset

    # 3x3 conv as 9 shifted (TH, W, Cin_p) x (Cin_p, TCO) MXU contractions, accumulated
    # directly into the f32 output block (no scratch, no zero pass, no final copy).
    first = True
    for kh in range(3):
        for kw in range(3):
            patch = x_ref[pl.ds(kh, th), pl.ds(kw, wout), :]        # slice from ref
            w_tap = w_ref[kh, kw, :, pl.ds(co0, tco)]               # (Cin_p, TCO)
            part = jax.lax.dot_general(
                patch, w_tap,
                dimension_numbers=(((2,), (0,)), ((), ())),
                preferred_element_type=jnp.float32)
            if first:
                o_ref[...] = part
                first = False
            else:
                o_ref[...] += part

    # Folded BatchNorm (eval) + conv bias -> per-channel affine, then LeakyReLU.
    # Dropout(0.3) is identity at inference.
    scale = scale_ref[:, pl.ds(co0, tco)]   # (1, TCO)
    shift = shift_ref[:, pl.ds(co0, tco)]   # (1, TCO)
    y = o_ref[...] * scale + shift
    o_ref[...] = jnp.where(y > 0, y, NEG_SLOPE * y).astype(o_ref.dtype)


def _round_up(x, m):
    return (x + m - 1) // m * m


def _vmem_info():
    """(physical VMEM bytes, device-kind string) with conservative fallbacks."""
    kind = ""
    try:
        kind = jax.devices()[0].device_kind.lower()
    except Exception:
        pass
    try:
        cap = int(pltpu.get_tpu_info().vmem_capacity_bytes)
    except Exception:
        cap = 64 * 1024 * 1024   # conservative: v7x has the smallest VMEM (64 MiB)
    return cap, kind


def _pick_tiles(h, w, cin_p, cout_p, budget_bytes, prefer_wide_n):
    """Pick (TH, TCO) so the double-buffered working set stays under the VMEM budget."""
    wp = w + 2

    def working_set(th, tco):
        return (2 * (th + 2) * wp * cin_p * 2     # bf16 input tile, double-buffered
                + 2 * th * w * tco * 4            # f32 output tile, double-buffered
                + 2 * 9 * cin_p * cout_p * 2      # bf16 weights (resident)
                + 4 * cout_p * 4)                 # scale / shift

    tco_candidates = [256, 128] if (prefer_wide_n and cout_p % 256 == 0) else [128]
    for tco in tco_candidates:
        best = None
        for th in range(min(h, 256), 0, -1):      # blocked H indexing needs H % TH == 0
            if h % th == 0 and working_set(th, tco) <= budget_bytes:
                best = th
                break
        if best is not None and (tco == 128 or best >= 8):
            return best, tco
    return 1, 128   # TODO(synk): W tiling instead of TH=1 for extreme W


def init_params(key, c_in, c_out):
    """Deterministic init matching nn.Conv2d / nn.BatchNorm2d defaults."""
    k_w, k_b = jax.random.split(key, 2)
    fan_in = c_in * 3 * 3
    bound = 1.0 / jnp.sqrt(jnp.float32(fan_in))
    return {
        "conv_w": jax.random.uniform(k_w, (c_out, c_in, 3, 3), jnp.float32,
                                     -bound, bound),          # OIHW (PyTorch)
        "conv_b": jax.random.uniform(k_b, (c_out,), jnp.float32, -bound, bound),
        "bn_gamma": jnp.ones((c_out,), jnp.float32),
        "bn_beta": jnp.zeros((c_out,), jnp.float32),
        "bn_mean": jnp.zeros((c_out,), jnp.float32),
        "bn_var": jnp.ones((c_out,), jnp.float32),
    }


def conv_unet_forward(x_nchw, params):
    """x_nchw: (N, C_in, H, W) float32 -> (N, C_out, H, W) float32."""
    n, c_in, h, w = x_nchw.shape
    c_out = params["conv_w"].shape[0]

    # Channel padding: lane-dense Cin once it is large enough to matter; mild (x8)
    # padding for tiny-Cin layers to avoid 16x HBM inflation of a mem-bound layer.
    cin_p = _round_up(c_in, LANE) if c_in >= 64 else _round_up(c_in, 8)
    cout_p = _round_up(c_out, LANE)                 # lane-dense output channels

    cap, kind = _vmem_info()
    budget = int(cap * 0.70)                        # headroom for Mosaic internals
    vmem_limit = int(cap * 0.85)
    prefer_wide_n = "v5" not in kind                # v6e/v7x MXU is 256-wide in N

    th, tco = _pick_tiles(h, w, cin_p, cout_p, budget, prefer_wide_n)
    nco = cout_p // tco
    nh = h // th
    wp = w + 2

    # --- wrapper-side data prep (fused by XLA into one producer pass) --------------
    # NCHW -> NHWC, zero-pad spatial (padding=1) and channels, cast to bf16 for MXU.
    x = jnp.transpose(x_nchw, (0, 2, 3, 1))
    xp = jnp.pad(x, ((0, 0), (1, 1), (1, 1), (0, cin_p - c_in))).astype(jnp.bfloat16)
    if nh == 1:
        xt = xp[:, None]                            # pure reshape, no extra HBM pass
    else:
        # TODO(synk): replace this halo gather (one extra HBM pass) with manual
        # double-buffered DMA from a pl.ANY-space input.
        row_idx = (jnp.arange(nh) * th)[:, None] + jnp.arange(th + 2)[None, :]
        xt = xp[:, row_idx]                         # (N, nH, TH+2, W+2, Cin_p)

    # OIHW -> HWIO, zero-pad channels, bf16 for the MXU.
    w_hwio = jnp.transpose(params["conv_w"], (2, 3, 1, 0))
    w_hwio = jnp.pad(w_hwio, ((0, 0), (0, 0), (0, cin_p - c_in), (0, cout_p - c_out)))
    w_hwio = w_hwio.astype(jnp.bfloat16)

    # Fold BN (eval) + conv bias into per-channel scale / shift (f32 epilogue).
    scale = params["bn_gamma"] / jnp.sqrt(params["bn_var"] + BN_EPS)
    shift = params["bn_beta"] + (params["conv_b"] - params["bn_mean"]) * scale
    scale_p = jnp.pad(scale, (0, cout_p - c_out), constant_values=1.0).reshape(1, cout_p)
    shift_p = jnp.pad(shift, (0, cout_p - c_out)).reshape(1, cout_p)

    grid = (n, nh, nco)
    cost = pl.CostEstimate(
        flops=2 * n * h * w * 9 * cin_p * cout_p,               # padded, as executed
        transcendentals=0,
        bytes_accessed=(n * nh * (th + 2) * wp * cin_p * 2      # bf16 input tiles
                        + 9 * cin_p * cout_p * 2                # bf16 weights (once)
                        + 2 * cout_p * 4                        # scale / shift
                        + n * h * w * cout_p * 4))              # f32 output

    out_p = pl.pallas_call(
        conv_bn_lrelu_kernel,
        # f32 output so the conv can accumulate directly into o_ref (no scratch).
        out_shape=jax.ShapeDtypeStruct((n, h, w, cout_p), jnp.float32),
        grid_spec=pltpu.PrefetchScalarGridSpec(
            num_scalar_prefetch=0,
            grid=grid,
            in_specs=[
                # Blocked input tile, pipelined/double-buffered by Pallas.
                pl.BlockSpec((None, None, th + 2, wp, cin_p),
                             lambda b, hi, co: (b, hi, 0, 0, 0)),
                # Full weight tensor, constant index_map -> DMA'd once, VMEM-resident.
                pl.BlockSpec((3, 3, cin_p, cout_p),
                             lambda b, hi, co: (0, 0, 0, 0)),
                pl.BlockSpec((1, cout_p), lambda b, hi, co: (0, 0)),
                pl.BlockSpec((1, cout_p), lambda b, hi, co: (0, 0)),
            ],
            out_specs=pl.BlockSpec((None, th, w, tco),
                                   lambda b, hi, co: (b, hi, 0, co)),
        ),
        compiler_params=pltpu.CompilerParams(
            # All grid axes independent (no cross-step state) -> megacore-shardable.
            dimension_semantics=("parallel", "parallel", "parallel"),
            vmem_limit_bytes=vmem_limit,
        ),
        cost_estimate=cost,
    )(xt, w_hwio, scale_p, shift_p)

    # Drop padded channels, NHWC -> NCHW to match the PyTorch module's output layout.
    return jnp.transpose(out_p[..., :c_out], (0, 3, 1, 2)).astype(x_nchw.dtype)


def _reference_forward(x_nchw, params):
    """Pure-JAX f32 reference (eval-mode Conv -> BN -> Dropout(id) -> LeakyReLU)."""
    y = jax.lax.conv_general_dilated(
        x_nchw, params["conv_w"], window_strides=(1, 1), padding=((1, 1), (1, 1)),
        dimension_numbers=("NCHW", "OIHW", "NCHW"))
    scale = params["bn_gamma"] / jnp.sqrt(params["bn_var"] + BN_EPS)
    shift = params["bn_beta"] + (params["conv_b"] - params["bn_mean"]) * scale
    y = y * scale[None, :, None, None] + shift[None, :, None, None]
    return jnp.where(y > 0, y, NEG_SLOPE * y)


if __name__ == "__main__":
    key = jax.random.PRNGKey(0)
    k_x, k_p = jax.random.split(key)

    N, C_IN, C_OUT, H, W = 2, 4, 8, 16, 16
    x = jax.random.normal(k_x, (N, C_IN, H, W), jnp.float32)
    params = init_params(k_p, C_IN, C_OUT)

    y = jax.jit(conv_unet_forward)(x, params)
    jax.block_until_ready(y)
    assert y.shape == (N, C_OUT, H, W), y.shape

    # Loose tolerance: kernel feeds the MXU in bf16 (f32 accumulation), ref is pure f32.
    err = float(jnp.max(jnp.abs(y - _reference_forward(x, params))))
    assert err < 1e-1, f"max abs err {err}"
    print("KERNEL_OK")
</pallas_src>

<mosaic_0001>
module attributes {stable_mosaic.version = 11 : i64} {
  func.func @conv_bn_lrelu_kernel(%arg0: i32, %arg1: i32, %arg2: i32, %arg3: memref<1x1x18x18x8xbf16, #tpu.memory_space<vmem>>, %arg4: memref<3x3x8x128xbf16, #tpu.memory_space<vmem>>, %arg5: memref<1x128xf32, #tpu.memory_space<vmem>>, %arg6: memref<1x128xf32, #tpu.memory_space<vmem>>, %arg7: memref<1x16x16x128xf32, #tpu.memory_space<vmem>>) attributes {dimension_semantics = [#tpu.dimension_semantics<parallel>, #tpu.dimension_semantics<parallel>, #tpu.dimension_semantics<parallel>], iteration_bounds = array<i64: 2, 1, 1>, scalar_prefetch = 0 : i64, scratch_operands = 0 : i64, tpu.core_type = #tpu.core_type<tc>, window_params = [{transform_indices = @transform_0, window_bounds = array<i64: 1, 1, 18, 18, 8>}, {pipeline_mode = #tpu.pipeline_mode<synchronous>, transform_indices = @transform_1, window_bounds = array<i64: 3, 3, 8, 128>}, {pipeline_mode = #tpu.pipeline_mode<synchronous>, transform_indices = @transform_2, window_bounds = array<i64: 1, 128>}, {pipeline_mode = #tpu.pipeline_mode<synchronous>, transform_indices = @transform_3, window_bounds = array<i64: 1, 128>}, {transform_indices = @transform_4, window_bounds = array<i64: 1, 16, 16, 128>}]} {
    %c128_i32 = arith.constant 128 : i32
    %0 = arith.muli %arg2, %c128_i32 : i32
    %1 = tpu.assume_multiple %0, 128 : i32
    %c0 = arith.constant 0 : index
    %c0_0 = arith.constant 0 : index
    %c0_1 = arith.constant 0 : index
    %c0_2 = arith.constant 0 : index
    %c0_3 = arith.constant 0 : index
    %2 = vector.load %arg3[%c0, %c0_0, %c0_1, %c0_2, %c0_3] : memref<1x1x18x18x8xbf16, #tpu.memory_space<vmem>>, vector<1x1x16x16x8xbf16>
    %3 = vector.shape_cast %2 : vector<1x1x16x16x8xbf16> to vector<16x16x8xbf16>
    %c0_4 = arith.constant 0 : index
    %c0_5 = arith.constant 0 : index
    %c0_6 = arith.constant 0 : index
    %4 = arith.index_cast %1 : i32 to index
    %5 = vector.load %arg4[%c0_4, %c0_5, %c0_6, %4] : memref<3x3x8x128xbf16, #tpu.memory_space<vmem>>, vector<1x1x8x128xbf16>
    %6 = vector.shape_cast %5 : vector<1x1x8x128xbf16> to vector<8x128xbf16>
    %cst = arith.constant dense<0.000000e+00> : vector<16x16x128xf32>
    %7 = tpu.matmul %3, %6, %cst {dimension_numbers = #tpu.dot_dimension_numbers<[2], [0], [0, 1], [1], [0, 0, 0, 1, 1, 1], [], []>} : vector<16x16x8xbf16>, vector<8x128xbf16>, vector<16x16x128xf32> -> vector<16x16x128xf32>
    %c0_7 = arith.constant 0 : index
    %c0_8 = arith.constant 0 : index
    %c0_9 = arith.constant 0 : index
    %c0_10 = arith.constant 0 : index
    %8 = vector.load %arg7[%c0_7, %c0_8, %c0_9, %c0_10] : memref<1x16x16x128xf32, #tpu.memory_space<vmem>>, vector<1x16x16x128xf32>
    %9 = vector.shape_cast %8 : vector<1x16x16x128xf32> to vector<16x16x128xf32>
    %10 = vector.shape_cast %7 : vector<16x16x128xf32> to vector<1x16x16x128xf32>
    tpu.vector_store %arg7[%c0_7, %c0_8, %c0_9, %c0_10], %10 {strides = array<i32>} : memref<1x16x16x128xf32, #tpu.memory_space<vmem>>, vector<1x16x16x128xf32>,
    %c0_11 = arith.constant 0 : index
    %c0_12 = arith.constant 0 : index
    %c0_13 = arith.constant 0 : index
    %c1 = arith.constant 1 : index
    %c0_14 = arith.constant 0 : index
    %11 = vector.load %arg3[%c0_11, %c0_12, %c0_13, %c1, %c0_14] : memref<1x1x18x18x8xbf16, #tpu.memory_space<vmem>>, vector<1x1x16x16x8xbf16>
    %12 = vector.shape_cast %11 : vector<1x1x16x16x8xbf16> to vector<16x16x8xbf16>
    %c0_15 = arith.constant 0 : index
    %c1_16 = arith.constant 1 : index
    %c0_17 = arith.constant 0 : index
    %13 = arith.index_cast %1 : i32 to index
    %14 = vector.load %arg4[%c0_15, %c1_16, %c0_17, %13] : memref<3x3x8x128xbf16, #tpu.memory_space<vmem>>, vector<1x1x8x128xbf16>
    %15 = vector.shape_cast %14 : vector<1x1x8x128xbf16> to vector<8x128xbf16>
    %cst_18 = arith.constant dense<0.000000e+00> : vector<16x16x128xf32>
    %16 = tpu.matmul %12, %15, %cst_18 {dimension_numbers = #tpu.dot_dimension_numbers<[2], [0], [0, 1], [1], [0, 0, 0, 1, 1, 1], [], []>} : vector<16x16x8xbf16>, vector<8x128xbf16>, vector<16x16x128xf32> -> vector<16x16x128xf32>
    %c0_19 = arith.constant 0 : index
    %c0_20 = arith.constant 0 : index
    %c0_21 = arith.constant 0 : index
    %c0_22 = arith.constant 0 : index
    %17 = vector.load %arg7[%c0_19, %c0_20, %c0_21, %c0_22] : memref<1x16x16x128xf32, #tpu.memory_space<vmem>>, vector<1x16x16x128xf32>
    %18 = vector.shape_cast %17 : vector<1x16x16x128xf32> to vector<16x16x128xf32>
    %19 = arith.addf %18, %16 : vector<16x16x128xf32>
    %c0_23 = arith.constant 0 : index
    %c0_24 = arith.constant 0 : index
    %c0_25 = arith.constant 0 : index
    %c0_26 = arith.constant 0 : index
    %20 = vector.load %arg7[%c0_23, %c0_24, %c0_25, %c0_26] : memref<1x16x16x128xf32, #tpu.memory_space<vmem>>, vector<1x16x16x128xf32>
    %21 = vector.shape_cast %20 : vector<1x16x16x128xf32> to vector<16x16x128xf32>
    %22 = vector.shape_cast %19 : vector<16x16x128xf32> to vector<1x16x16x128xf32>
    tpu.vector_store %arg7[%c0_23, %c0_24, %c0_25, %c0_26], %22 {strides = array<i32>} : memref<1x16x16x128xf32, #tpu.memory_space<vmem>>, vector<1x16x16x128xf32>,
    %c0_27 = arith.constant 0 : index
    %c0_28 = arith.constant 0 : index
    %c0_29 = arith.constant 0 : index
    %c2 = arith.constant 2 : index
    %c0_30 = arith.constant 0 : index
    %23 = vector.load %arg3[%c0_27, %c0_28, %c0_29, %c2, %c0_30] : memref<1x1x18x18x8xbf16, #tpu.memory_space<vmem>>, vector<1x1x16x16x8xbf16>
    %24 = vector.shape_cast %23 : vector<1x1x16x16x8xbf16> to vector<16x16x8xbf16>
    %c0_31 = arith.constant 0 : index
    %c2_32 = arith.constant 2 : index
    %c0_33 = arith.constant 0 : index
    %25 = arith.index_cast %1 : i32 to index
    %26 = vector.load %arg4[%c0_31, %c2_32, %c0_33, %25] : memref<3x3x8x128xbf16, #tpu.memory_space<vmem>>, vector<1x1x8x128xbf16>
    %27 = vector.shape_cast %26 : vector<1x1x8x128xbf16> to vector<8x128xbf16>
    %cst_34 = arith.constant dense<0.000000e+00> : vector<16x16x128xf32>
    %28 = tpu.matmul %24, %27, %cst_34 {dimension_numbers = #tpu.dot_dimension_numbers<[2], [0], [0, 1], [1], [0, 0, 0, 1, 1, 1], [], []>} : vector<16x16x8xbf16>, vector<8x128xbf16>, vector<16x16x128xf32> -> vector<16x16x128xf32>
    %c0_35 = arith.constant 0 : index
    %c0_36 = arith.constant 0 : index
    %c0_37 = arith.constant 0 : index
    %c0_38 = arith.constant 0 : index
    %29 = vector.load %arg7[%c0_35, %c0_36, %c0_37, %c0_38] : memref<1x16x16x128xf32, #tpu.memory_space<vmem>>, vector<1x16x16x128xf32>
    %30 = vector.shape_cast %29 : vector<1x16x16x128xf32> to vector<16x16x128xf32>
    %31 = arith.addf %30, %28 : vector<16x16x128xf32>
    %c0_39 = arith.constant 0 : index
    %c0_40 = arith.constant 0 : index
    %c0_41 = arith.constant 0 : index
    %c0_42 = arith.constant 0 : index
    %32 = vector.load %arg7[%c0_39, %c0_40, %c0_41, %c0_42] : memref<1x16x16x128xf32, #tpu.memory_space<vmem>>, vector<1x16x16x128xf32>
    %33 = vector.shape_cast %32 : vector<1x16x16x128xf32> to vector<16x16x128xf32>
    %34 = vector.shape_cast %31 : vector<16x16x128xf32> to vector<1x16x16x128xf32>
    tpu.vector_store %arg7[%c0_39, %c0_40, %c0_41, %c0_42], %34 {strides = array<i32>} : memref<1x16x16x128xf32, #tpu.memory_space<vmem>>, vector<1x16x16x128xf32>,
    %c0_43 = arith.constant 0 : index
    %c0_44 = arith.constant 0 : index
    %c1_45 = arith.constant 1 : index
    %c0_46 = arith.constant 0 : index
    %c0_47 = arith.constant 0 : index
    %35 = vector.load %arg3[%c0_43, %c0_44, %c1_45, %c0_46, %c0_47] : memref<1x1x18x18x8xbf16, #tpu.memory_space<vmem>>, vector<1x1x16x16x8xbf16>
    %36 = vector.shape_cast %35 : vector<1x1x16x16x8xbf16> to vector<16x16x8xbf16>
    %c1_48 = arith.constant 1 : index
    %c0_49 = arith.constant 0 : index
    %c0_50 = arith.constant 0 : index
    %37 = arith.index_cast %1 : i32 to index
    %38 = vector.load %arg4[%c1_48, %c0_49, %c0_50, %37] : memref<3x3x8x128xbf16, #tpu.memory_space<vmem>>, vector<1x1x8x128xbf16>
    %39 = vector.shape_cast %38 : vector<1x1x8x128xbf16> to vector<8x128xbf16>
    %cst_51 = arith.constant dense<0.000000e+00> : vector<16x16x128xf32>
    %40 = tpu.matmul %36, %39, %cst_51 {dimension_numbers = #tpu.dot_dimension_numbers<[2], [0], [0, 1], [1], [0, 0, 0, 1, 1, 1], [], []>} : vector<16x16x8xbf16>, vector<8x128xbf16>, vector<16x16x128xf32> -> vector<16x16x128xf32>
    %c0_52 = arith.constant 0 : index
    %c0_53 = arith.constant 0 : index
    %c0_54 = arith.constant 0 : index
    %c0_55 = arith.constant 0 : index
    %41 = vector.load %arg7[%c0_52, %c0_53, %c0_54, %c0_55] : memref<1x16x16x128xf32, #tpu.memory_space<vmem>>, vector<1x16x16x128xf32>
    %42 = vector.shape_cast %41 : vector<1x16x16x128xf32> to vector<16x16x128xf32>
    %43 = arith.addf %42, %40 : vector<16x16x128xf32>
    %c0_56 = arith.constant 0 : index
    %c0_57 = arith.constant 0 : index
    %c0_58 = arith.constant 0 : index
    %c0_59 = arith.constant 0 : index
    %44 = vector.load %arg7[%c0_56, %c0_57, %c0_58, %c0_59] : memref<1x16x16x128xf32, #tpu.memory_space<vmem>>, vector<1x16x16x128xf32>
    %45 = vector.shape_cast %44 : vector<1x16x16x128xf32> to vector<16x16x128xf32>
    %46 = vector.shape_cast %43 : vector<16x16x128xf32> to vector<1x16x16x128xf32>
    tpu.vector_store %arg7[%c0_56, %c0_57, %c0_58, %c0_59], %46 {strides = array<i32>} : memref<1x16x16x128xf32, #tpu.memory_space<vmem>>, vector<1x16x16x128xf32>,
    %c0_60 = arith.constant 0 : index
    %c0_61 = arith.constant 0 : index
    %c1_62 = arith.constant 1 : index
    %c1_63 = arith.constant 1 : index
    %c0_64 = arith.constant 0 : index
    %47 = vector.load %arg3[%c0_60, %c0_61, %c1_62, %c1_63, %c0_64] : memref<1x1x18x18x8xbf16, #tpu.memory_space<vmem>>, vector<1x1x16x16x8xbf16>
    %48 = vector.shape_cast %47 : vector<1x1x16x16x8xbf16> to vector<16x16x8xbf16>
    %c1_65 = arith.constant 1 : index
    %c1_66 = arith.constant 1 : index
    %c0_67 = arith.constant 0 : index
    %49 = arith.index_cast %1 : i32 to index
    %50 = vector.load %arg4[%c1_65, %c1_66, %c0_67, %49] : memref<3x3x8x128xbf16, #tpu.memory_space<vmem>>, vector<1x1x8x128xbf16>
    %51 = vector.shape_cast %50 : vector<1x1x8x128xbf16> to vector<8x128xbf16>
    %cst_68 = arith.constant dense<0.000000e+00> : vector<16x16x128xf32>
    %52 = tpu.matmul %48, %51, %cst_68 {dimension_numbers = #tpu.dot_dimension_numbers<[2], [0], [0, 1], [1], [0, 0, 0, 1, 1, 1], [], []>} : vector<16x16x8xbf16>, vector<8x128xbf16>, vector<16x16x128xf32> -> vector<16x16x128xf32>
    %c0_69 = arith.constant 0 : index
    %c0_70 = arith.constant 0 : index
    %c0_71 = arith.constant 0 : index
    %c0_72 = arith.constant 0 : index
    %53 = vector.load %arg7[%c0_69, %c0_70, %c0_71, %c0_72] : memref<1x16x16x128xf32, #tpu.memory_space<vmem>>, vector<1x16x16x128xf32>
    %54 = vector.shape_cast %53 : vector<1x16x16x128xf32> to vector<16x16x128xf32>
    %55 = arith.addf %54, %52 : vector<16x16x128xf32>
    %c0_73 = arith.constant 0 : index
    %c0_74 = arith.constant 0 : index
    %c0_75 = arith.constant 0 : index
    %c0_76 = arith.constant 0 : index
    %56 = vector.load %arg7[%c0_73, %c0_74, %c0_75, %c0_76] : memref<1x16x16x128xf32, #tpu.memory_space<vmem>>, vector<1x16x16x128xf32>
    %57 = vector.shape_cast %56 : vector<1x16x16x128xf32> to vector<16x16x128xf32>
    %58 = vector.shape_cast %55 : vector<16x16x128xf32> to vector<1x16x16x128xf32>
    tpu.vector_store %arg7[%c0_73, %c0_74, %c0_75, %c0_76], %58 {strides = array<i32>} : memref<1x16x16x128xf32, #tpu.memory_space<vmem>>, vector<1x16x16x128xf32>,
    %c0_77 = arith.constant 0 : index
    %c0_78 = arith.constant 0 : index
    %c1_79 = arith.constant 1 : index
    %c2_80 = arith.constant 2 : index
    %c0_81 = arith.constant 0 : index
    %59 = vector.load %arg3[%c0_77, %c0_78, %c1_79, %c2_80, %c0_81] : memref<1x1x18x18x8xbf16, #tpu.memory_space<vmem>>, vector<1x1x16x16x8xbf16>
    %60 = vector.shape_cast %59 : vector<1x1x16x16x8xbf16> to vector<16x16x8xbf16>
    %c1_82 = arith.constant 1 : index
    %c2_83 = arith.constant 2 : index
    %c0_84 = arith.constant 0 : index
    %61 = arith.index_cast %1 : i32 to index
    %62 = vector.load %arg4[%c1_82, %c2_83, %c0_84, %61] : memref<3x3x8x128xbf16, #tpu.memory_space<vmem>>, vector<1x1x8x128xbf16>
    %63 = vector.shape_cast %62 : vector<1x1x8x128xbf16> to vector<8x128xbf16>
    %cst_85 = arith.constant dense<0.000000e+00> : vector<16x16x128xf32>
    %64 = tpu.matmul %60, %63, %cst_85 {dimension_numbers = #tpu.dot_dimension_numbers<[2], [0], [0, 1], [1], [0, 0, 0, 1, 1, 1], [], []>} : vector<16x16x8xbf16>, vector<8x128xbf16>, vector<16x16x128xf32> -> vector<16x16x128xf32>
    %c0_86 = arith.constant 0 : index
    %c0_87 = arith.constant 0 : index
    %c0_88 = arith.constant 0 : index
    %c0_89 = arith.constant 0 : index
    %65 = vector.load %arg7[%c0_86, %c0_87, %c0_88, %c0_89] : memref<1x16x16x128xf32, #tpu.memory_space<vmem>>, vector<1x16x16x128xf32>
    %66 = vector.shape_cast %65 : vector<1x16x16x128xf32> to vector<16x16x128xf32>
    %67 = arith.addf %66, %64 : vector<16x16x128xf32>
    %c0_90 = arith.constant 0 : index
    %c0_91 = arith.constant 0 : index
    %c0_92 = arith.constant 0 : index
    %c0_93 = arith.constant 0 : index
    %68 = vector.load %arg7[%c0_90, %c0_91, %c0_92, %c0_93] : memref<1x16x16x128xf32, #tpu.memory_space<vmem>>, vector<1x16x16x128xf32>
    %69 = vector.shape_cast %68 : vector<1x16x16x128xf32> to vector<16x16x128xf32>
    %70 = vector.shape_cast %67 : vector<16x16x128xf32> to vector<1x16x16x128xf32>
    tpu.vector_store %arg7[%c0_90, %c0_91, %c0_92, %c0_93], %70 {strides = array<i32>} : memref<1x16x16x128xf32, #tpu.memory_space<vmem>>, vector<1x16x16x128xf32>,
    %c0_94 = arith.constant 0 : index
    %c0_95 = arith.constant 0 : index
    %c2_96 = arith.constant 2 : index
    %c0_97 = arith.constant 0 : index
    %c0_98 = arith.constant 0 : index
    %71 = vector.load %arg3[%c0_94, %c0_95, %c2_96, %c0_97, %c0_98] : memref<1x1x18x18x8xbf16, #tpu.memory_space<vmem>>, vector<1x1x16x16x8xbf16>
    %72 = vector.shape_cast %71 : vector<1x1x16x16x8xbf16> to vector<16x16x8xbf16>
    %c2_99 = arith.constant 2 : index
    %c0_100 = arith.constant 0 : index
    %c0_101 = arith.constant 0 : index
    %73 = arith.index_cast %1 : i32 to index
    %74 = vector.load %arg4[%c2_99, %c0_100, %c0_101, %73] : memref<3x3x8x128xbf16, #tpu.memory_space<vmem>>, vector<1x1x8x128xbf16>
    %75 = vector.shape_cast %74 : vector<1x1x8x128xbf16> to vector<8x128xbf16>
    %cst_102 = arith.constant dense<0.000000e+00> : vector<16x16x128xf32>
    %76 = tpu.matmul %72, %75, %cst_102 {dimension_numbers = #tpu.dot_dimension_numbers<[2], [0], [0, 1], [1], [0, 0, 0, 1, 1, 1], [], []>} : vector<16x16x8xbf16>, vector<8x128xbf16>, vector<16x16x128xf32> -> vector<16x16x128xf32>
    %c0_103 = arith.constant 0 : index
    %c0_104 = arith.constant 0 : index
    %c0_105 = arith.constant 0 : index
    %c0_106 = arith.constant 0 : index
    %77 = vector.load %arg7[%c0_103, %c0_104, %c0_105, %c0_106] : memref<1x16x16x128xf32, #tpu.memory_space<vmem>>, vector<1x16x16x128xf32>
    %78 = vector.shape_cast %77 : vector<1x16x16x128xf32> to vector<16x16x128xf32>
    %79 = arith.addf %78, %76 : vector<16x16x128xf32>
    %c0_107 = arith.constant 0 : index
    %c0_108 = arith.constant 0 : index
    %c0_109 = arith.constant 0 : index
    %c0_110 = arith.constant 0 : index
    %80 = vector.load %arg7[%c0_107, %c0_108, %c0_109, %c0_110] : memref<1x16x16x128xf32, #tpu.memory_space<vmem>>, vector<1x16x16x128xf32>
    %81 = vector.shape_cast %80 : vector<1x16x16x128xf32> to vector<16x16x128xf32>
    %82 = vector.shape_cast %79 : vector<16x16x128xf32> to vector<1x16x16x128xf32>
    tpu.vector_store %arg7[%c0_107, %c0_108, %c0_109, %c0_110], %82 {strides = array<i32>} : memref<1x16x16x128xf32, #tpu.memory_space<vmem>>, vector<1x16x16x128xf32>,
    %c0_111 = arith.constant 0 : index
    %c0_112 = arith.constant 0 : index
    %c2_113 = arith.constant 2 : index
    %c1_114 = arith.constant 1 : index
    %c0_115 = arith.constant 0 : index
    %83 = vector.load %arg3[%c0_111, %c0_112, %c2_113, %c1_114, %c0_115] : memref<1x1x18x18x8xbf16, #tpu.memory_space<vmem>>, vector<1x1x16x16x8xbf16>
    %84 = vector.shape_cast %83 : vector<1x1x16x16x8xbf16> to vector<16x16x8xbf16>
    %c2_116 = arith.constant 2 : index
    %c1_117 = arith.constant 1 : index
    %c0_118 = arith.constant 0 : index
    %85 = arith.index_cast %1 : i32 to index
    %86 = vector.load %arg4[%c2_116, %c1_117, %c0_118, %85] : memref<3x3x8x128xbf16, #tpu.memory_space<vmem>>, vector<1x1x8x128xbf16>
    %87 = vector.shape_cast %86 : vector<1x1x8x128xbf16> to vector<8x128xbf16>
    %cst_119 = arith.constant dense<0.000000e+00> : vector<16x16x128xf32>
    %88 = tpu.matmul %84, %87, %cst_119 {dimension_numbers = #tpu.dot_dimension_numbers<[2], [0], [0, 1], [1], [0, 0, 0, 1, 1, 1], [], []>} : vector<16x16x8xbf16>, vector<8x128xbf16>, vector<16x16x128xf32> -> vector<16x16x128xf32>
    %c0_120 = arith.constant 0 : index
    %c0_121 = arith.constant 0 : index
    %c0_122 = arith.constant 0 : index
    %c0_123 = arith.constant 0 : index
    %89 = vector.load %arg7[%c0_120, %c0_121, %c0_122, %c0_123] : memref<1x16x16x128xf32, #tpu.memory_space<vmem>>, vector<1x16x16x128xf32>
    %90 = vector.shape_cast %89 : vector<1x16x16x128xf32> to vector<16x16x128xf32>
    %91 = arith.addf %90, %88 : vector<16x16x128xf32>
    %c0_124 = arith.constant 0 : index
    %c0_125 = arith.constant 0 : index
    %c0_126 = arith.constant 0 : index
    %c0_127 = arith.constant 0 : index
    %92 = vector.load %arg7[%c0_124, %c0_125, %c0_126, %c0_127] : memref<1x16x16x128xf32, #tpu.memory_space<vmem>>, vector<1x16x16x128xf32>
    %93 = vector.shape_cast %92 : vector<1x16x16x128xf32> to vector<16x16x128xf32>
    %94 = vector.shape_cast %91 : vector<16x16x128xf32> to vector<1x16x16x128xf32>
    tpu.vector_store %arg7[%c0_124, %c0_125, %c0_126, %c0_127], %94 {strides = array<i32>} : memref<1x16x16x128xf32, #tpu.memory_space<vmem>>, vector<1x16x16x128xf32>,
    %c0_128 = arith.constant 0 : index
    %c0_129 = arith.constant 0 : index
    %c2_130 = arith.constant 2 : index
    %c2_131 = arith.constant 2 : index
    %c0_132 = arith.constant 0 : index
    %95 = vector.load %arg3[%c0_128, %c0_129, %c2_130, %c2_131, %c0_132] : memref<1x1x18x18x8xbf16, #tpu.memory_space<vmem>>, vector<1x1x16x16x8xbf16>
    %96 = vector.shape_cast %95 : vector<1x1x16x16x8xbf16> to vector<16x16x8xbf16>
    %c2_133 = arith.constant 2 : index
    %c2_134 = arith.constant 2 : index
    %c0_135 = arith.constant 0 : index
    %97 = arith.index_cast %1 : i32 to index
    %98 = vector.load %arg4[%c2_133, %c2_134, %c0_135, %97] : memref<3x3x8x128xbf16, #tpu.memory_space<vmem>>, vector<1x1x8x128xbf16>
    %99 = vector.shape_cast %98 : vector<1x1x8x128xbf16> to vector<8x128xbf16>
    %cst_136 = arith.constant dense<0.000000e+00> : vector<16x16x128xf32>
    %100 = tpu.matmul %96, %99, %cst_136 {dimension_numbers = #tpu.dot_dimension_numbers<[2], [0], [0, 1], [1], [0, 0, 0, 1, 1, 1], [], []>} : vector<16x16x8xbf16>, vector<8x128xbf16>, vector<16x16x128xf32> -> vector<16x16x128xf32>
    %c0_137 = arith.constant 0 : index
    %c0_138 = arith.constant 0 : index
    %c0_139 = arith.constant 0 : index
    %c0_140 = arith.constant 0 : index
    %101 = vector.load %arg7[%c0_137, %c0_138, %c0_139, %c0_140] : memref<1x16x16x128xf32, #tpu.memory_space<vmem>>, vector<1x16x16x128xf32>
    %102 = vector.shape_cast %101 : vector<1x16x16x128xf32> to vector<16x16x128xf32>
    %103 = arith.addf %102, %100 : vector<16x16x128xf32>
    %c0_141 = arith.constant 0 : index
    %c0_142 = arith.constant 0 : index
    %c0_143 = arith.constant 0 : index
    %c0_144 = arith.constant 0 : index
    %104 = vector.load %arg7[%c0_141, %c0_142, %c0_143, %c0_144] : memref<1x16x16x128xf32, #tpu.memory_space<vmem>>, vector<1x16x16x128xf32>
    %105 = vector.shape_cast %104 : vector<1x16x16x128xf32> to vector<16x16x128xf32>
    %106 = vector.shape_cast %103 : vector<16x16x128xf32> to vector<1x16x16x128xf32>
    tpu.vector_store %arg7[%c0_141, %c0_142, %c0_143, %c0_144], %106 {strides = array<i32>} : memref<1x16x16x128xf32, #tpu.memory_space<vmem>>, vector<1x16x16x128xf32>,
    %c0_145 = arith.constant 0 : index
    %107 = arith.index_cast %1 : i32 to index
    %108 = vector.load %arg5[%c0_145, %107] : memref<1x128xf32, #tpu.memory_space<vmem>>, vector<1x128xf32>
    %c0_146 = arith.constant 0 : index
    %109 = arith.index_cast %1 : i32 to index
    %110 = vector.load %arg6[%c0_146, %109] : memref<1x128xf32, #tpu.memory_space<vmem>>, vector<1x128xf32>
    %c0_147 = arith.constant 0 : index
    %c0_148 = arith.constant 0 : index
    %c0_149 = arith.constant 0 : index
    %c0_150 = arith.constant 0 : index
    %111 = vector.load %arg7[%c0_147, %c0_148, %c0_149, %c0_150] : memref<1x16x16x128xf32, #tpu.memory_space<vmem>>, vector<1x16x16x128xf32>
    %112 = vector.shape_cast %111 : vector<1x16x16x128xf32> to vector<16x16x128xf32>
    %113 = vector.shape_cast %108 : vector<1x128xf32> to vector<1x1x128xf32>
    %114 = vector.broadcast %113 : vector<1x1x128xf32> to vector<16x16x128xf32>
    %115 = arith.mulf %112, %114 : vector<16x16x128xf32>
    %116 = vector.shape_cast %110 : vector<1x128xf32> to vector<1x1x128xf32>
    %117 = vector.broadcast %116 : vector<1x1x128xf32> to vector<16x16x128xf32>
    %118 = arith.addf %115, %117 : vector<16x16x128xf32>
    %cst_151 = arith.constant 0.000000e+00 : f32
    %119 = vector.broadcast %cst_151 : f32 to vector<16x16x128xf32>
    %120 = arith.cmpf ogt, %118, %119 : vector<16x16x128xf32>
    %cst_152 = arith.constant 0.00999999977 : f32
    %121 = vector.broadcast %cst_152 : f32 to vector<16x16x128xf32>
    %122 = arith.mulf %121, %118 : vector<16x16x128xf32>
    %123 = arith.select %120, %118, %122 : vector<16x16x128xi1>, vector<16x16x128xf32>
    %c0_153 = arith.constant 0 : index
    %c0_154 = arith.constant 0 : index
    %c0_155 = arith.constant 0 : index
    %c0_156 = arith.constant 0 : index
    %124 = vector.load %arg7[%c0_153, %c0_154, %c0_155, %c0_156] : memref<1x16x16x128xf32, #tpu.memory_space<vmem>>, vector<1x16x16x128xf32>
    %125 = vector.shape_cast %124 : vector<1x16x16x128xf32> to vector<16x16x128xf32>
    %126 = vector.shape_cast %123 : vector<16x16x128xf32> to vector<1x16x16x128xf32>
    tpu.vector_store %arg7[%c0_153, %c0_154, %c0_155, %c0_156], %126 {strides = array<i32>} : memref<1x16x16x128xf32, #tpu.memory_space<vmem>>, vector<1x16x16x128xf32>,
    return
  }
  func.func @transform_0(%arg0: i32, %arg1: i32, %arg2: i32) -> (i32, i32, i32, i32, i32) {
    %c0_i32 = arith.constant 0 : i32
    %c0_i32_0 = arith.constant 0 : i32
    %c0_i32_1 = arith.constant 0 : i32
    %c0_i32_2 = arith.constant 0 : i32
    return %arg0, %arg1, %c0_i32, %c0_i32_0, %c0_i32_1 : i32, i32, i32, i32, i32
  }
  func.func @transform_1(%arg0: i32, %arg1: i32, %arg2: i32) -> (i32, i32, i32, i32) {
    %c0_i32 = arith.constant 0 : i32
    %c0_i32_0 = arith.constant 0 : i32
    %c0_i32_1 = arith.constant 0 : i32
    %c0_i32_2 = arith.constant 0 : i32
    %c0_i32_3 = arith.constant 0 : i32
    return %c0_i32, %c0_i32_0, %c0_i32_1, %c0_i32_2 : i32, i32, i32, i32
  }
  func.func @transform_2(%arg0: i32, %arg1: i32, %arg2: i32) -> (i32, i32) {
    %c0_i32 = arith.constant 0 : i32
    %c0_i32_0 = arith.constant 0 : i32
    %c0_i32_1 = arith.constant 0 : i32
    return %c0_i32, %c0_i32_0 : i32, i32
  }
  func.func @transform_3(%arg0: i32, %arg1: i32, %arg2: i32) -> (i32, i32) {
    %c0_i32 = arith.constant 0 : i32
    %c0_i32_0 = arith.constant 0 : i32
    %c0_i32_1 = arith.constant 0 : i32
    return %c0_i32, %c0_i32_0 : i32, i32
  }
  func.func @transform_4(%arg0: i32, %arg1: i32, %arg2: i32) -> (i32, i32, i32, i32) {
    %c0_i32 = arith.constant 0 : i32
    %c0_i32_0 = arith.constant 0 : i32
    return %arg0, %arg1, %c0_i32, %arg2 : i32, i32, i32, i32
  }
}

</mosaic_0001>

<bundles_post_ra>
// kernel: conv_unet_forward.1
= control target key start
LH: loop header
LB: loop body
LE: loop exit
PB: predicated region body
PF: predicated region fallthrough
CT: control target
= control target key end

     0   :  { %s6064_s15 = smov 0   ;;  %s6066_s16 = smov 0   ;;  %s7424_s0 = inlined_call_operand.vmem [shape: bf16[2,1,18,18,8], index: 0, kind: input, shape index: {}]   ;;  %s7425_s1 = inlined_call_operand.vmem [shape: bf16[3,3,8,128], index: 1, kind: input, shape index: {}]   ;;  %s7426_s2 = inlined_call_operand.vmem [shape: f32[1,128], index: 2, kind: input, shape index: {}]   ;;  %s7427_s3 = inlined_call_operand.vmem [shape: f32[1,128], index: 3, kind: input, shape index: {}]   ;;  %s7428_s4 = inlined_call_operand.vmem [shape: f32[2,16,16,128], index: 4, kind: output, shape index: {}]  }
   0x1   :  { %s6068_s17 = smov 0  }
   0x2 LB: > { %s33_s18 = sadd.s32 1, %s6033_s16  ;;  %p5280_p0 = scmp.ge.s32.totalorder %s6037_s17, 1  ;;  %s6037_s17 = sphi %s6068_s17, %s14_s17   ;;  %s6033_s16 = sphi %s6066_s16, %s7434_s16   ;;  %s6029_s15 = sphi %s6064_s15, %s7433_s15  }
   0x3   : > { %p35_p1 = scmp.ge.s32.totalorder %s33_s18, 2  ;;  %p191_p2 = scmp.lt.s32.totalorder %s6037_s17, 3 }
   0x5   : > { %s7436_s18 = smov (%p35_p1, %s33_s18), 0  ;;  %p192_p3 = pnand %p5280_p0, %p191_p2 }
   0x6   : > { %p229_p4 = scmp.lt.s32.totalorder (!%p192_p3), %s6029_s15, 1 }
   0x7   : > { %195 = sbr.rel (%p192_p3) target bundleno = 734 (0x2de), region = 36 }
   0xc   : > { %v290_v0 = vld [vmem:[%s7425_s1] sm:$0xf]  ;;  %vm420_vm0 = vcmask 1043456   ;;  %v5364_v2 = vld [vmem:[%s7425_s1 + $0x4] sm:$0xf]  ;;  %s7438_s15 = smov (!%p229_p4, %s6029_s15), 1 }
   0xd   : > { %v422_v1 = vsel %vm420_vm0, %v290_v0, 0  ;;  %v5381_v3 = vld [vmem:[%s7425_s1 + $0x8] sm:$0xf]  ;;  %v1081_v4 = vsel %vm420_vm0, %v5364_v2, 0  ;;  %v5446_v6 = vld [vmem:[%s7425_s1 + $0xc] sm:$0xf] }
   0xe   : > { %5983 = vmatpush.bf16.msra.mxu1 %v422_v1  ;;  %5984 = vmatpush.bf16.msra.mxu2 %v422_v1  ;;  %v1580_v5 = vsel %vm420_vm0, %v5381_v3, 0  ;;  %v1933_v7 = vsel %vm420_vm0, %v5446_v6, 0  ;;  %v5575_v8 = vld [vmem:[%s7425_s1 + $0x10] sm:$0xf]  ;;  %s5986_s29 = smul.u32 216, %s7438_s15  ;;  %vm371_vm1 = vcmask 64512  }
   0xf   : > { %5985 = vmatpush.bf16.msra.mxu3 %v422_v1  ;;  %v2653_v9 = vsel %vm420_vm0, %v5575_v8, 0  ;;  %431 = vmatpush.bf16.msra.mxu0 %v422_v1  ;;  %v5640_v24 = vld [vmem:[%s7425_s1 + $0x14] sm:$0xf]  ;;  %v5705_v25 = vld [vmem:[%s7425_s1 + $0x18] sm:$0xf]  ;;  %vm1368_vm4 = vcmask 1042432  }
  0x10   : > { %s6108_s6 = scalar_lea.vmem %s7424_s0, %s5986_s29  ;;  %v3149_v28 = vsel %vm420_vm0, %v5640_v24, 0  ;;  %v3502_v29 = vsel %vm420_vm0, %v5705_v25, 0  ;;  %v5834_v30 = vld [vmem:[%s7425_s1 + $0x1c] sm:$0xf]  ;;  %vm597_vm2 = vsmask.f32 3328 }
  0x11   : > { %v5939_v10 = vld [vmem:[%s6108_s6 + $0x30] sm:$0xff]  ;;  %v5943_v11 = vld [vmem:[%s6108_s6 + $0x60] sm:$0xff]  ;;  %v5941_v18 = vld [vmem:[%s6108_s6 + $0x48] sm:$0xff]  ;;  %v4222_v31 = vsel %vm420_vm0, %v5834_v30, 0  ;;  %vm598_vm3 = vsmask.f32 7440 }
  0x12   : > { %1090 = vmatpush.bf16.msrb.mxu1 %v1081_v4  ;;  %1589 = vmatpush.bf16.msrb.mxu2 %v1580_v5  ;;  %v5947_v12 = vld [vmem:[%s6108_s6 + $0x90] sm:$0xff]  ;;  %v5935_v13 = vld [vmem:[%s6108_s6] sm:$0xff]  ;;  %v5945_v19 = vld [vmem:[%s6108_s6 + $0x78] sm:$0xff]  ;;  %vm1369_vm5 = vcmask 1046532   ;;  %s5934_s19 = sshll.u32 %s7438_s15, 8 }
  0x13   : > { %1942 = vmatpush.bf16.msrb.mxu3 %v1933_v7  ;;  %2662 = vmatpush.bf16.msrb.mxu0 %v2653_v9  ;;  %v5940_v14 = vld [vmem:[%s6108_s6 + $0x3c] sm:$0xff]  ;;  %v5944_v15 = vld [vmem:[%s6108_s6 + $0x6c] sm:$0xff]  ;;  %v546_v23 = vld [vmem:[%s6108_s6 + $0x4] sm:$0xf]  ;;  %s6307_s21 = scalar_lea.vmem %s7428_s4, %s5934_s19 }
  0x14   : > { %5352 = vmatmul.msk.bf16.vlgmr.msra.gmra.mxu1 %vm371_vm1, %v5939_v10  ;;  %5356 = vmatmul.msk.bf16.vlgmr.msra.gmra.mxu2 %vm371_vm1, %v5943_v11  ;;  %v5948_v16 = vld [vmem:[%s6108_s6 + $0x9c] sm:$0xff]  ;;  %v5936_v17 = vld [vmem:[%s6108_s6 + $0xc] sm:$0xff]  ;;  %v610_v32 = vshll.u32 %v546_v23, 16  ;;  %v614_v33 = vshrl.u32 %v546_v23, 16  ;;  %v547_v38 = vld [vmem:[%s6108_s6 + $0x8] sm:$0x1] }
  0x15   : > { %5360 = vmatmul.msk.bf16.vlgmr.msra.gmra.mxu3 %vm371_vm1, %v5947_v12  ;;  %5348 = vmatmul.msk.bf16.vlgmr.msra.gmra.mxu0 %vm371_vm1, %v5935_v13  ;;  %v5949_v20 = vld [vmem:[%s6108_s6 + $0xa8] sm:$0xff]  ;;  %v5937_v21 = vld [vmem:[%s6108_s6 + $0x18] sm:$0xff]  ;;  %v545_v22 = vld [vmem:[%s6108_s6] sm:$0xf]  ;;  %v620_v47 = vshll.u32 %v547_v38, 16 }
  0x16   : > { %v601_v26 = vshrl.u32 %v545_v22, 16  ;;  %v604_v27 = vshll.u32 %v545_v22, 16  ;;  %3158 = vmatpush.bf16.msra.mxu1 %v3149_v28  ;;  %3511 = vmatpush.bf16.msra.mxu2 %v3502_v29  ;;  %v5527_v34 = vld [vmem:[%s6108_s6 + $0xc] sm:$0xf]  ;;  %v5528_v35 = vld [vmem:[%s6108_s6 + $0x10] sm:$0xf]  ;;  %vm6160_vm6 = vmor %vm597_vm2, %vm598_vm3 }
  0x17   : > { %4231 = vmatpush.bf16.msra.mxu3 %v4222_v31  ;;  %v2173_v39 = vshrl.u32 %v5527_v34, 16  ;;  %v2176_v40 = vshll.u32 %v5527_v34, 16  ;;  %v2182_v41 = vshll.u32 %v5528_v35, 16  ;;  %v2186_v42 = vshrl.u32 %v5528_v35, 16  ;;  %v1269_v45 = vld [vmem:[%s6108_s6 + $0x4] sm:$0xf]  ;;  %vm6166_vm7 = vmor %vm1368_vm4, %vm1369_vm5 }
  0x18   : > { %v603_v36 = vrot.slane %v601_v26, 4  ;;  %v606_v37 = vrot.slane %v604_v27, 5  ;;  %v612_v43 = vrot.slane %v610_v32, 5  ;;  %v616_v44 = vrot.slane %v614_v33, 4  ;;  %v5942_v48 = vld [vmem:[%s6108_s6 + $0x54] sm:$0xff]  ;;  %v5946_v53 = vld [vmem:[%s6108_s6 + $0x84] sm:$0xff] }
  0x19   : > { %v2175_v49 = vrot.slane %v2173_v39, 4  ;;  %v2178_v50 = vrot.slane %v2176_v40, 5  ;;  %v2184_v51 = vrot.slane %v2182_v41, 5  ;;  %v2188_v52 = vrot.slane %v2186_v42, 4  ;;  %v5529_v56 = vld [vmem:[%s6108_s6 + $0x14] sm:$0x1] }
  0x1a   : > { %v607_v46 = vor.u32 %v606_v37, %v603_v36  ;;  %v617_v54 = vor.u32 %v616_v44, %v612_v43  ;;  %v1373_v55 = vrot.slane %v1269_v45, 5  ;;  %v1268_v57 = vld [vmem:[%s6108_s6] sm:$0xe]  ;;  %v1270_v58 = vld [vmem:[%s6108_s6 + $0x8] sm:$0x1]  ;;  %v5950_v59 = vld [vmem:[%s6108_s6 + $0xb4] sm:$0xff] }
  0x1b   : > { %v622_v60 = vrot.slane %v620_v47, 5  ;;  %v5938_v61 = vld [vmem:[%s6108_s6 + $0x24] sm:$0xff]  ;;  %v2179_v63 = vor.u32 %v2178_v50, %v2175_v49  ;;  %v2189_v0 = vor.u32 %v2188_v52, %v2184_v51  ;;  %v2192_v1 = vshll.u32 %v5529_v56, 16  ;;  %v548_v8 = vld [vmem:[%s6108_s6 + $0xc] sm:$0xf] }
  0x1c   : > { %v608_v62 = vrot.slane %v607_v46, 4  ;;  %v618_v3 = vrot.slane %v617_v54, 4  ;;  %v5382_v4 = vrot.slane %v1268_v57, 9  ;;  %v1375_v5 = vrot.slane %v1373_v55, 4  ;;  %v549_v9 = vld [vmem:[%s6108_s6 + $0x10] sm:$0xf] }
  0x1d   : > { %v1376_v6 = vrot.slane %v1270_v58, 5  ;;  %v5899_v10 = vld [vmem:[%s7425_s1 + $0x20] sm:$0xf]  ;;  %v2180_v11 = vrot.slane %v2179_v63, 4  ;;  %v2190_v12 = vrot.slane %v2189_v0, 4  ;;  %v2194_v13 = vrot.slane %v2192_v1, 5 }
  0x1e   : > { %v628_v22 = vshll.u32 %v548_v8, 16  ;;  %v634_v23 = vshll.u32 %v549_v9, 16  ;;  %v638_v24 = vshrl.u32 %v549_v9, 16  ;;  %v550_v39 = vld [vmem:[%s6108_s6 + $0x14] sm:$0x1]  ;;  %v5982_v7 = vld [vmem:[%s6108_s6 + $0xcc] sm:$0xff] }
  0x1f   : > { %v2185_v27 = vsel %vm6160_vm6, %v2180_v11, %v2184_v51  ;;  %v2195_v28 = vsel %vm6160_vm6, %v2190_v12, %v2194_v13  ;;  %v1272_v44 = vld [vmem:[%s6108_s6 + $0x10] sm:$0xf]  ;;  %v644_v52 = vshll.u32 %v550_v39, 16  ;;  %v1271_v57 = vld [vmem:[%s6108_s6 + $0xc] sm:$0xe] }
  0x20   : > { %v630_v36 = vrot.slane %v628_v22, 5  ;;  %v636_v37 = vrot.slane %v634_v23, 5  ;;  %v640_v38 = vrot.slane %v638_v24, 4  ;;  %v2556_v40 = vunpack.c.l.b16 %v2185_v27  ;;  %v1273_v58 = vld [vmem:[%s6108_s6 + $0x14] sm:$0x1] }
  0x21   : > { %v2557_v41 = vunpack.c.l.b16 %v2195_v28  ;;  %v1380_v54 = vrot.slane %v1272_v44, 5  ;;  %v646_v0 = vrot.slane %v644_v52, 5  ;;  %v552_v1 = vld [vmem:[%s6108_s6 + $0x1c] sm:$0xf]  ;;  %v5534_v13 = vld [vmem:[%s6108_s6 + $0x28] sm:$0xf] }
  0x22   : > { %v641_v51 = vor.u32 %v640_v38, %v636_v37  ;;  %v2230_v22 = vshll.u32 %v5534_v13, 16  ;;  %v2234_v23 = vshrl.u32 %v5534_v13, 16  ;;  %v5535_v44 = vld [vmem:[%s6108_s6 + $0x2c] sm:$0x1]  ;;  %v5952_v52 = vld [vmem:[%s6108_s6 + $0x18] sm:$0xff] }
  0x24   : > { %5353 = vmatmul.msk.bf16.gmra.mxu1 %vm371_vm1, %v5940_v14  ;;  %5357 = vmatmul.msk.bf16.gmra.mxu2 %vm371_vm1, %v5944_v15  ;;  %v4718_v14 = vsel %vm420_vm0, %v5899_v10, 0  ;;  %v5530_v15 = vld [vmem:[%s6108_s6 + $0x18] sm:$0xf]  ;;  %v642_v63 = vrot.slane %v641_v51, 4 }
  0x25   : > { %5361 = vmatmul.msk.bf16.gmra.mxu3 %vm371_vm1, %v5948_v16  ;;  %5349 = vmatmul.msk.bf16.gmra.mxu0 %vm371_vm1, %v5936_v17  ;;  %v613_v16 = vsel %vm6160_vm6, %v608_v62, %v612_v43  ;;  %v623_v17 = vsel %vm6160_vm6, %v618_v3, %v622_v60  ;;  %v2197_v25 = vshrl.u32 %v5530_v15, 16  ;;  %v2200_v26 = vshll.u32 %v5530_v15, 16 }
  0x26   : > { %4727 = vmatpush.bf16.msra.mxu0 %v4718_v14  ;;  %v984_v31 = vunpack.c.l.b16 %v613_v16  ;;  %v985_v32 = vunpack.c.l.b16 %v623_v17  ;;  %v5383_v3 = vrot.slane %v1271_v57, 9  ;;  %v658_v14 = vshll.u32 %v552_v1, 16 }
  0x27   : > { %v2199_v42 = vrot.slane %v2197_v25, 4  ;;  %v2202_v43 = vrot.slane %v2200_v26, 5  ;;  %v662_v15 = vshrl.u32 %v552_v1, 16  ;;  %v647_v17 = vsel %vm6160_vm6, %v642_v63, %v646_v0  ;;  %v554_v63 = vld [vmem:[%s6108_s6 + $0x24] sm:$0xf] }
  0x28   : > { %v1016_v47 = vpack.c.b16 %v985_v32, %v984_v31  ;;  %v660_v31 = vrot.slane %v658_v14, 5  ;;  %v555_v0 = vld [vmem:[%s6108_s6 + $0x28] sm:$0xf] }
  0x29   : > { %v2203_v56 = vor.u32 %v2202_v43, %v2199_v42  ;;  %v664_v32 = vrot.slane %v662_v15, 4  ;;  %v682_v13 = vshll.u32 %v555_v0, 16  ;;  %v686_v14 = vshrl.u32 %v555_v0, 16 }
  0x34   : > { %5354 = vmatmul.msk.bf16.gmra.mxu1 %vm371_vm1, %v5941_v18  ;;  %5358 = vmatmul.msk.bf16.gmra.mxu2 %vm371_vm1, %v5945_v19  ;;  %v1374_v18 = vsel %vm6166_vm7, %v5382_v4, %v1373_v55  ;;  %v1377_v19 = vsel %vm6166_vm7, %v1375_v5, %v1376_v6  ;;  %v2588_v55 = vpack.c.b16 %v2557_v41, %v2556_v40  ;;  %v1382_v4 = vrot.slane %v1380_v54, 4 }
  0x35   : > { %5362 = vmatmul.msk.bf16.gmra.mxu3 %vm371_vm1, %v5949_v20  ;;  %5350 = vmatmul.msk.bf16.gmra.mxu0 %vm371_vm1, %v5937_v21  ;;  %v5531_v20 = vld [vmem:[%s6108_s6 + $0x1c] sm:$0xf]  ;;  %v625_v21 = vshrl.u32 %v548_v8, 16  ;;  %v1483_v33 = vunpack.c.l.b16 %v1374_v18  ;;  %v1484_v34 = vunpack.c.l.b16 %v1377_v19  ;;  %v1383_v5 = vrot.slane %v1273_v58, 5  ;;  %v5533_v8 = vld [vmem:[%s6108_s6 + $0x24] sm:$0xf] }
  0x36   : > { %v2206_v29 = vshll.u32 %v5531_v20, 16  ;;  %v2210_v30 = vshrl.u32 %v5531_v20, 16  ;;  %v2204_v6 = vrot.slane %v2203_v56, 4  ;;  %v2221_v18 = vshrl.u32 %v5533_v8, 16 }
  0x37   : > { %v627_v35 = vrot.slane %v625_v21, 4  ;;  %v1515_v49 = vpack.c.b16 %v1484_v34, %v1483_v33  ;;  %v2224_v19 = vshll.u32 %v5533_v8, 16  ;;  %v1381_v20 = vsel %vm6166_vm7, %v5383_v3, %v1380_v54 }
  0x38   : > { %v2208_v45 = vrot.slane %v2206_v29, 5  ;;  %v2212_v46 = vrot.slane %v2210_v30, 4  ;;  %v1384_v21 = vsel %vm6166_vm7, %v1382_v4, %v1383_v5  ;;  %v987_v29 = vunpack.c.l.b16 %v647_v17  ;;  %v553_v30 = vld [vmem:[%s6108_s6 + $0x20] sm:$0x1] }
  0x39   : > { %v631_v50 = vor.u32 %v630_v36, %v627_v35  ;;  %v1485_v33 = vunpack.c.l.b16 %v1381_v20  ;;  %v1486_v34 = vunpack.c.l.b16 %v1384_v21  ;;  %v1275_v35 = vld [vmem:[%s6108_s6 + $0x1c] sm:$0xf]  ;;  %v2223_v36 = vrot.slane %v2221_v18, 4 }
  0x3a   : > { %v2209_v26 = vsel %vm6160_vm6, %v2204_v6, %v2208_v45  ;;  %v2232_v40 = vrot.slane %v2230_v22, 5  ;;  %v2236_v41 = vrot.slane %v2234_v23, 4  ;;  %v668_v43 = vshll.u32 %v553_v30, 16  ;;  %v1278_v30 = vld [vmem:[%s6108_s6 + $0x28] sm:$0xf] }
  0x3b   : > { %v632_v62 = vrot.slane %v631_v50, 4  ;;  %v2558_v38 = vunpack.c.l.b16 %v2209_v26  ;;  %v1276_v50 = vld [vmem:[%s6108_s6 + $0x20] sm:$0x1] }
  0x3c   : > { %v2237_v54 = vor.u32 %v2236_v41, %v2232_v40  ;;  %v670_v57 = vrot.slane %v668_v43, 5  ;;  %v5953_v43 = vld [vmem:[%s6108_s6 + $0x24] sm:$0xff] }
  0x3d   : > { %v637_v16 = vsel %vm6160_vm6, %v632_v62, %v636_v37  ;;  %v2226_v37 = vrot.slane %v2224_v19, 5 }
  0x3e   : > { %v986_v28 = vunpack.c.l.b16 %v637_v16  ;;  %v2238_v1 = vrot.slane %v2237_v54, 4 }
  0x3f   : > { %v2227_v51 = vor.u32 %v2226_v37, %v2223_v36 }
  0x41   : > { %v2228_v62 = vrot.slane %v2227_v51, 4  ;;  %v557_v51 = vld [vmem:[%s6108_s6 + $0x30] sm:$0xf] }
  0x43   : > { %v2233_v15 = vsel %vm6160_vm6, %v2228_v62, %v2232_v40  ;;  %v700_v62 = vshll.u32 %v557_v51, 16 }
  0x44   : > { %5355 = vmatmul.msk.bf16.gmra.mxu1 %vm371_vm1, %v5942_v48  ;;  %5359 = vmatmul.msk.bf16.gmra.mxu2 %vm371_vm1, %v5946_v53  ;;  %v5532_v48 = vld [vmem:[%s6108_s6 + $0x20] sm:$0x1]  ;;  %v5951_v53 = vld [vmem:[%s6108_s6 + $0xc] sm:$0xff] }
  0x45   : > { %5363 = vmatmul.msk.bf16.gmra.mxu3 %vm371_vm1, %v5950_v59  ;;  %5351 = vmatmul.msk.bf16.gmra.mxu0 %vm371_vm1, %v5938_v61  ;;  %v2213_v59 = vor.u32 %v2212_v46, %v2208_v45  ;;  %v2216_v60 = vshll.u32 %v5532_v48, 16  ;;  %v551_v61 = vld [vmem:[%s6108_s6 + $0x18] sm:$0xf]  ;;  %v665_v45 = vor.u32 %v664_v32, %v660_v31  ;;  %v1387_v46 = vrot.slane %v1275_v35, 5 }
  0x46   : > { %v649_v9 = vshrl.u32 %v551_v61, 16  ;;  %v652_v10 = vshll.u32 %v551_v61, 16  ;;  %v1516_v48 = vpack.c.b16 %v1486_v34, %v1485_v33  ;;  %v1390_v61 = vrot.slane %v1276_v50, 5  ;;  %v5538_v33 = vld [vmem:[%s6108_s6 + $0x38] sm:$0x1] }
  0x47   : > { %v2214_v11 = vrot.slane %v2213_v59, 4  ;;  %v2218_v12 = vrot.slane %v2216_v60, 5  ;;  %v666_v58 = vrot.slane %v665_v45, 4  ;;  %v1389_v60 = vrot.slane %v1387_v46, 4 }
  0x48   : > { %v651_v24 = vrot.slane %v649_v9, 4  ;;  %v654_v25 = vrot.slane %v652_v10, 5  ;;  %v5536_v9 = vld [vmem:[%s6108_s6 + $0x30] sm:$0xf]  ;;  %v5537_v10 = vld [vmem:[%s6108_s6 + $0x34] sm:$0xf] }
  0x49   : > { %v2219_v27 = vsel %vm6160_vm6, %v2214_v11, %v2218_v12  ;;  %v671_v5 = vsel %vm6160_vm6, %v666_v58, %v670_v57  ;;  %v1391_v8 = vsel %vm6166_vm7, %v1389_v60, %v1390_v61  ;;  %v673_v11 = vshrl.u32 %v554_v63, 16  ;;  %v5539_v60 = vld [vmem:[%s6108_s6 + $0x3c] sm:$0xf] }
  0x4a   : > { %v2559_v39 = vunpack.c.l.b16 %v2219_v27  ;;  %v655_v42 = vor.u32 %v654_v25, %v651_v24  ;;  %v676_v12 = vshll.u32 %v554_v63, 16  ;;  %v2245_v17 = vshrl.u32 %v5536_v9, 16 }
  0x4b   : > { %v2248_v18 = vshll.u32 %v5536_v9, 16  ;;  %v2254_v19 = vshll.u32 %v5537_v10, 16  ;;  %v2258_v20 = vshrl.u32 %v5537_v10, 16  ;;  %v989_v22 = vunpack.c.l.b16 %v671_v5 }
  0x4c   : > { %v656_v56 = vrot.slane %v655_v42, 4  ;;  %v1488_v24 = vunpack.c.l.b16 %v1391_v8  ;;  %v675_v25 = vrot.slane %v673_v11, 4  ;;  %v678_v26 = vrot.slane %v676_v12, 5 }
  0x4d   : > { %v684_v27 = vrot.slane %v682_v13, 5  ;;  %v2247_v34 = vrot.slane %v2245_v17, 4  ;;  %v2250_v35 = vrot.slane %v2248_v18, 5  ;;  %v2256_v36 = vrot.slane %v2254_v19, 5 }
  0x4e   : > { %v661_v4 = vsel %vm6160_vm6, %v656_v56, %v660_v31  ;;  %v2560_v31 = vunpack.c.l.b16 %v2233_v15  ;;  %v2260_v37 = vrot.slane %v2258_v20, 4  ;;  %v679_v40 = vor.u32 %v678_v26, %v675_v25  ;;  %v1281_v25 = vld [vmem:[%s6108_s6 + $0x34] sm:$0xf] }
  0x4f   : > { %v988_v21 = vunpack.c.l.b16 %v661_v4  ;;  %v697_v61 = vshrl.u32 %v557_v51, 16  ;;  %v2269_v8 = vshrl.u32 %v5539_v60, 16  ;;  %v2272_v9 = vshll.u32 %v5539_v60, 16 }
  0x50   : > { %v2261_v50 = vor.u32 %v2260_v37, %v2256_v36  ;;  %v702_v15 = vrot.slane %v700_v62, 5 }
  0x51   : > { %v2271_v26 = vrot.slane %v2269_v8, 4 }
  0x52   : > { %v2262_v0 = vrot.slane %v2261_v50, 4 }
  0x54   : > { %5365 = vmatmul.msk.bf16.vlgmr.msrb.gmra.mxu1 %vm371_vm1, %v1016_v47  ;;  %5398 = vmatmul.msk.bf16.vlgmr.msrb.gmra.mxu2 %vm371_vm1, %v1515_v49  ;;  %v1017_v47 = vpack.c.b16 %v987_v29, %v986_v28  ;;  %v1274_v49 = vld [vmem:[%s6108_s6 + $0x18] sm:$0xe]  ;;  %v688_v28 = vrot.slane %v686_v14, 4  ;;  %v556_v29 = vld [vmem:[%s6108_s6 + $0x2c] sm:$0x1]  ;;  %v699_v14 = vrot.slane %v697_v61, 4 }
  0x55   : > { %5511 = vmatmul.msk.bf16.vlgmr.msrb.gmra.mxu3 %vm371_vm1, %v5951_v53  ;;  %5576 = vmatmul.msk.bf16.vlgmr.msrb.gmra.mxu0 %vm371_vm1, %v2588_v55  ;;  %v2589_v53 = vpack.c.b16 %v2559_v39, %v2558_v38  ;;  %v2240_v55 = vshll.u32 %v5535_v44, 16  ;;  %v5384_v59 = vrot.slane %v1274_v49, 9  ;;  %v1018_v38 = vpack.c.b16 %v989_v22, %v988_v21 }
  0x56   : > { %v689_v41 = vor.u32 %v688_v28, %v684_v27  ;;  %v692_v42 = vshll.u32 %v556_v29, 16  ;;  %v1394_v44 = vrot.slane %v1278_v30, 5  ;;  %v2251_v49 = vor.u32 %v2250_v35, %v2247_v34  ;;  %v5541_v30 = vld [vmem:[%s6108_s6 + $0x44] sm:$0x1] }
  0x57   : > { %v2242_v3 = vrot.slane %v2240_v55, 5  ;;  %v1388_v6 = vsel %vm6166_vm7, %v5384_v59, %v1387_v46  ;;  %v2264_v46 = vshll.u32 %v5538_v33, 16  ;;  %v558_v55 = vld [vmem:[%s6108_s6 + $0x34] sm:$0xf]  ;;  %v703_v33 = vor.u32 %v702_v15, %v699_v14 }
  0x58   : > { %v1487_v23 = vunpack.c.l.b16 %v1388_v6  ;;  %v694_v54 = vrot.slane %v692_v42, 5  ;;  %v1396_v57 = vrot.slane %v1394_v44, 4  ;;  %v2252_v63 = vrot.slane %v2251_v49, 4  ;;  %v5954_v42 = vld [vmem:[%s6108_s6 + $0x30] sm:$0xff] }
  0x59   : > { %v2243_v16 = vsel %vm6160_vm6, %v2238_v1, %v2242_v3  ;;  %v2266_v59 = vrot.slane %v2264_v46, 5  ;;  %v5540_v1 = vld [vmem:[%s6108_s6 + $0x40] sm:$0xf]  ;;  %v706_v3 = vshll.u32 %v558_v55, 16  ;;  %v710_v4 = vshrl.u32 %v558_v55, 16 }
  0x5a   : > { %v2561_v32 = vunpack.c.l.b16 %v2243_v16  ;;  %v1517_v39 = vpack.c.b16 %v1488_v24, %v1487_v23  ;;  %v2278_v12 = vshll.u32 %v5540_v1, 16  ;;  %v2282_v13 = vshrl.u32 %v5540_v1, 16  ;;  %v559_v24 = vld [vmem:[%s6108_s6 + $0x38] sm:$0x1] }
  0x5b   : > { %v2257_v16 = vsel %vm6160_vm6, %v2252_v63, %v2256_v36  ;;  %v2267_v17 = vsel %vm6160_vm6, %v2262_v0, %v2266_v59  ;;  %v708_v20 = vrot.slane %v706_v3, 5  ;;  %v712_v21 = vrot.slane %v710_v4, 4  ;;  %v5542_v63 = vld [vmem:[%s6108_s6 + $0x48] sm:$0xf]  ;;  %v5543_v0 = vld [vmem:[%s6108_s6 + $0x4c] sm:$0xf] }
  0x5c   : > { %v2590_v45 = vpack.c.b16 %v2561_v32, %v2560_v31  ;;  %v2562_v28 = vunpack.c.l.b16 %v2257_v16  ;;  %v2563_v29 = vunpack.c.l.b16 %v2267_v17  ;;  %v2280_v31 = vrot.slane %v2278_v12, 5 }
  0x5d   : > { %v2284_v32 = vrot.slane %v2282_v13, 4  ;;  %v713_v34 = vor.u32 %v712_v21, %v708_v20  ;;  %v716_v35 = vshll.u32 %v559_v24, 16  ;;  %v1401_v36 = vrot.slane %v1281_v25, 5 }
  0x5e   : > { %v2296_v12 = vshll.u32 %v5542_v63, 16  ;;  %v2302_v13 = vshll.u32 %v5543_v0, 16  ;;  %v2306_v14 = vshrl.u32 %v5543_v0, 16 }
  0x5f   : > { %v2285_v46 = vor.u32 %v2284_v32, %v2280_v31  ;;  %v714_v49 = vrot.slane %v713_v34, 4  ;;  %v718_v50 = vrot.slane %v716_v35, 5  ;;  %v1283_v34 = vld [vmem:[%s6108_s6 + $0x3c] sm:$0xe]  ;;  %v1285_v35 = vld [vmem:[%s6108_s6 + $0x44] sm:$0x1] }
  0x61   : > { %v2286_v60 = vrot.slane %v2285_v46, 4  ;;  %v719_v62 = vsel %vm6160_vm6, %v714_v49, %v718_v50  ;;  %v5387_v46 = vrot.slane %v1283_v34, 9  ;;  %v563_v49 = vld [vmem:[%s6108_s6 + $0x48] sm:$0xf]  ;;  %v564_v50 = vld [vmem:[%s6108_s6 + $0x4c] sm:$0xf] }
  0x62   : > { %v993_v16 = vunpack.c.l.b16 %v719_v62  ;;  %v745_v62 = vshrl.u32 %v563_v49, 16  ;;  %v754_v0 = vshll.u32 %v564_v50, 16 }
  0x64   : > { %5366 = vmatmul.msk.bf16.gmra.mxu1 %vm371_vm1, %v1017_v47  ;;  %5399 = vmatmul.msk.bf16.gmra.mxu2 %vm371_vm1, %v1516_v48  ;;  %v1277_v47 = vld [vmem:[%s6108_s6 + $0x24] sm:$0xe]  ;;  %v1279_v48 = vld [vmem:[%s6108_s6 + $0x2c] sm:$0x1] }
  0x65   : > { %5512 = vmatmul.msk.bf16.gmra.mxu3 %vm371_vm1, %v5952_v52  ;;  %5577 = vmatmul.msk.bf16.gmra.mxu0 %vm371_vm1, %v2589_v53  ;;  %v680_v52 = vrot.slane %v679_v40, 4  ;;  %v690_v53 = vrot.slane %v689_v41, 4  ;;  %v5385_v56 = vrot.slane %v1277_v47, 9  ;;  %v1397_v58 = vrot.slane %v1279_v48, 5  ;;  %v561_v48 = vld [vmem:[%s6108_s6 + $0x40] sm:$0xf] }
  0x66   : > { %v2288_v41 = vshll.u32 %v5541_v30, 16  ;;  %v704_v47 = vrot.slane %v703_v33, 4  ;;  %v734_v59 = vshrl.u32 %v561_v48, 16 }
  0x67   : > { %v685_v5 = vsel %vm6160_vm6, %v680_v52, %v684_v27  ;;  %v695_v6 = vsel %vm6160_vm6, %v690_v53, %v694_v54  ;;  %v1395_v10 = vsel %vm6166_vm7, %v5385_v56, %v1394_v44  ;;  %v1398_v11 = vsel %vm6166_vm7, %v1396_v57, %v1397_v58 }
  0x68   : > { %v990_v18 = vunpack.c.l.b16 %v685_v5  ;;  %v991_v19 = vunpack.c.l.b16 %v695_v6  ;;  %v1489_v22 = vunpack.c.l.b16 %v1395_v10  ;;  %v1490_v23 = vunpack.c.l.b16 %v1398_v11 }
  0x69   : > { %v2274_v27 = vrot.slane %v2272_v9, 5  ;;  %v2591_v44 = vpack.c.b16 %v2563_v29, %v2562_v28  ;;  %v1403_v52 = vrot.slane %v1401_v36, 4  ;;  %v2290_v56 = vrot.slane %v2288_v41, 5 }
  0x6a   : > { %v1019_v37 = vpack.c.b16 %v991_v19, %v990_v18  ;;  %v730_v58 = vshll.u32 %v561_v48, 16  ;;  %v709_v61 = vsel %vm6160_vm6, %v704_v47, %v708_v20  ;;  %v736_v9 = vrot.slane %v734_v59, 4  ;;  %v562_v19 = vld [vmem:[%s6108_s6 + $0x44] sm:$0x1]  ;;  %v1284_v20 = vld [vmem:[%s6108_s6 + $0x40] sm:$0xf] }
  0x6b   : > { %v2275_v40 = vor.u32 %v2274_v27, %v2271_v26  ;;  %v2291_v10 = vsel %vm6160_vm6, %v2286_v60, %v2290_v56  ;;  %v2293_v11 = vshrl.u32 %v5542_v63, 16  ;;  %v992_v15 = vunpack.c.l.b16 %v709_v61  ;;  %v5546_v60 = vld [vmem:[%s6108_s6 + $0x58] sm:$0xf] }
  0x6c   : > { %v6294_v8 = vrot.slane %v730_v58, 5  ;;  %v2565_v24 = vunpack.c.l.b16 %v2291_v10  ;;  %v2298_v26 = vrot.slane %v2296_v12, 5  ;;  %v6302_v27 = vrot.slane %v2302_v13, 5 }
  0x6d   : > { %v2276_v55 = vrot.slane %v2275_v40, 4  ;;  %v2295_v25 = vrot.slane %v2293_v11, 4  ;;  %v2308_v28 = vrot.slane %v2306_v14, 4  ;;  %v740_v29 = vshll.u32 %v562_v19, 16 }
  0x6e   : > { %v1408_v30 = vrot.slane %v1284_v20, 5  ;;  %v1020_v32 = vpack.c.b16 %v993_v16, %v992_v15  ;;  %v1411_v48 = vrot.slane %v1285_v35, 5  ;;  %v748_v63 = vshll.u32 %v563_v49, 16  ;;  %v565_v20 = vld [vmem:[%s6108_s6 + $0x50] sm:$0x1] }
  0x6f   : > { %v2281_v5 = vsel %vm6160_vm6, %v2276_v55, %v2280_v31  ;;  %v5544_v31 = vld [vmem:[%s6108_s6 + $0x50] sm:$0x1]  ;;  %v2326_v10 = vshll.u32 %v5546_v60, 16  ;;  %v2330_v11 = vshrl.u32 %v5546_v60, 16  ;;  %v747_v16 = vrot.slane %v745_v62, 4 }
  0x70   : > { %v1410_v47 = vrot.slane %v1408_v30, 4  ;;  %v1409_v58 = vsel %vm6166_vm7, %v5387_v46, %v1408_v30  ;;  %v5547_v30 = vld [vmem:[%s6108_s6 + $0x5c] sm:$0x1]  ;;  %v764_v35 = vshll.u32 %v565_v20, 16 }
  0x71   : > { %v1493_v14 = vunpack.c.l.b16 %v1409_v58  ;;  %v2336_v46 = vshll.u32 %v5547_v30, 16 }
  0x72   : > { %v1412_v59 = vsel %vm6166_vm7, %v1410_v47, %v1411_v48  ;;  %v566_v47 = vld [vmem:[%s6108_s6 + $0x54] sm:$0xf] }
  0x73   : > { %v1494_v15 = vunpack.c.l.b16 %v1412_v59  ;;  %v772_v58 = vshll.u32 %v566_v47, 16  ;;  %v2338_v60 = vrot.slane %v2336_v46, 5 }
  0x74   : > { %5367 = vmatmul.msk.bf16.gmra.mxu1 %vm371_vm1, %v1018_v38  ;;  %5400 = vmatmul.msk.bf16.gmra.mxu2 %vm371_vm1, %v1517_v39  ;;  %v1518_v38 = vpack.c.b16 %v1490_v23, %v1489_v22  ;;  %v1280_v39 = vld [vmem:[%s6108_s6 + $0x30] sm:$0xe]  ;;  %v737_v22 = vor.u32 %v736_v9, %v6294_v8  ;;  %v2564_v23 = vunpack.c.l.b16 %v2281_v5 }
  0x75   : > { %5513 = vmatmul.msk.bf16.gmra.mxu3 %vm371_vm1, %v5953_v43  ;;  %5578 = vmatmul.msk.bf16.gmra.mxu0 %vm371_vm1, %v2590_v45  ;;  %v1282_v43 = vld [vmem:[%s6108_s6 + $0x38] sm:$0x1]  ;;  %v560_v45 = vld [vmem:[%s6108_s6 + $0x3c] sm:$0xf]  ;;  %v5386_v51 = vrot.slane %v1280_v39, 9 }
  0x76   : > { %v1404_v53 = vrot.slane %v1282_v43, 5  ;;  %v721_v54 = vshrl.u32 %v560_v45, 16  ;;  %v724_v57 = vshll.u32 %v560_v45, 16  ;;  %v2592_v39 = vpack.c.b16 %v2565_v24, %v2564_v23 }
  0x77   : > { %v1402_v1 = vsel %vm6166_vm7, %v5386_v51, %v1401_v36  ;;  %v738_v40 = vrot.slane %v737_v22, 4  ;;  %v2309_v43 = vor.u32 %v2308_v28, %v6302_v27  ;;  %v742_v45 = vrot.slane %v740_v29, 5 }
  0x78   : > { %v1405_v3 = vsel %vm6166_vm7, %v1403_v52, %v1404_v53  ;;  %v723_v4 = vrot.slane %v721_v54, 4  ;;  %v726_v6 = vrot.slane %v724_v57, 5  ;;  %v1491_v17 = vunpack.c.l.b16 %v1402_v1  ;;  %v5545_v54 = vld [vmem:[%s6108_s6 + $0x54] sm:$0xf] }
  0x79   : > { %v1492_v18 = vunpack.c.l.b16 %v1405_v3  ;;  %v2310_v52 = vrot.slane %v2309_v43, 4  ;;  %v743_v57 = vsel %vm6160_vm6, %v738_v40, %v742_v45  ;;  %v758_v1 = vshrl.u32 %v564_v50, 16  ;;  %v1288_v43 = vld [vmem:[%s6108_s6 + $0x50] sm:$0x1] }
  0x7a   : > { %v727_v21 = vor.u32 %v726_v6, %v723_v4  ;;  %v2317_v4 = vshrl.u32 %v5545_v54, 16  ;;  %v2320_v5 = vshll.u32 %v5545_v54, 16  ;;  %v995_v13 = vunpack.c.l.b16 %v743_v57 }
  0x7b   : > { %v1519_v33 = vpack.c.b16 %v1492_v18, %v1491_v17  ;;  %v750_v17 = vrot.slane %v748_v63, 5  ;;  %v6344_v18 = vrot.slane %v754_v0, 5  ;;  %v760_v19 = vrot.slane %v758_v1, 4 }
  0x7c   : > { %v2319_v23 = vrot.slane %v2317_v4, 4  ;;  %v2322_v24 = vrot.slane %v2320_v5, 5  ;;  %v766_v50 = vrot.slane %v764_v35, 5  ;;  %v1418_v54 = vrot.slane %v1288_v43, 5  ;;  %v1289_v43 = vld [vmem:[%s6108_s6 + $0x54] sm:$0xe] }
  0x7d   : > { %v761_v34 = vor.u32 %v760_v19, %v6344_v18  ;;  %v769_v57 = vshrl.u32 %v566_v47, 16 }
  0x7e   : > { %v2323_v40 = vor.u32 %v2322_v24, %v2319_v23 }
  0x7f   : > { %v762_v49 = vrot.slane %v761_v34, 4 }
  0x81   : > { %v767_v4 = vsel %vm6160_vm6, %v762_v49, %v766_v50  ;;  %v1291_v49 = vld [vmem:[%s6108_s6 + $0x5c] sm:$0x1] }
  0x82   : > { %v997_v20 = vunpack.c.l.b16 %v767_v4 }
  0x84   : > { %5368 = vmatmul.msk.bf16.gmra.mxu1 %vm371_vm1, %v1019_v37  ;;  %5401 = vmatmul.msk.bf16.gmra.mxu2 %vm371_vm1, %v1518_v38  ;;  %v5955_v37 = vld [vmem:[%s6108_s6 + $0x3c] sm:$0xff]  ;;  %v728_v38 = vrot.slane %v727_v21, 4 }
  0x85   : > { %5514 = vmatmul.msk.bf16.gmra.mxu3 %vm371_vm1, %v5954_v42  ;;  %5579 = vmatmul.msk.bf16.gmra.mxu0 %vm371_vm1, %v2591_v44  ;;  %v2299_v42 = vor.u32 %v2298_v26, %v2295_v25  ;;  %v2312_v44 = vshll.u32 %v5544_v31, 16  ;;  %v1287_v25 = vld [vmem:[%s6108_s6 + $0x4c] sm:$0xf]  ;;  %v6348_v26 = vrot.slane %v2326_v10, 5  ;;  %v1520_v31 = vpack.c.b16 %v1494_v15, %v1493_v14 }
  0x86   : > { %v733_v56 = vsel %vm6160_vm6, %v728_v38, %v6294_v8  ;;  %v1415_v38 = vrot.slane %v1287_v25, 5  ;;  %v771_v15 = vrot.slane %v769_v57, 4  ;;  %v568_v25 = vld [vmem:[%s6108_s6 + $0x5c] sm:$0x1] }
  0x87   : > { %v2300_v51 = vrot.slane %v2299_v42, 4  ;;  %v2314_v53 = vrot.slane %v2312_v44, 5  ;;  %v994_v12 = vunpack.c.l.b16 %v733_v56  ;;  %v1286_v42 = vld [vmem:[%s6108_s6 + $0x48] sm:$0xe]  ;;  %v5548_v56 = vld [vmem:[%s6108_s6 + $0x60] sm:$0xf] }
  0x88   : > { %v2341_v5 = vshrl.u32 %v5548_v56, 16 }
  0x89   : > { %v2305_v8 = vsel %vm6160_vm6, %v2300_v51, %v6302_v27  ;;  %v2315_v9 = vsel %vm6160_vm6, %v2310_v52, %v2314_v53  ;;  %v2332_v27 = vrot.slane %v2330_v11, 4  ;;  %v1021_v29 = vpack.c.b16 %v995_v13, %v994_v12  ;;  %v567_v51 = vld [vmem:[%s6108_s6 + $0x58] sm:$0xf] }
  0x8a   : > { %v2566_v21 = vunpack.c.l.b16 %v2305_v8  ;;  %v2567_v22 = vunpack.c.l.b16 %v2315_v9  ;;  %v5388_v52 = vrot.slane %v1286_v42, 9  ;;  %v1417_v53 = vrot.slane %v1415_v38, 4 }
  0x8b   : > { %v2333_v45 = vor.u32 %v2332_v27, %v6348_v26  ;;  %v778_v63 = vshll.u32 %v567_v51, 16  ;;  %v782_v0 = vshrl.u32 %v567_v51, 16  ;;  %v2344_v8 = vshll.u32 %v5548_v56, 16  ;;  %v1290_v27 = vld [vmem:[%s6108_s6 + $0x58] sm:$0xf] }
  0x8c   : > { %v1416_v10 = vsel %vm6166_vm7, %v5388_v52, %v1415_v38  ;;  %v1419_v11 = vsel %vm6166_vm7, %v1417_v53, %v1418_v54  ;;  %v1422_v38 = vrot.slane %v1290_v27, 5  ;;  %v569_v51 = vld [vmem:[%s6108_s6 + $0x60] sm:$0xf] }
  0x8d   : > { %v2334_v59 = vrot.slane %v2333_v45, 4  ;;  %v1495_v23 = vunpack.c.l.b16 %v1416_v10  ;;  %v1496_v24 = vunpack.c.l.b16 %v1419_v11  ;;  %v5551_v10 = vld [vmem:[%s6108_s6 + $0x6c] sm:$0xf]  ;;  %v5552_v11 = vld [vmem:[%s6108_s6 + $0x70] sm:$0xf] }
  0x8e   : > { %v2368_v27 = vshll.u32 %v5551_v10, 16 }
  0x91   : > { %v453_v36 = vpop.f32.mrf.mxu1 }
  0x92   : > { %521 = vst [vmem:[%s6307_s21 + $0x40] sm:$0xff] %v453_v36  ;;  %v6314_v41 = vpop.f32.mrf.mxu0 }
  0x94   : > { %5369 = vmatmul.msk.bf16.gmra.mxu1 %vm371_vm1, %v1020_v32  ;;  %5402 = vmatmul.msk.bf16.gmra.mxu2 %vm371_vm1, %v1519_v33  ;;  %v751_v33 = vor.u32 %v750_v17, %v747_v16  ;;  %v774_v16 = vrot.slane %v772_v58, 5  ;;  %v5389_v58 = vrot.slane %v1289_v43, 9 }
  0x95   : > { %5515 = vmatmul.msk.bf16.gmra.mxu3 %vm371_vm1, %v5955_v37  ;;  %5580 = vmatmul.msk.bf16.gmra.mxu0 %vm371_vm1, %v2592_v39  ;;  %v5956_v37 = vld [vmem:[%s6108_s6 + $0x48] sm:$0xff]  ;;  %v2593_v39 = vpack.c.b16 %v2567_v22, %v2566_v21  ;;  %v6388_v21 = vrot.slane %v778_v63, 5  ;;  %v784_v22 = vrot.slane %v782_v0, 4  ;;  %v796_v0 = vshll.u32 %v569_v51, 16 }
  0x96   : > { %v752_v48 = vrot.slane %v751_v33, 4  ;;  %v775_v34 = vor.u32 %v774_v16, %v771_v15 }
  0x97   : > { %v473_v55 = vpop.f32.mrf.mxu2 }
  0x98   : > { %529 = vst [vmem:[%s6307_s21 + $0x80] sm:$0xff] %v473_v55  ;;  %v493_v61 = vpop.f32.mrf.mxu3  ;;  %v2324_v55 = vrot.slane %v2323_v40, 4  ;;  %v1521_v40 = vpack.c.b16 %v1496_v24, %v1495_v23  ;;  %v776_v53 = vrot.slane %v775_v34, 4 }
  0x99   : > { %v455_v3 = vpop.f32.mrf.mxu1  ;;  %537 = vst [vmem:[%s6307_s21 + $0xc0] sm:$0xff] %v493_v61  ;;  %v5549_v61 = vld [vmem:[%s6108_s6 + $0x64] sm:$0xf] }
  0x9a   : > { %522 = vst [vmem:[%s6307_s21 + $0x48] sm:$0xff] %v455_v3  ;;  %v6337_v6 = vpop.f32.mrf.mxu0  ;;  %v757_v3 = vsel %vm6160_vm6, %v752_v48, %v6344_v18  ;;  %v2350_v12 = vshll.u32 %v5549_v61, 16  ;;  %v2354_v13 = vshrl.u32 %v5549_v61, 16  ;;  %v2329_v17 = vsel %vm6160_vm6, %v2324_v55, %v6348_v26  ;;  %v5957_v48 = vld [vmem:[%s6108_s6 + $0x54] sm:$0xff]  ;;  %v570_v55 = vld [vmem:[%s6108_s6 + $0x64] sm:$0xf] }
  0x9b   : > { %v2339_v18 = vsel %vm6160_vm6, %v2334_v59, %v2338_v60  ;;  %v996_v19 = vunpack.c.l.b16 %v757_v3  ;;  %v2568_v30 = vunpack.c.l.b16 %v2329_v17  ;;  %v1424_v59 = vrot.slane %v1422_v38, 4 }
  0x9c   : > { %v6393_v26 = vrot.slane %v2350_v12, 5  ;;  %v2356_v33 = vrot.slane %v2354_v13, 4  ;;  %v1425_v60 = vrot.slane %v1291_v49, 5  ;;  %v793_v61 = vshrl.u32 %v569_v51, 16 }
  0x9d   : > { %v806_v3 = vshrl.u32 %v570_v55, 16  ;;  %v1423_v13 = vsel %vm6166_vm7, %v5389_v58, %v1422_v38  ;;  %v1293_v38 = vld [vmem:[%s6108_s6 + $0x64] sm:$0xf] }
  0x9e   : > { %v2357_v52 = vor.u32 %v2356_v33, %v6393_v26  ;;  %v1426_v15 = vsel %vm6166_vm7, %v1424_v59, %v1425_v60  ;;  %v795_v16 = vrot.slane %v793_v61, 4  ;;  %v1294_v59 = vld [vmem:[%s6108_s6 + $0x68] sm:$0x1] }
  0x9f   : > { %v475_v28 = vpop.f32.mrf.mxu2 }
  0xa0   : > { %530 = vst [vmem:[%s6307_s21 + $0x88] sm:$0xff] %v475_v28  ;;  %v495_v32 = vpop.f32.mrf.mxu3  ;;  %v2343_v28 = vrot.slane %v2341_v5, 4  ;;  %v2358_v4 = vrot.slane %v2357_v52, 4 }
  0xa1   : > { %v458_v36 = vpop.f32.mrf.mxu1  ;;  %538 = vst [vmem:[%s6307_s21 + $0xc8] sm:$0xff] %v495_v32  ;;  %v5550_v32 = vld [vmem:[%s6108_s6 + $0x68] sm:$0x1] }
  0xa2   : > { %523 = vst [vmem:[%s6307_s21 + $0x50] sm:$0xff] %v458_v36  ;;  %v6358_v44 = vpop.f32.mrf.mxu0  ;;  %v785_v36 = vor.u32 %v784_v22, %v6388_v21  ;;  %v2360_v46 = vshll.u32 %v5550_v32, 16  ;;  %v808_v22 = vrot.slane %v806_v3, 4  ;;  %v1497_v32 = vunpack.c.l.b16 %v1423_v13 }
  0xa4   : > { %5370 = vmatmul.msk.bf16.gmra.mxu1 %vm371_vm1, %v1021_v29  ;;  %5403 = vmatmul.msk.bf16.gmra.mxu2 %vm371_vm1, %v1520_v31  ;;  %v2346_v29 = vrot.slane %v2344_v8, 5  ;;  %v2569_v31 = vunpack.c.l.b16 %v2339_v18  ;;  %v786_v56 = vrot.slane %v785_v36, 4  ;;  %v2362_v63 = vrot.slane %v2360_v46, 5  ;;  %v5553_v46 = vld [vmem:[%s6108_s6 + $0x74] sm:$0x1] }
  0xa5   : > { %5516 = vmatmul.msk.bf16.gmra.mxu3 %vm371_vm1, %v5956_v37  ;;  %5581 = vmatmul.msk.bf16.gmra.mxu0 %vm371_vm1, %v2593_v39  ;;  %v788_v37 = vshll.u32 %v568_v25, 16  ;;  %v1022_v39 = vpack.c.b16 %v997_v20, %v996_v19  ;;  %v781_v8 = vsel %vm6160_vm6, %v776_v53, %v6388_v21  ;;  %v571_v19 = vld [vmem:[%s6108_s6 + $0x68] sm:$0x1]  ;;  %v798_v20 = vrot.slane %v796_v0, 5  ;;  %v572_v0 = vld [vmem:[%s6108_s6 + $0x6c] sm:$0xf] }
  0xa6   : > { %v2347_v45 = vor.u32 %v2346_v29, %v2343_v28  ;;  %v2594_v50 = vpack.c.b16 %v2569_v31, %v2568_v30  ;;  %v2363_v23 = vsel %vm6160_vm6, %v2358_v4, %v2362_v63  ;;  %v2365_v25 = vshrl.u32 %v5551_v10, 16 }
  0xa7   : > { %v478_v62 = vpop.f32.mrf.mxu2  ;;  %v790_v57 = vrot.slane %v788_v37, 5  ;;  %v2374_v28 = vshll.u32 %v5552_v11, 16  ;;  %v2378_v29 = vshrl.u32 %v5552_v11, 16  ;;  %v998_v30 = vunpack.c.l.b16 %v781_v8 }
  0xa8   : > { %531 = vst [vmem:[%s6307_s21 + $0x90] sm:$0xff] %v478_v62  ;;  %v498_v1 = vpop.f32.mrf.mxu3  ;;  %v2348_v62 = vrot.slane %v2347_v45, 4  ;;  %v799_v34 = vor.u32 %v798_v20, %v795_v16  ;;  %v812_v36 = vshll.u32 %v571_v19, 16  ;;  %v2571_v37 = vunpack.c.l.b16 %v2363_v23  ;;  %v5555_v20 = vld [vmem:[%s6108_s6 + $0x7c] sm:$0xf] }
  0xa9   : > { %v460_v9 = vpop.f32.mrf.mxu1  ;;  %539 = vst [vmem:[%s6307_s21 + $0xd0] sm:$0xff] %v498_v1  ;;  %v802_v1 = vshll.u32 %v570_v55, 16  ;;  %v2380_v43 = vrot.slane %v2378_v29, 4  ;;  %v1292_v55 = vld [vmem:[%s6108_s6 + $0x60] sm:$0xe]  ;;  %v2384_v63 = vshll.u32 %v5553_v46, 16 }
  0xaa   : > { %524 = vst [vmem:[%s6307_s21 + $0x58] sm:$0xff] %v460_v9  ;;  %v6381_v14 = vpop.f32.mrf.mxu0  ;;  %v791_v9 = vsel %vm6160_vm6, %v786_v56, %v790_v57  ;;  %v2353_v17 = vsel %vm6160_vm6, %v2348_v62, %v6393_v26  ;;  %v1498_v26 = vunpack.c.l.b16 %v1426_v15  ;;  %v800_v52 = vrot.slane %v799_v34, 4 }
  0xab   : > { %v6428_v21 = vrot.slane %v802_v1, 5  ;;  %v999_v31 = vunpack.c.l.b16 %v791_v9  ;;  %v2570_v33 = vunpack.c.l.b16 %v2353_v17  ;;  %v1429_v56 = vrot.slane %v1293_v38, 5  ;;  %v573_v1 = vld [vmem:[%s6108_s6 + $0x70] sm:$0xf]  ;;  %v5554_v9 = vld [vmem:[%s6108_s6 + $0x78] sm:$0xf] }
  0xac   : > { %v814_v58 = vrot.slane %v812_v36, 5  ;;  %v5390_v4 = vrot.slane %v1292_v55, 9  ;;  %v1432_v8 = vrot.slane %v1294_v59, 5  ;;  %v2386_v13 = vrot.slane %v2384_v63, 5 }
  0xad   : > { %v2595_v57 = vpack.c.b16 %v2571_v37, %v2570_v33  ;;  %v805_v3 = vsel %vm6160_vm6, %v800_v52, %v6428_v21  ;;  %v817_v16 = vshrl.u32 %v572_v0, 16  ;;  %v820_v17 = vshll.u32 %v572_v0, 16  ;;  %v5959_v0 = vld [vmem:[%s6108_s6 + $0x6c] sm:$0xff] }
  0xae   : > { %v830_v19 = vshrl.u32 %v573_v1, 16  ;;  %v2392_v23 = vshll.u32 %v5554_v9, 16  ;;  %v1430_v29 = vsel %vm6166_vm7, %v5390_v4, %v1429_v56  ;;  %v2398_v33 = vshll.u32 %v5555_v20, 16 }
  0xaf   : > { %v480_v35 = vpop.f32.mrf.mxu2  ;;  %v2402_v34 = vshrl.u32 %v5555_v20, 16  ;;  %v822_v36 = vrot.slane %v820_v17, 5 }
  0xb0   : > { %532 = vst [vmem:[%s6307_s21 + $0x98] sm:$0xff] %v480_v35  ;;  %v500_v42 = vpop.f32.mrf.mxu3  ;;  %v809_v35 = vor.u32 %v808_v22, %v6428_v21  ;;  %v2389_v22 = vshrl.u32 %v5554_v9, 16  ;;  %v832_v38 = vrot.slane %v830_v19, 4  ;;  %v2394_v46 = vrot.slane %v2392_v23, 5 }
  0xb1   : > { %v463_v47 = vpop.f32.mrf.mxu1  ;;  %540 = vst [vmem:[%s6307_s21 + $0xd8] sm:$0xff] %v500_v42  ;;  %v6437_v42 = vrot.slane %v2374_v28, 5 }
  0xb2   : > { %525 = vst [vmem:[%s6307_s21 + $0x60] sm:$0xff] %v463_v47  ;;  %v6404_v54 = vpop.f32.mrf.mxu0  ;;  %v1023_v47 = vpack.c.b16 %v999_v31, %v998_v30  ;;  %v810_v53 = vrot.slane %v809_v35, 4  ;;  %v819_v35 = vrot.slane %v817_v16, 4 }
  0xb3   : > { %v2381_v62 = vor.u32 %v2380_v43, %v6437_v42  ;;  %v574_v43 = vld [vmem:[%s6108_s6 + $0x74] sm:$0x1] }
  0xb4   : > { %5371 = vmatmul.msk.bf16.gmra.mxu1 %vm371_vm1, %v1022_v39  ;;  %5404 = vmatmul.msk.bf16.gmra.mxu2 %vm371_vm1, %v1521_v40  ;;  %v2367_v39 = vrot.slane %v2365_v25, 4  ;;  %v2370_v40 = vrot.slane %v2368_v27, 5  ;;  %v815_v10 = vsel %vm6160_vm6, %v810_v53, %v814_v58  ;;  %v1000_v27 = vunpack.c.l.b16 %v805_v3  ;;  %v1297_v3 = vld [vmem:[%s6108_s6 + $0x74] sm:$0x1] }
  0xb5   : > { %5517 = vmatmul.msk.bf16.gmra.mxu3 %vm371_vm1, %v5957_v48  ;;  %5582 = vmatmul.msk.bf16.gmra.mxu0 %vm371_vm1, %v2594_v50  ;;  %v1522_v48 = vpack.c.b16 %v1498_v26, %v1497_v32  ;;  %v5958_v50 = vld [vmem:[%s6108_s6 + $0x60] sm:$0xff]  ;;  %v1001_v28 = vunpack.c.l.b16 %v815_v10  ;;  %v823_v52 = vor.u32 %v822_v36, %v819_v35  ;;  %v836_v55 = vshll.u32 %v574_v43, 16 }
  0xb6   : > { %v2371_v61 = vor.u32 %v2370_v40, %v2367_v39  ;;  %v1499_v39 = vunpack.c.l.b16 %v1430_v29  ;;  %v1439_v17 = vrot.slane %v1297_v3, 5  ;;  %v1299_v3 = vld [vmem:[%s6108_s6 + $0x7c] sm:$0xf] }
  0xb7   : > { %v483_v5 = vpop.f32.mrf.mxu2 }
  0xb8   : > { %533 = vst [vmem:[%s6307_s21 + $0xa0] sm:$0xff] %v483_v5  ;;  %v503_v12 = vpop.f32.mrf.mxu3  ;;  %v1431_v5 = vrot.slane %v1429_v56, 4  ;;  %v2372_v11 = vrot.slane %v2371_v61, 4  ;;  %v5556_v56 = vld [vmem:[%s6108_s6 + $0x80] sm:$0x1] }
  0xb9   : > { %v465_v18 = vpop.f32.mrf.mxu1  ;;  %541 = vst [vmem:[%s6307_s21 + $0xe0] sm:$0xff] %v503_v12  ;;  %v2382_v12 = vrot.slane %v2381_v62, 4  ;;  %v2408_v10 = vshll.u32 %v5556_v56, 16 }
  0xba   : > { %526 = vst [vmem:[%s6307_s21 + $0x68] sm:$0xff] %v465_v18  ;;  %v6433_v24 = vpop.f32.mrf.mxu0  ;;  %v826_v18 = vshll.u32 %v573_v1, 16  ;;  %v1433_v30 = vsel %vm6166_vm7, %v1431_v5, %v1432_v8  ;;  %v2377_v32 = vsel %vm6160_vm6, %v2372_v11, %v6437_v42  ;;  %v1295_v1 = vld [vmem:[%s6108_s6 + $0x6c] sm:$0xe]  ;;  %v575_v8 = vld [vmem:[%s6108_s6 + $0x78] sm:$0xf] }
  0xbb   : > { %v2387_v26 = vsel %vm6160_vm6, %v2382_v12, %v2386_v13  ;;  %v1500_v40 = vunpack.c.l.b16 %v1433_v30  ;;  %v824_v11 = vrot.slane %v823_v52, 4  ;;  %v838_v13 = vrot.slane %v836_v55, 5 }
  0xbc   : > { %v6476_v37 = vrot.slane %v826_v18, 5  ;;  %v2573_v42 = vunpack.c.l.b16 %v2387_v26  ;;  %v576_v18 = vld [vmem:[%s6108_s6 + $0x7c] sm:$0xf]  ;;  %v841_v20 = vshrl.u32 %v575_v8, 16 }
  0xbd   : > { %v1523_v58 = vpack.c.b16 %v1500_v40, %v1499_v39  ;;  %v854_v26 = vshrl.u32 %v576_v18, 16 }
  0xbe   : > { %v833_v53 = vor.u32 %v832_v38, %v6476_v37  ;;  %v829_v29 = vsel %vm6160_vm6, %v824_v11, %v6476_v37  ;;  %v843_v37 = vrot.slane %v841_v20, 4  ;;  %v5559_v11 = vld [vmem:[%s6108_s6 + $0x8c] sm:$0x1]  ;;  %v1443_v20 = vrot.slane %v1299_v3, 5 }
  0xbf   : > { %v485_v45 = vpop.f32.mrf.mxu2 }
  0xc0   : > { %534 = vst [vmem:[%s6307_s21 + $0xa8] sm:$0xff] %v485_v45  ;;  %v505_v49 = vpop.f32.mrf.mxu3  ;;  %v2391_v45 = vrot.slane %v2389_v22, 4  ;;  %v834_v12 = vrot.slane %v833_v53, 4 }
  0xc1   : > { %v468_v51 = vpop.f32.mrf.mxu1  ;;  %542 = vst [vmem:[%s6307_s21 + $0xe8] sm:$0xff] %v505_v49  ;;  %v6480_v49 = vrot.slane %v2398_v33, 5  ;;  %v5558_v33 = vld [vmem:[%s6108_s6 + $0x88] sm:$0xf] }
  0xc2   : > { %527 = vst [vmem:[%s6307_s21 + $0x70] sm:$0xff] %v468_v51  ;;  %v6446_v60 = vpop.f32.mrf.mxu0  ;;  %v2395_v62 = vor.u32 %v2394_v46, %v2391_v45  ;;  %v839_v30 = vsel %vm6160_vm6, %v834_v12, %v838_v13 }
  0xc3   : > { %v1003_v52 = vunpack.c.l.b16 %v839_v30 }
  0xc4   : > { %5372 = vmatmul.msk.bf16.gmra.mxu1 %vm371_vm1, %v1023_v47  ;;  %5405 = vmatmul.msk.bf16.gmra.mxu2 %vm371_vm1, %v1522_v48  ;;  %v1296_v47 = vld [vmem:[%s6108_s6 + $0x70] sm:$0xf]  ;;  %v2572_v48 = vunpack.c.l.b16 %v2377_v32  ;;  %v2396_v19 = vrot.slane %v2395_v62, 4  ;;  %v850_v32 = vshll.u32 %v576_v18, 16 }
  0xc5   : > { %5518 = vmatmul.msk.bf16.gmra.mxu3 %vm371_vm1, %v5958_v50  ;;  %5583 = vmatmul.msk.bf16.gmra.mxu0 %vm371_vm1, %v2595_v57  ;;  %v2404_v50 = vrot.slane %v2402_v34, 4  ;;  %v1024_v57 = vpack.c.b16 %v1001_v28, %v1000_v27  ;;  %v1436_v61 = vrot.slane %v1296_v47, 5  ;;  %v5557_v27 = vld [vmem:[%s6108_s6 + $0x84] sm:$0xf] }
  0xc6   : > { %v2596_v4 = vpack.c.b16 %v2573_v42, %v2572_v48  ;;  %v2401_v38 = vsel %vm6160_vm6, %v2396_v19, %v6480_v49  ;;  %v2413_v43 = vshrl.u32 %v5557_v27, 16  ;;  %v2416_v45 = vshll.u32 %v5557_v27, 16  ;;  %v5960_v19 = vld [vmem:[%s6108_s6 + $0x78] sm:$0xff] }
  0xc7   : > { %v488_v15 = vpop.f32.mrf.mxu2  ;;  %v2405_v9 = vor.u32 %v2404_v50, %v6480_v49  ;;  %v1438_v16 = vrot.slane %v1436_v61, 4  ;;  %v2422_v42 = vshll.u32 %v5558_v33, 16  ;;  %v2426_v50 = vshrl.u32 %v5558_v33, 16 }
  0xc8   : > { %535 = vst [vmem:[%s6307_s21 + $0xb0] sm:$0xff] %v488_v15  ;;  %v508_v21 = vpop.f32.mrf.mxu3  ;;  %v5391_v15 = vrot.slane %v1295_v1, 9  ;;  %v6513_v53 = vrot.slane %v850_v32, 5  ;;  %v856_v49 = vrot.slane %v854_v26, 4 }
  0xc9   : > { %v470_v25 = vpop.f32.mrf.mxu1  ;;  %543 = vst [vmem:[%s6307_s21 + $0xf0] sm:$0xff] %v508_v21  ;;  %v844_v21 = vshll.u32 %v575_v8, 16  ;;  %v2406_v23 = vrot.slane %v2405_v9, 4  ;;  %v2428_v8 = vrot.slane %v2426_v50, 4 }
  0xca   : > { %528 = vst [vmem:[%s6307_s21 + $0x78] sm:$0xff] %v470_v25  ;;  %v6469_v31 = vpop.f32.mrf.mxu0  ;;  %v2410_v25 = vrot.slane %v2408_v10, 5  ;;  %v1437_v36 = vsel %vm6166_vm7, %v5391_v15, %v1436_v61  ;;  %v857_v10 = vor.u32 %v856_v49, %v6513_v53 }
  0xcb   : > { %v846_v40 = vrot.slane %v844_v21, 5  ;;  %v1501_v55 = vunpack.c.l.b16 %v1437_v36  ;;  %v1445_v36 = vrot.slane %v1443_v20, 4 }
  0xcc   : > { %v2411_v48 = vsel %vm6160_vm6, %v2406_v23, %v2410_v25  ;;  %v1300_v25 = vld [vmem:[%s6108_s6 + $0x80] sm:$0x1]  ;;  %v858_v30 = vrot.slane %v857_v10, 4 }
  0xcd   : > { %v847_v61 = vor.u32 %v846_v40, %v843_v37  ;;  %v2575_v62 = vunpack.c.l.b16 %v2411_v48 }
  0xcf   : > { %v490_v51 = vpop.f32.mrf.mxu2 }
  0xd0   : > { %536 = vst [vmem:[%s6307_s21 + $0xb8] sm:$0xff] %v490_v51  ;;  %v510_v59 = vpop.f32.mrf.mxu3  ;;  %v1002_v51 = vunpack.c.l.b16 %v829_v29  ;;  %v2432_v29 = vshll.u32 %v5559_v11, 16 }
  0xd1   : > { %v1092_v63 = vpop.f32.mrf.mxu1  ;;  %544 = vst [vmem:[%s6307_s21 + $0xf8] sm:$0xff] %v510_v59  ;;  %v2574_v59 = vunpack.c.l.b16 %v2401_v38  ;;  %v579_v38 = vld [vmem:[%s6108_s6 + $0x88] sm:$0xf] }
  0xd2   : > { %v2664_v5 = vpop.f32.mrf.mxu0  ;;  %v1204_v22 = vadd.f32 %v1092_v63, %v6314_v41  ;;  %v1440_v41 = vsel %vm6166_vm7, %v1438_v16, %v1439_v17  ;;  %v2415_v63 = vrot.slane %v2413_v43, 4  ;;  %v1025_v13 = vpack.c.b16 %v1003_v52, %v1002_v51  ;;  %v1298_v17 = vld [vmem:[%s6108_s6 + $0x78] sm:$0xe]  ;;  %v5561_v51 = vld [vmem:[%s6108_s6 + $0x94] sm:$0xf] }
  0xd3   : > { %v1502_v56 = vunpack.c.l.b16 %v1440_v41  ;;  %v2597_v21 = vpack.c.b16 %v2575_v62, %v2574_v59  ;;  %v5392_v26 = vrot.slane %v1298_v17, 9  ;;  %v1446_v41 = vrot.slane %v1300_v25, 5 }
  0xd4   : > { %5373 = vmatmul.msk.bf16.gmra.mxu1 %vm371_vm1, %v1024_v57  ;;  %5406 = vmatmul.msk.bf16.gmra.mxu2 %vm371_vm1, %v1523_v58  ;;  %v577_v58 = vld [vmem:[%s6108_s6 + $0x80] sm:$0x1]  ;;  %v2434_v43 = vrot.slane %v2432_v29, 5  ;;  %v2450_v3 = vshrl.u32 %v5561_v51, 16 }
  0xd5   : > { %5519 = vmatmul.msk.bf16.gmra.mxu3 %vm371_vm1, %v5959_v0  ;;  %5584 = vmatmul.msk.bf16.gmra.mxu0 %vm371_vm1, %v2596_v4  ;;  %v2418_v0 = vrot.slane %v2416_v45, 5  ;;  %v6519_v4 = vrot.slane %v2422_v42, 5  ;;  %v1524_v15 = vpack.c.b16 %v1502_v56, %v1501_v55  ;;  %v5560_v45 = vld [vmem:[%s6108_s6 + $0x90] sm:$0xf]  ;;  %v1444_v48 = vsel %vm6166_vm7, %v5392_v26, %v1443_v20  ;;  %v1302_v20 = vld [vmem:[%s6108_s6 + $0x88] sm:$0xf] }
  0xd6   : > { %v874_v55 = vshll.u32 %v579_v38, 16  ;;  %v878_v56 = vshrl.u32 %v579_v38, 16  ;;  %v2437_v59 = vshrl.u32 %v5560_v45, 16  ;;  %v581_v38 = vld [vmem:[%s6108_s6 + $0x90] sm:$0xf] }
  0xd7   : > { %v1591_v28 = vpop.f32.mrf.mxu2 }
  0xd8   : > { %v1703_v34 = vadd.f32 %v1591_v28, %v1204_v22  ;;  %v1944_v35 = vpop.f32.mrf.mxu3  ;;  %v2419_v22 = vor.u32 %v2418_v0, %v2415_v63  ;;  %v2429_v28 = vor.u32 %v2428_v8, %v6519_v4 }
  0xd9   : > { %v1094_v39 = vpop.f32.mrf.mxu1 }
  0xda   : > { %v2056_v46 = vadd.f32 %v1944_v35, %v1703_v34  ;;  %v2666_v47 = vpop.f32.mrf.mxu0  ;;  %v1205_v1 = vadd.f32 %v1094_v39, %v6337_v6  ;;  %v848_v6 = vrot.slane %v847_v61, 4  ;;  %v578_v34 = vld [vmem:[%s6108_s6 + $0x84] sm:$0xf]  ;;  %v2420_v39 = vrot.slane %v2419_v22, 4 }
  0xdb   : > { %v2430_v40 = vrot.slane %v2429_v28, 4  ;;  %v865_v42 = vshrl.u32 %v578_v34, 16  ;;  %v868_v50 = vshll.u32 %v578_v34, 16  ;;  %v2440_v61 = vshll.u32 %v5560_v45, 16  ;;  %v5562_v28 = vld [vmem:[%s6108_s6 + $0x98] sm:$0x1] }
  0xdc   : > { %v2776_v57 = vadd.f32 %v2664_v5, %v2056_v46  ;;  %v860_v5 = vshll.u32 %v577_v58, 16  ;;  %v853_v35 = vsel %vm6160_vm6, %v848_v6, %v6513_v53  ;;  %v2425_v58 = vsel %vm6160_vm6, %v2420_v39, %v6519_v4  ;;  %v1301_v34 = vld [vmem:[%s6108_s6 + $0x84] sm:$0xe] }
  0xdd   : > { %v1004_v49 = vunpack.c.l.b16 %v853_v35  ;;  %v2435_v0 = vsel %vm6160_vm6, %v2430_v40, %v2434_v43  ;;  %v867_v10 = vrot.slane %v865_v42, 4  ;;  %v6552_v4 = vrot.slane %v874_v55, 5  ;;  %v5961_v35 = vld [vmem:[%s6108_s6 + $0x84] sm:$0xff]  ;;  %v1303_v40 = vld [vmem:[%s6108_s6 + $0x8c] sm:$0x1] }
  0xde   : > { %2808 = vst [vmem:[%s6307_s21] sm:$0xff] %v2776_v57  ;;  %v862_v32 = vrot.slane %v860_v5, 5  ;;  %v1447_v57 = vsel %vm6166_vm7, %v1445_v36, %v1446_v41  ;;  %v870_v5 = vrot.slane %v868_v50, 5  ;;  %v2577_v17 = vunpack.c.l.b16 %v2435_v0 }
  0xdf   : > { %v1593_v9 = vpop.f32.mrf.mxu2  ;;  %v1504_v11 = vunpack.c.l.b16 %v1447_v57  ;;  %v2452_v22 = vrot.slane %v2450_v3, 4  ;;  %v1450_v36 = vrot.slane %v1302_v20, 5  ;;  %v5393_v42 = vrot.slane %v1301_v34, 9 }
  0xe0   : > { %v1704_v12 = vadd.f32 %v1593_v9, %v1205_v1  ;;  %v1946_v16 = vpop.f32.mrf.mxu3  ;;  %v2446_v1 = vshll.u32 %v5561_v51, 16  ;;  %v1503_v9 = vunpack.c.l.b16 %v1444_v48  ;;  %v871_v25 = vor.u32 %v870_v5, %v867_v10 }
  0xe1   : > { %v1097_v18 = vpop.f32.mrf.mxu1  ;;  %v1452_v55 = vrot.slane %v1450_v36, 4  ;;  %v1451_v0 = vsel %vm6166_vm7, %v5393_v42, %v1450_v36 }
  0xe2   : > { %v2057_v23 = vadd.f32 %v1946_v16, %v1704_v12  ;;  %v2669_v27 = vpop.f32.mrf.mxu0  ;;  %v1206_v37 = vadd.f32 %v1097_v18, %v6358_v44  ;;  %v2576_v16 = vunpack.c.l.b16 %v2425_v58  ;;  %v2439_v18 = vrot.slane %v2437_v59, 4 }
  0xe4   : > { %5374 = vmatmul.msk.bf16.gmra.mxu1 %vm371_vm1, %v1025_v13  ;;  %5407 = vmatmul.msk.bf16.gmra.mxu2 %vm371_vm1, %v1524_v15  ;;  %v2777_v33 = vadd.f32 %v2666_v47, %v2057_v23  ;;  %v863_v47 = vsel %vm6160_vm6, %v858_v30, %v862_v32  ;;  %v580_v13 = vld [vmem:[%s6108_s6 + $0x8c] sm:$0x1]  ;;  %v880_v15 = vrot.slane %v878_v56, 4  ;;  %v1525_v32 = vpack.c.b16 %v1504_v11, %v1503_v9 }
  0xe5   : > { %5520 = vmatmul.msk.bf16.gmra.mxu3 %vm371_vm1, %v5960_v19  ;;  %5585 = vmatmul.msk.bf16.gmra.mxu0 %vm371_vm1, %v2597_v21  ;;  %v1005_v8 = vunpack.c.l.b16 %v863_v47  ;;  %v2442_v19 = vrot.slane %v2440_v61, 5  ;;  %v6557_v21 = vrot.slane %v2446_v1, 5  ;;  %v2598_v41 = vpack.c.b16 %v2577_v17, %v2576_v16  ;;  %v5563_v61 = vld [vmem:[%s6108_s6 + $0x9c] sm:$0xf] }
  0xe6   : > { %2809 = vst [vmem:[%s6307_s21 + $0x8] sm:$0xff] %v2777_v33  ;;  %v881_v33 = vor.u32 %v880_v15, %v6552_v4  ;;  %v872_v47 = vrot.slane %v871_v25, 4  ;;  %v1453_v56 = vrot.slane %v1303_v40, 5  ;;  %v2461_v15 = vshrl.u32 %v5563_v61, 16 }
  0xe7   : > { %v1596_v46 = vpop.f32.mrf.mxu2  ;;  %v1026_v30 = vpack.c.b16 %v1005_v8, %v1004_v49  ;;  %v2443_v39 = vor.u32 %v2442_v19, %v2439_v18  ;;  %v2453_v45 = vor.u32 %v2452_v22, %v6557_v21  ;;  %v892_v49 = vshll.u32 %v581_v38, 16  ;;  %v5564_v8 = vld [vmem:[%s6108_s6 + $0xa0] sm:$0xf] }
  0xe8   : > { %v1705_v52 = vadd.f32 %v1596_v46, %v1206_v37  ;;  %v1949_v53 = vpop.f32.mrf.mxu3  ;;  %v2456_v46 = vshll.u32 %v5562_v28, 16  ;;  %v882_v51 = vrot.slane %v881_v33, 4  ;;  %v2464_v16 = vshll.u32 %v5563_v61, 16 }
  0xe9   : > { %v1099_v44 = vpop.f32.mrf.mxu1  ;;  %v2454_v58 = vrot.slane %v2453_v45, 4  ;;  %v894_v11 = vrot.slane %v892_v49, 5  ;;  %v2474_v20 = vshrl.u32 %v5564_v8, 16  ;;  %v1505_v28 = vunpack.c.l.b16 %v1451_v0  ;;  %v585_v0 = vld [vmem:[%s6108_s6 + $0xa0] sm:$0xf] }
  0xea   : > { %v2058_v62 = vadd.f32 %v1949_v53, %v1705_v52  ;;  %v2671_v63 = vpop.f32.mrf.mxu0  ;;  %v1207_v6 = vadd.f32 %v1099_v44, %v6381_v14  ;;  %v582_v52 = vld [vmem:[%s6108_s6 + $0x94] sm:$0xf]  ;;  %v889_v53 = vshrl.u32 %v581_v38, 16  ;;  %v2444_v44 = vrot.slane %v2443_v39, 4 }
  0xeb   : > { %v2458_v59 = vrot.slane %v2456_v46, 5  ;;  %v898_v1 = vshll.u32 %v582_v52, 16  ;;  %v902_v3 = vshrl.u32 %v582_v52, 16  ;;  %v2476_v39 = vrot.slane %v2474_v20, 4  ;;  %v5962_v52 = vld [vmem:[%s6108_s6 + $0x90] sm:$0xff] }
  0xec   : > { %v2778_v12 = vadd.f32 %v2669_v27, %v2058_v62  ;;  %v884_v27 = vshll.u32 %v580_v13, 16  ;;  %v891_v5 = vrot.slane %v889_v53, 4  ;;  %v1454_v13 = vsel %vm6166_vm7, %v1452_v55, %v1453_v56  ;;  %v1306_v53 = vld [vmem:[%s6108_s6 + $0x98] sm:$0x1] }
  0xed   : > { %v2459_v19 = vsel %vm6160_vm6, %v2454_v58, %v2458_v59  ;;  %v6589_v25 = vrot.slane %v898_v1, 5  ;;  %v584_v58 = vld [vmem:[%s6108_s6 + $0x9c] sm:$0xf] }
  0xee   : > { %2810 = vst [vmem:[%s6307_s21 + $0x10] sm:$0xff] %v2778_v12  ;;  %v886_v48 = vrot.slane %v884_v27, 5  ;;  %v904_v27 = vrot.slane %v902_v3, 4  ;;  %v2579_v34 = vunpack.c.l.b16 %v2459_v19 }
  0xef   : > { %v1598_v23 = vpop.f32.mrf.mxu2 }
  0xf0   : > { %v1706_v29 = vadd.f32 %v1598_v23, %v1207_v6  ;;  %v1951_v26 = vpop.f32.mrf.mxu3  ;;  %v2470_v6 = vshll.u32 %v5564_v8, 16 }
  0xf1   : > { %v1102_v14 = vpop.f32.mrf.mxu1 }
  0xf2   : > { %v2059_v37 = vadd.f32 %v1951_v26, %v1706_v29  ;;  %v2674_v43 = vpop.f32.mrf.mxu0  ;;  %v1208_v57 = vadd.f32 %v1102_v14, %v6404_v54  ;;  %v887_v54 = vsel %vm6160_vm6, %v882_v51, %v886_v48  ;;  %v1506_v29 = vunpack.c.l.b16 %v1454_v13  ;;  %v1305_v26 = vld [vmem:[%s6108_s6 + $0x94] sm:$0xf]  ;;  %v5567_v13 = vld [vmem:[%s6108_s6 + $0xac] sm:$0xf] }
  0xf3   : > { %v1007_v23 = vunpack.c.l.b16 %v887_v54  ;;  %v2463_v14 = vrot.slane %v2461_v15, 4  ;;  %v6596_v38 = vrot.slane %v2470_v6, 5  ;;  %v913_v54 = vshrl.u32 %v584_v58, 16 }
  0xf4   : > { %5375 = vmatmul.msk.bf16.gmra.mxu1 %vm371_vm1, %v1026_v30  ;;  %5408 = vmatmul.msk.bf16.gmra.mxu2 %vm371_vm1, %v1525_v32  ;;  %v2779_v50 = vadd.f32 %v2671_v63, %v2059_v37  ;;  %v877_v63 = vsel %vm6160_vm6, %v872_v47, %v6552_v4  ;;  %v2449_v4 = vsel %vm6160_vm6, %v2444_v44, %v6557_v21  ;;  %v583_v30 = vld [vmem:[%s6108_s6 + $0x98] sm:$0x1]  ;;  %v922_v15 = vshll.u32 %v585_v0, 16 }
  0xf5   : > { %5521 = vmatmul.msk.bf16.gmra.mxu3 %vm371_vm1, %v5961_v35  ;;  %5586 = vmatmul.msk.bf16.gmra.mxu0 %vm371_vm1, %v2598_v41  ;;  %v1006_v22 = vunpack.c.l.b16 %v877_v63  ;;  %v895_v32 = vor.u32 %v894_v11, %v891_v5  ;;  %v2578_v33 = vunpack.c.l.b16 %v2449_v4  ;;  %v2466_v35 = vrot.slane %v2464_v16, 5  ;;  %v5565_v41 = vld [vmem:[%s6108_s6 + $0xa4] sm:$0x1] }
  0xf6   : > { %2811 = vst [vmem:[%s6307_s21 + $0x18] sm:$0xff] %v2779_v50  ;;  %v908_v45 = vshll.u32 %v583_v30, 16  ;;  %v1526_v47 = vpack.c.b16 %v1506_v29, %v1505_v28  ;;  %v1304_v50 = vld [vmem:[%s6108_s6 + $0x90] sm:$0xe]  ;;  %v2480_v56 = vshll.u32 %v5565_v41, 16  ;;  %v2477_v59 = vor.u32 %v2476_v39, %v6596_v38 }
  0xf7   : > { %v1601_v62 = vpop.f32.mrf.mxu2  ;;  %v1027_v40 = vpack.c.b16 %v1007_v23, %v1006_v22  ;;  %v896_v42 = vrot.slane %v895_v32, 4  ;;  %v2599_v49 = vpack.c.b16 %v2579_v34, %v2578_v33  ;;  %v2467_v55 = vor.u32 %v2466_v35, %v2463_v14 }
  0xf8   : > { %v1707_v9 = vadd.f32 %v1601_v62, %v1208_v57  ;;  %v1954_v10 = vpop.f32.mrf.mxu3  ;;  %v910_v62 = vrot.slane %v908_v45, 5  ;;  %v5394_v63 = vrot.slane %v1304_v50, 9  ;;  %v916_v5 = vshll.u32 %v584_v58, 16 }
  0xf9   : > { %v1104_v12 = vpop.f32.mrf.mxu1  ;;  %v901_v3 = vsel %vm6160_vm6, %v896_v42, %v6589_v25  ;;  %v2468_v11 = vrot.slane %v2467_v55, 4  ;;  %v926_v16 = vshrl.u32 %v585_v0, 16  ;;  %v2494_v28 = vshll.u32 %v5567_v13, 16  ;;  %v1309_v0 = vld [vmem:[%s6108_s6 + $0xa4] sm:$0x1] }
  0xfa   : > { %v2060_v17 = vadd.f32 %v1954_v10, %v1707_v9  ;;  %v2676_v18 = vpop.f32.mrf.mxu0  ;;  %v1209_v36 = vadd.f32 %v1104_v12, %v6433_v24  ;;  %v1457_v24 = vrot.slane %v1305_v26, 5  ;;  %v1460_v9 = vrot.slane %v1306_v53, 5  ;;  %v5566_v10 = vld [vmem:[%s6108_s6 + $0xa8] sm:$0xf] }
  0xfb   : > { %v2482_v12 = vrot.slane %v2480_v56, 5  ;;  %v2485_v20 = vshrl.u32 %v5566_v10, 16  ;;  %v2488_v22 = vshll.u32 %v5566_v10, 16  ;;  %v2498_v29 = vshrl.u32 %v5567_v13, 16  ;;  %v1307_v56 = vld [vmem:[%s6108_s6 + $0x9c] sm:$0xe] }
  0xfc   : > { %v2780_v21 = vadd.f32 %v2674_v43, %v2060_v17  ;;  %v905_v43 = vor.u32 %v904_v27, %v6589_v25  ;;  %v1459_v8 = vrot.slane %v1457_v24, 4  ;;  %v2478_v17 = vrot.slane %v2477_v59, 4  ;;  %v587_v10 = vld [vmem:[%s6108_s6 + $0xa8] sm:$0xf] }
  0xfd   : > { %v1458_v6 = vsel %vm6166_vm7, %v5394_v63, %v1457_v24  ;;  %v1008_v27 = vunpack.c.l.b16 %v901_v3  ;;  %v915_v30 = vrot.slane %v913_v54, 4  ;;  %v918_v32 = vrot.slane %v916_v5, 5 }
  0xfe   : > { %2812 = vst [vmem:[%s6307_s21 + $0x20] sm:$0xff] %v2780_v21  ;;  %v906_v61 = vrot.slane %v905_v43, 4  ;;  %v1461_v21 = vsel %vm6166_vm7, %v1459_v8, %v1460_v9  ;;  %v2473_v26 = vsel %vm6160_vm6, %v2468_v11, %v6596_v38  ;;  %v6625_v14 = vrot.slane %v922_v15, 5 }
  0xff   : > { %v1603_v37 = vpop.f32.mrf.mxu2  ;;  %v928_v35 = vrot.slane %v926_v16, 4  ;;  %v1507_v39 = vunpack.c.l.b16 %v1458_v6  ;;  %v2490_v43 = vrot.slane %v2488_v22, 5  ;;  %v1508_v45 = vunpack.c.l.b16 %v1461_v21  ;;  %v5570_v21 = vld [vmem:[%s6108_s6 + $0xb8] sm:$0xf] }
 0x100   : > { %v1708_v46 = vadd.f32 %v1603_v37, %v1209_v36  ;;  %v1956_v48 = vpop.f32.mrf.mxu3  ;;  %v911_v19 = vsel %vm6160_vm6, %v906_v61, %v910_v62  ;;  %v2483_v36 = vsel %vm6160_vm6, %v2478_v17, %v2482_v12  ;;  %v586_v37 = vld [vmem:[%s6108_s6 + $0xa4] sm:$0x1]  ;;  %v6632_v38 = vrot.slane %v2494_v28, 5 }
 0x101   : > { %v1107_v51 = vpop.f32.mrf.mxu1  ;;  %v1009_v41 = vunpack.c.l.b16 %v911_v19  ;;  %v2500_v42 = vrot.slane %v2498_v29, 4  ;;  %v919_v50 = vor.u32 %v918_v32, %v915_v30  ;;  %v2580_v24 = vunpack.c.l.b16 %v2473_v26  ;;  %v588_v19 = vld [vmem:[%s6108_s6 + $0xac] sm:$0xf] }
 0x102   : > { %v2061_v44 = vadd.f32 %v1956_v48, %v1708_v46  ;;  %v2679_v57 = vpop.f32.mrf.mxu0  ;;  %v1210_v4 = vadd.f32 %v1107_v51, %v6446_v60  ;;  %v5568_v48 = vld [vmem:[%s6108_s6 + $0xb0] sm:$0x1]  ;;  %v2581_v51 = vunpack.c.l.b16 %v2483_v36  ;;  %v929_v53 = vor.u32 %v928_v35, %v6625_v14 }
 0x103   : > { %v2504_v58 = vshll.u32 %v5568_v48, 16  ;;  %v1028_v61 = vpack.c.b16 %v1009_v41, %v1008_v27  ;;  %v1527_v62 = vpack.c.b16 %v1508_v45, %v1507_v39  ;;  %v920_v8 = vrot.slane %v919_v50, 4 }
 0x104   : > { %5376 = vmatmul.msk.bf16.gmra.mxu1 %vm371_vm1, %v1027_v40  ;;  %5409 = vmatmul.msk.bf16.gmra.mxu2 %vm371_vm1, %v1526_v47  ;;  %v2781_v1 = vadd.f32 %v2676_v18, %v2061_v44  ;;  %v2487_v40 = vrot.slane %v2485_v20, 4  ;;  %v1308_v47 = vld [vmem:[%s6108_s6 + $0xa0] sm:$0xf]  ;;  %v2600_v9 = vpack.c.b16 %v2581_v51, %v2580_v24  ;;  %v930_v5 = vrot.slane %v929_v53, 4  ;;  %v1181_v53 = vld [vmem:[%s6307_s21 + $0x48] sm:$0xff] }
 0x105   : > { %5522 = vmatmul.msk.bf16.gmra.mxu3 %vm371_vm1, %v5962_v52  ;;  %5587 = vmatmul.msk.bf16.gmra.mxu0 %vm371_vm1, %v2599_v49  ;;  %v932_v49 = vshll.u32 %v586_v37, 16  ;;  %v1464_v44 = vrot.slane %v1308_v47, 5  ;;  %v5395_v12 = vrot.slane %v1307_v56, 9  ;;  %v1467_v15 = vrot.slane %v1309_v0, 5 }
 0x106   : > { %2813 = vst [vmem:[%s6307_s21 + $0x28] sm:$0xff] %v2781_v1  ;;  %v2501_v1 = vor.u32 %v2500_v42, %v6632_v38  ;;  %v2506_v17 = vrot.slane %v2504_v58, 5  ;;  %v937_v6 = vshrl.u32 %v587_v10, 16  ;;  %v940_v20 = vshll.u32 %v587_v10, 16  ;;  %v1311_v58 = vld [vmem:[%s6108_s6 + $0xac] sm:$0xf] }
 0x107   : > { %v1606_v18 = vpop.f32.mrf.mxu2  ;;  %v934_v11 = vrot.slane %v932_v49, 5  ;;  %v925_v27 = vsel %vm6160_vm6, %v920_v8, %v6625_v14  ;;  %v1465_v29 = vsel %vm6166_vm7, %v5395_v12, %v1464_v44  ;;  %v946_v26 = vshll.u32 %v588_v19, 16  ;;  %v1310_v12 = vld [vmem:[%s6108_s6 + $0xa8] sm:$0xe] }
 0x108   : > { %v1709_v23 = vadd.f32 %v1606_v18, %v1210_v4  ;;  %v1959_v25 = vpop.f32.mrf.mxu3  ;;  %v1466_v4 = vrot.slane %v1464_v44, 4  ;;  %v2502_v22 = vrot.slane %v2501_v1, 4  ;;  %v939_v36 = vrot.slane %v937_v6, 4  ;;  %v5571_v1 = vld [vmem:[%s6108_s6 + $0xbc] sm:$0x1] }
 0x109   : > { %v1109_v60 = vpop.f32.mrf.mxu1  ;;  %v935_v28 = vsel %vm6160_vm6, %v930_v5, %v934_v11  ;;  %v942_v41 = vrot.slane %v940_v20, 5  ;;  %v2518_v45 = vshll.u32 %v5570_v21, 16  ;;  %v1010_v48 = vunpack.c.l.b16 %v925_v27 }
 0x10a   : > { %v2062_v33 = vadd.f32 %v1959_v25, %v1709_v23  ;;  %v2681_v34 = vpop.f32.mrf.mxu0  ;;  %v1211_v52 = vadd.f32 %v1109_v60, %v6469_v31  ;;  %v5963_v31 = vld [vmem:[%s6108_s6 + $0x9c] sm:$0xff]  ;;  %v5569_v60 = vld [vmem:[%s6108_s6 + $0xb4] sm:$0xf]  ;;  %v1468_v32 = vsel %vm6166_vm7, %v1466_v4, %v1467_v15  ;;  %v2507_v39 = vsel %vm6160_vm6, %v2502_v22, %v2506_v17  ;;  %v5964_v15 = vld [vmem:[%s6108_s6 + $0xa8] sm:$0xff] }
 0x10b   : > { %v1180_v23 = vld [vmem:[%s6307_s21 + $0x40] sm:$0xff]  ;;  %v1509_v42 = vunpack.c.l.b16 %v1465_v29  ;;  %v1510_v24 = vunpack.c.l.b16 %v1468_v32  ;;  %v6665_v51 = vrot.slane %v946_v26, 5  ;;  %v943_v56 = vor.u32 %v942_v41, %v939_v36  ;;  %v591_v26 = vld [vmem:[%s6108_s6 + $0xb8] sm:$0xf] }
 0x10c   : > { %v2782_v46 = vadd.f32 %v2679_v57, %v2062_v33  ;;  %v2491_v57 = vor.u32 %v2490_v43, %v2487_v40  ;;  %v950_v33 = vshrl.u32 %v588_v19, 16  ;;  %v2509_v40 = vshrl.u32 %v5569_v60, 16  ;;  %v5572_v36 = vld [vmem:[%s6108_s6 + $0xc0] sm:$0xf] }
 0x10d   : > { %v2512_v43 = vshll.u32 %v5569_v60, 16  ;;  %v944_v11 = vrot.slane %v943_v56, 4  ;;  %v2528_v6 = vshll.u32 %v5571_v1, 16  ;;  %v5396_v27 = vrot.slane %v1310_v12, 9 }
 0x10e   : > { %2814 = vst [vmem:[%s6307_s21 + $0x30] sm:$0xff] %v2782_v46  ;;  %v2492_v16 = vrot.slane %v2491_v57, 4  ;;  %v2522_v46 = vshrl.u32 %v5570_v21, 16  ;;  %v2583_v57 = vunpack.c.l.b16 %v2507_v39  ;;  %v590_v21 = vld [vmem:[%s6108_s6 + $0xb4] sm:$0xf]  ;;  %v2536_v56 = vshll.u32 %v5572_v36, 16 }
 0x10f   : > { %v1608_v55 = vpop.f32.mrf.mxu2  ;;  %v949_v32 = vsel %vm6160_vm6, %v944_v11, %v6665_v51  ;;  %v1314_v11 = vld [vmem:[%s6108_s6 + $0xb8] sm:$0xf] }
 0x110   : > { %v1710_v59 = vadd.f32 %v1608_v55, %v1211_v52  ;;  %v1961_v63 = vpop.f32.mrf.mxu3  ;;  %v952_v52 = vrot.slane %v950_v33, 4  ;;  %v589_v55 = vld [vmem:[%s6108_s6 + $0xb0] sm:$0x1]  ;;  %v2538_v12 = vrot.slane %v2536_v56, 5 }
 0x111   : > { %v1112_v3 = vpop.f32.mrf.mxu1 }
 0x112   : > { %v2063_v54 = vadd.f32 %v1961_v63, %v1710_v59  ;;  %v2684_v13 = vpop.f32.mrf.mxu0  ;;  %v1212_v25 = vadd.f32 %v1180_v23, %v1112_v3  ;;  %v2511_v59 = vrot.slane %v2509_v40, 4  ;;  %v2524_v63 = vrot.slane %v2522_v46, 4 }
 0x113   : > { %v953_v8 = vor.u32 %v952_v52, %v6665_v51  ;;  %v961_v40 = vshrl.u32 %v590_v21, 16 }
 0x114   : > { %5377 = vmatmul.msk.bf16.gmra.mxu1 %vm371_vm1, %v1028_v61  ;;  %5410 = vmatmul.msk.bf16.gmra.mxu2 %vm371_vm1, %v1527_v62  ;;  %v2783_v18 = vadd.f32 %v2681_v34, %v2063_v54  ;;  %v2497_v34 = vsel %vm6160_vm6, %v2492_v16, %v6632_v38  ;;  %v1011_v38 = vunpack.c.l.b16 %v935_v28  ;;  %v2514_v61 = vrot.slane %v2512_v43, 5  ;;  %v1312_v16 = vld [vmem:[%s6108_s6 + $0xb0] sm:$0x1] }
 0x115   : > { %5523 = vmatmul.msk.bf16.gmra.mxu3 %vm371_vm1, %v5963_v31  ;;  %5588 = vmatmul.msk.bf16.gmra.mxu0 %vm371_vm1, %v2600_v9  ;;  %v2582_v44 = vunpack.c.l.b16 %v2497_v34  ;;  %v6670_v62 = vrot.slane %v2518_v45, 5  ;;  %v956_v9 = vshll.u32 %v589_v55, 16  ;;  %v1528_v54 = vpack.c.b16 %v1510_v24, %v1509_v42  ;;  %v5573_v45 = vld [vmem:[%s6108_s6 + $0xc4] sm:$0xf] }
 0x116   : > { %2815 = vst [vmem:[%s6307_s21 + $0x38] sm:$0xff] %v2783_v18  ;;  %v1029_v31 = vpack.c.b16 %v1011_v38, %v1010_v48  ;;  %v2515_v18 = vor.u32 %v2514_v61, %v2511_v59  ;;  %v954_v23 = vrot.slane %v953_v8, 4  ;;  %v1474_v60 = vrot.slane %v1312_v16, 5  ;;  %v592_v8 = vld [vmem:[%s6108_s6 + $0xbc] sm:$0x1] }
 0x117   : > { %v1611_v30 = vpop.f32.mrf.mxu2  ;;  %v2601_v17 = vpack.c.b16 %v2583_v57, %v2582_v44  ;;  %v2525_v19 = vor.u32 %v2524_v63, %v6670_v62  ;;  %v964_v43 = vshll.u32 %v590_v21, 16  ;;  %v1012_v48 = vunpack.c.l.b16 %v949_v32 }
 0x118   : > { %v1711_v35 = vadd.f32 %v1611_v30, %v1212_v25  ;;  %v1964_v14 = vpop.f32.mrf.mxu3  ;;  %v958_v25 = vrot.slane %v956_v9, 5  ;;  %v1182_v30 = vld [vmem:[%s6307_s21 + $0x50] sm:$0xff]  ;;  %v2516_v33 = vrot.slane %v2515_v18, 4  ;;  %v970_v42 = vshll.u32 %v591_v26, 16  ;;  %v5574_v18 = vld [vmem:[%s6108_s6 + $0xc8] sm:$0x1] }
 0x119   : > { %v1114_v37 = vpop.f32.mrf.mxu1  ;;  %v2526_v34 = vrot.slane %v2525_v19, 4  ;;  %v2542_v44 = vshll.u32 %v5573_v45, 16  ;;  %v2546_v57 = vshrl.u32 %v5573_v45, 16  ;;  %v963_v61 = vrot.slane %v961_v40, 4  ;;  %v1184_v40 = vld [vmem:[%s6307_s21 + $0x60] sm:$0xff] }
 0x11a   : > { %v2064_v47 = vadd.f32 %v1964_v14, %v1711_v35  ;;  %v2686_v50 = vpop.f32.mrf.mxu0  ;;  %v1213_v0 = vadd.f32 %v1181_v53, %v1114_v37  ;;  %v2530_v35 = vrot.slane %v2528_v6, 5  ;;  %v959_v39 = vsel %vm6160_vm6, %v954_v23, %v958_v25  ;;  %v1313_v25 = vld [vmem:[%s6108_s6 + $0xb4] sm:$0xe] }
 0x11b   : > { %v2521_v51 = vsel %vm6160_vm6, %v2516_v33, %v6670_v62  ;;  %v2533_v53 = vshrl.u32 %v5572_v36, 16  ;;  %v966_v63 = vrot.slane %v964_v43, 5  ;;  %v6703_v62 = vrot.slane %v970_v42, 5 }
 0x11c   : > { %v2784_v49 = vadd.f32 %v2684_v13, %v2064_v47  ;;  %v1471_v13 = vrot.slane %v1311_v58, 5  ;;  %v2531_v52 = vsel %vm6160_vm6, %v2526_v34, %v2530_v35  ;;  %v1013_v58 = vunpack.c.l.b16 %v959_v39 }
 0x11d   : > { %v2584_v9 = vunpack.c.l.b16 %v2521_v51  ;;  %v980_v23 = vshll.u32 %v592_v8, 16  ;;  %v2552_v34 = vshll.u32 %v5574_v18, 16  ;;  %v5593_v8 = vld [vmem:[%s6108_s6 + $0x10] sm:$0xf] }
 0x11e   : > { %2816 = vst [vmem:[%s6307_s21 + $0x40] sm:$0xff] %v2784_v49  ;;  %v1473_v29 = vrot.slane %v1471_v13, 4  ;;  %v1472_v37 = vsel %vm6166_vm7, %v5396_v27, %v1471_v13  ;;  %v6709_v13 = vrot.slane %v2542_v44, 5  ;;  %v1030_v16 = vpack.c.b16 %v1013_v58, %v1012_v48 }
 0x11f   : > { %v1613_v3 = vpop.f32.mrf.mxu2  ;;  %v1511_v59 = vunpack.c.l.b16 %v1472_v37  ;;  %v982_v39 = vrot.slane %v980_v23, 5  ;;  %v5786_v37 = vld [vmem:[%s6108_s6 + $0x18] sm:$0xf] }
 0x120   : > { %v1712_v10 = vadd.f32 %v1613_v3, %v1213_v0  ;;  %v1966_v5 = vpop.f32.mrf.mxu3  ;;  %v1475_v24 = vsel %vm6166_vm7, %v1473_v29, %v1474_v60  ;;  %v1478_v29 = vrot.slane %v1314_v11, 5  ;;  %v5788_v11 = vld [vmem:[%s6108_s6 + $0x20] sm:$0x1] }
 0x121   : > { %v1117_v4 = vpop.f32.mrf.mxu1  ;;  %v1512_v0 = vunpack.c.l.b16 %v1475_v24 }
 0x122   : > { %v2065_v20 = vadd.f32 %v1966_v5, %v1712_v10  ;;  %v2689_v22 = vpop.f32.mrf.mxu0  ;;  %v1214_v14 = vadd.f32 %v1182_v30, %v1117_v4  ;;  %v2585_v10 = vunpack.c.l.b16 %v2531_v52  ;;  %v2548_v4 = vrot.slane %v2546_v57, 4  ;;  %v1315_v30 = vld [vmem:[%s6108_s6 + $0xbc] sm:$0x1] }
 0x123   : > { %v1529_v6 = vpack.c.b16 %v1512_v0, %v1511_v59  ;;  %v1480_v43 = vrot.slane %v1478_v29, 4  ;;  %v1481_v45 = vrot.slane %v1315_v30, 5  ;;  %v3742_v52 = vshrl.u32 %v5786_v37, 16  ;;  %v5851_v30 = vld [vmem:[%s6108_s6 + $0x18] sm:$0xe] }
 0x124   : > { %5378 = vmatmul.msk.bf16.gmra.mxu1 %vm371_vm1, %v1029_v31  ;;  %5411 = vmatmul.msk.bf16.gmra.mxu2 %vm371_vm1, %v1528_v54  ;;  %v2785_v28 = vadd.f32 %v2686_v50, %v2065_v20  ;;  %v974_v50 = vshrl.u32 %v591_v26, 16  ;;  %v1183_v31 = vld [vmem:[%s6307_s21 + $0x58] sm:$0xff]  ;;  %v2535_v54 = vrot.slane %v2533_v53, 4  ;;  %v2602_v60 = vpack.c.b16 %v2585_v10, %v2584_v9 }
 0x125   : > { %5524 = vmatmul.msk.bf16.gmra.mxu3 %vm371_vm1, %v5964_v15  ;;  %5589 = vmatmul.msk.bf16.gmra.mxu0 %vm371_vm1, %v2601_v17  ;;  %v967_v17 = vor.u32 %v966_v63, %v963_v61  ;;  %v2549_v33 = vor.u32 %v2548_v4, %v6709_v13  ;;  %v3745_v53 = vshll.u32 %v5786_v37, 16  ;;  %v1482_v59 = vsel %vm6166_vm7, %v1480_v43, %v1481_v45 }
 0x126   : > { %2817 = vst [vmem:[%s6307_s21 + $0x48] sm:$0xff] %v2785_v28  ;;  %v976_v3 = vrot.slane %v974_v50, 4  ;;  %v5965_v28 = vld [vmem:[%s6108_s6 + $0xb4] sm:$0xff]  ;;  %v2539_v26 = vor.u32 %v2538_v12, %v2535_v54  ;;  %v2554_v50 = vrot.slane %v2552_v34, 5  ;;  %v3744_v9 = vrot.slane %v3742_v52, 4 }
 0x127   : > { %v1616_v41 = vpop.f32.mrf.mxu2  ;;  %v968_v35 = vrot.slane %v967_v17, 4  ;;  %v2550_v42 = vrot.slane %v2549_v33, 4  ;;  %v3747_v10 = vrot.slane %v3745_v53, 5  ;;  %v1514_v54 = vunpack.c.l.b16 %v1482_v59  ;;  %v5852_v17 = vld [vmem:[%s6108_s6 + $0x1c] sm:$0xf]  ;;  %v5966_v33 = vld [vmem:[%s6108_s6 + $0xc0] sm:$0xff] }
 0x128   : > { %v1713_v46 = vadd.f32 %v1616_v41, %v1214_v14  ;;  %v1969_v47 = vpop.f32.mrf.mxu3  ;;  %v5397_v14 = vrot.slane %v1313_v25, 9  ;;  %v2540_v48 = vrot.slane %v2539_v26, 4  ;;  %v3761_v25 = vshll.u32 %v5788_v11, 16 }
 0x129   : > { %v1119_v38 = vpop.f32.mrf.mxu1  ;;  %v973_v24 = vsel %vm6160_vm6, %v968_v35, %v6703_v62  ;;  %v3748_v23 = vor.u32 %v3747_v10, %v3744_v9  ;;  %v5853_v35 = vld [vmem:[%s6108_s6 + $0x20] sm:$0x1]  ;;  %v5900_v45 = vrot.slane %v5851_v30, 9  ;;  %v5595_v30 = vld [vmem:[%s6108_s6 + $0x18] sm:$0xe] }
 0x12a   : > { %v2066_v49 = vadd.f32 %v1969_v47, %v1713_v46  ;;  %v2691_v55 = vpop.f32.mrf.mxu0  ;;  %v1215_v5 = vadd.f32 %v1183_v31, %v1119_v38  ;;  %v5787_v46 = vld [vmem:[%s6108_s6 + $0x1c] sm:$0xf]  ;;  %v1479_v51 = vsel %vm6166_vm7, %v5397_v14, %v1478_v29  ;;  %v1014_v63 = vunpack.c.l.b16 %v973_v24  ;;  %v5789_v24 = vld [vmem:[%s6108_s6 + $0x24] sm:$0xf] }
 0x12b   : > { %v3751_v44 = vshll.u32 %v5787_v46, 16  ;;  %v3755_v57 = vshrl.u32 %v5787_v46, 16  ;;  %v1513_v31 = vunpack.c.l.b16 %v1479_v51  ;;  %v3763_v43 = vrot.slane %v3761_v25, 5  ;;  %v5790_v51 = vld [vmem:[%s6108_s6 + $0x28] sm:$0xf] }
 0x12c   : > { %v2786_v1 = vadd.f32 %v2689_v22, %v2066_v49  ;;  %v977_v22 = vor.u32 %v976_v3, %v6703_v62  ;;  %v2555_v62 = vsel %vm6160_vm6, %v2550_v42, %v2554_v50  ;;  %v4514_v42 = vrot.slane %v5853_v35, 5  ;;  %v1186_v50 = vld [vmem:[%s6307_s21 + $0x70] sm:$0xff] }
 0x12d   : > { %v6741_v12 = vrot.slane %v3751_v44, 5  ;;  %v3757_v4 = vrot.slane %v3755_v57, 4 }
 0x12e   : > { %2818 = vst [vmem:[%s6307_s21 + $0x50] sm:$0xff] %v2786_v1  ;;  %v978_v41 = vrot.slane %v977_v22, 4  ;;  %v2545_v1 = vsel %vm6160_vm6, %v2540_v48, %v6709_v13  ;;  %v2587_v13 = vunpack.c.l.b16 %v2555_v62  ;;  %v5592_v22 = vld [vmem:[%s6108_s6 + $0xc] sm:$0xe]  ;;  %v3779_v62 = vshrl.u32 %v5790_v51, 16 }
 0x12f   : > { %v1618_v15 = vpop.f32.mrf.mxu2 }
 0x130   : > { %v1714_v19 = vadd.f32 %v1618_v15, %v1215_v5  ;;  %v1971_v20 = vpop.f32.mrf.mxu3  ;;  %v983_v56 = vsel %vm6160_vm6, %v978_v41, %v982_v39  ;;  %v1185_v15 = vld [vmem:[%s6307_s21 + $0x68] sm:$0xff] }
 0x131   : > { %v1122_v27 = vpop.f32.mrf.mxu1  ;;  %v1015_v3 = vunpack.c.l.b16 %v983_v56 }
 0x132   : > { %v2067_v21 = vadd.f32 %v1971_v20, %v1714_v19  ;;  %v2694_v32 = vpop.f32.mrf.mxu0  ;;  %v1216_v47 = vadd.f32 %v1184_v40, %v1122_v27  ;;  %v2942_v19 = vrot.slane %v5593_v8, 5  ;;  %v3749_v40 = vrot.slane %v3748_v23, 4 }
 0x133   : > { %v1031_v20 = vpack.c.b16 %v1015_v3, %v1014_v63  ;;  %v3766_v63 = vshrl.u32 %v5789_v24, 16 }
 0x134   : > { %5379 = vmatmul.msk.bf16.gmra.mxu1 %vm371_vm1, %v1030_v16  ;;  %5412 = vmatmul.msk.bf16.gmra.mxu2 %vm371_vm1, %v1529_v6  ;;  %v2787_v36 = vadd.f32 %v2691_v55, %v2067_v21  ;;  %v2586_v16 = vunpack.c.l.b16 %v2545_v1  ;;  %v3758_v21 = vor.u32 %v3757_v4, %v6741_v12  ;;  %v2944_v41 = vrot.slane %v2942_v19, 4 }
 0x135   : > { %5525 = vmatmul.msk.bf16.gmra.mxu3 %vm371_vm1, %v5965_v28  ;;  %5590 = vmatmul.msk.bf16.gmra.mxu0 %vm371_vm1, %v2602_v60  ;;  %v1530_v28 = vpack.c.b16 %v1514_v54, %v1513_v31  ;;  %v5594_v60 = vld [vmem:[%s6108_s6 + $0x14] sm:$0x1]  ;;  %v3775_v1 = vshll.u32 %v5790_v51, 16  ;;  %v1187_v54 = vld [vmem:[%s6307_s21 + $0x78] sm:$0xff] }
 0x136   : > { %2819 = vst [vmem:[%s6307_s21 + $0x58] sm:$0xff] %v2787_v36  ;;  %v2603_v34 = vpack.c.b16 %v2587_v13, %v2586_v16  ;;  %v5641_v36 = vrot.slane %v5592_v22, 9  ;;  %v2945_v37 = vrot.slane %v5594_v60, 5  ;;  %v3768_v16 = vrot.slane %v3766_v63, 4  ;;  %v5855_v22 = vld [vmem:[%s6108_s6 + $0x28] sm:$0xf] }
 0x137   : > { %v1621_v38 = vpop.f32.mrf.mxu2 }
 0x138   : > { %v1715_v49 = vadd.f32 %v1621_v38, %v1216_v47  ;;  %v1974_v55 = vpop.f32.mrf.mxu3  ;;  %v3759_v47 = vrot.slane %v3758_v21, 4  ;;  %v2943_v53 = vsel %vm6166_vm7, %v5641_v36, %v2942_v19 }
 0x139   : > { %v1124_v58 = vpop.f32.mrf.mxu1  ;;  %v3052_v8 = vunpack.c.l.b16 %v2943_v53 }
 0x13a   : > { %v2068_v61 = vadd.f32 %v1974_v55, %v1715_v49  ;;  %v2696_v0 = vpop.f32.mrf.mxu0  ;;  %v1217_v18 = vadd.f32 %v1185_v15, %v1124_v58  ;;  %v2946_v49 = vsel %vm6166_vm7, %v2944_v41, %v2945_v37  ;;  %v3754_v55 = vsel %vm6160_vm6, %v3749_v40, %v6741_v12  ;;  %v5596_v15 = vld [vmem:[%s6108_s6 + $0x1c] sm:$0xf]  ;;  %v5856_v37 = vld [vmem:[%s6108_s6 + $0x2c] sm:$0x1] }
 0x13b   : > { %v3764_v57 = vsel %vm6160_vm6, %v3759_v47, %v3763_v43  ;;  %v3053_v9 = vunpack.c.l.b16 %v2946_v49  ;;  %v4125_v10 = vunpack.c.l.b16 %v3754_v55  ;;  %v2949_v60 = vrot.slane %v5596_v15, 5  ;;  %v5793_v47 = vld [vmem:[%s6108_s6 + $0x34] sm:$0xf] }
 0x13c   : > { %v2788_v5 = vadd.f32 %v2694_v32, %v2068_v61  ;;  %v4511_v32 = vrot.slane %v5852_v17, 5  ;;  %v4126_v11 = vunpack.c.l.b16 %v3764_v57  ;;  %v6775_v17 = vrot.slane %v3775_v1, 5 }
 0x13d   : > { %v3084_v25 = vpack.c.b16 %v3053_v9, %v3052_v8  ;;  %v4518_v41 = vrot.slane %v5855_v22, 5  ;;  %v5642_v43 = vrot.slane %v5595_v30, 9  ;;  %v4521_v49 = vrot.slane %v5856_v37, 5  ;;  %v5857_v37 = vld [vmem:[%s6108_s6 + $0x30] sm:$0xe] }
 0x13e   : > { %2820 = vst [vmem:[%s6307_s21 + $0x60] sm:$0xff] %v2788_v5  ;;  %v4513_v48 = vrot.slane %v4511_v32, 4  ;;  %v4512_v58 = vsel %vm6166_vm7, %v5900_v45, %v4511_v32  ;;  %v2951_v45 = vrot.slane %v2949_v60, 4  ;;  %v3799_v57 = vshll.u32 %v5793_v47, 16 }
 0x13f   : > { %v1623_v6 = vpop.f32.mrf.mxu2  ;;  %v4621_v12 = vunpack.c.l.b16 %v4512_v58  ;;  %v4520_v53 = vrot.slane %v4518_v41, 4  ;;  %v3803_v58 = vshrl.u32 %v5793_v47, 16 }
 0x140   : > { %v1716_v27 = vadd.f32 %v1623_v6, %v1217_v18  ;;  %v1976_v29 = vpop.f32.mrf.mxu3  ;;  %v4515_v59 = vsel %vm6166_vm7, %v4513_v48, %v4514_v42  ;;  %v3781_v18 = vrot.slane %v3779_v62, 4  ;;  %v5791_v6 = vld [vmem:[%s6108_s6 + $0x2c] sm:$0x1]  ;;  %v1188_v48 = vld [vmem:[%s6307_s21 + $0x80] sm:$0xff] }
 0x141   : > { %v1127_v26 = vpop.f32.mrf.mxu1  ;;  %v4622_v4 = vunpack.c.l.b16 %v4515_v59 }
 0x142   : > { %v2069_v14 = vadd.f32 %v1976_v29, %v1716_v27  ;;  %v2699_v39 = vpop.f32.mrf.mxu0  ;;  %v1218_v38 = vadd.f32 %v1186_v50, %v1127_v26  ;;  %v5967_v27 = vld [vmem:[%s6108_s6 + $0x18] sm:$0xff]  ;;  %v4157_v29 = vpack.c.b16 %v4126_v11, %v4125_v10  ;;  %v3782_v26 = vor.u32 %v3781_v18, %v6775_v17  ;;  %v1189_v18 = vld [vmem:[%s6307_s21 + $0x88] sm:$0xff] }
 0x143   : > { %v4522_v10 = vsel %vm6166_vm7, %v4520_v53, %v4521_v49  ;;  %v1190_v49 = vld [vmem:[%s6307_s21 + $0x90] sm:$0xff] }
 0x144   : > { %5380 = vmatmul.msk.bf16.gmra.mxu1 %vm371_vm1, %v1031_v20  ;;  %5413 = vmatmul.msk.bf16.gmra.mxu2 %vm371_vm1, %v1530_v28  ;;  %v2789_v46 = vadd.f32 %v2696_v0, %v2069_v14  ;;  %v3769_v0 = vshll.u32 %v5789_v24, 16  ;;  %v5597_v14 = vld [vmem:[%s6108_s6 + $0x20] sm:$0x1]  ;;  %v4624_v22 = vunpack.c.l.b16 %v4522_v10 }
 0x145   : > { %5526 = vmatmul.msk.bf16.gmra.mxu3 %vm371_vm1, %v5966_v33  ;;  %5591 = vmatmul.msk.bf16.gmra.mxu0 %vm371_vm1, %v2603_v34  ;;  %v3785_v33 = vshll.u32 %v5791_v6, 16  ;;  %v4653_v34 = vpack.c.b16 %v4622_v4, %v4621_v12  ;;  %v2952_v42 = vrot.slane %v5597_v14, 5  ;;  %v6808_v12 = vrot.slane %v3799_v57, 5 }
 0x146   : > { %2821 = vst [vmem:[%s6307_s21 + $0x68] sm:$0xff] %v2789_v46  ;;  %v3771_v13 = vrot.slane %v3769_v0, 5  ;;  %v5792_v46 = vld [vmem:[%s6108_s6 + $0x30] sm:$0xf]  ;;  %v2950_v0 = vsel %vm6166_vm7, %v5642_v43, %v2949_v60  ;;  %v3805_v4 = vrot.slane %v3803_v58, 4 }
 0x147   : > { %v1626_v52 = vpop.f32.mrf.mxu2  ;;  %v3787_v24 = vrot.slane %v3785_v33, 5  ;;  %v2953_v1 = vsel %vm6166_vm7, %v2951_v45, %v2952_v42  ;;  %v3054_v15 = vunpack.c.l.b16 %v2950_v0  ;;  %v5968_v33 = vld [vmem:[%s6108_s6 + $0x24] sm:$0xff] }
 0x148   : > { %v1717_v56 = vadd.f32 %v1626_v52, %v1218_v38  ;;  %v1979_v44 = vpop.f32.mrf.mxu3  ;;  %v3772_v32 = vor.u32 %v3771_v13, %v3768_v16  ;;  %v3783_v38 = vrot.slane %v3782_v26, 4  ;;  %v3055_v16 = vunpack.c.l.b16 %v2953_v1 }
 0x149   : > { %v1129_v61 = vpop.f32.mrf.mxu1 }
 0x14a   : > { %v2070_v3 = vadd.f32 %v1979_v44, %v1717_v56  ;;  %v2701_v31 = vpop.f32.mrf.mxu0  ;;  %v1219_v19 = vadd.f32 %v1187_v54, %v1129_v61  ;;  %v3773_v50 = vrot.slane %v3772_v32, 4  ;;  %v3790_v56 = vshrl.u32 %v5792_v46, 16  ;;  %v5599_v54 = vld [vmem:[%s6108_s6 + $0x28] sm:$0xf] }
 0x14b   : > { %v3793_v44 = vshll.u32 %v5792_v46, 16  ;;  %v3085_v26 = vpack.c.b16 %v3055_v16, %v3054_v15  ;;  %v1191_v16 = vld [vmem:[%s6307_s21 + $0x98] sm:$0xff] }
 0x14c   : > { %v2790_v5 = vadd.f32 %v2699_v39, %v2070_v3  ;;  %v5854_v39 = vld [vmem:[%s6108_s6 + $0x24] sm:$0xe]  ;;  %v3778_v62 = vsel %vm6160_vm6, %v3773_v50, %v6775_v17  ;;  %v5794_v17 = vld [vmem:[%s6108_s6 + $0x38] sm:$0x1] }
 0x14d   : > { %v5901_v52 = vrot.slane %v5854_v39, 9  ;;  %v3795_v11 = vrot.slane %v3793_v44, 5  ;;  %v3809_v30 = vshll.u32 %v5794_v17, 16  ;;  %v5796_v44 = vld [vmem:[%s6108_s6 + $0x40] sm:$0xf] }
 0x14e   : > { %2822 = vst [vmem:[%s6307_s21 + $0x70] sm:$0xff] %v2790_v5  ;;  %v3792_v5 = vrot.slane %v3790_v56, 4  ;;  %v5795_v56 = vld [vmem:[%s6108_s6 + $0x3c] sm:$0xf]  ;;  %v3823_v10 = vshll.u32 %v5796_v44, 16 }
 0x14f   : > { %v1628_v20 = vpop.f32.mrf.mxu2  ;;  %v4519_v9 = vsel %vm6166_vm7, %v5901_v52, %v4518_v41 }
 0x150   : > { %v1718_v23 = vadd.f32 %v1628_v20, %v1219_v19  ;;  %v1981_v28 = vpop.f32.mrf.mxu3  ;;  %v4127_v19 = vunpack.c.l.b16 %v3778_v62  ;;  %v4623_v20 = vunpack.c.l.b16 %v4519_v9  ;;  %v3796_v60 = vor.u32 %v3795_v11, %v3792_v5 }
 0x151   : > { %v1132_v21 = vpop.f32.mrf.mxu1  ;;  %v3817_v9 = vshll.u32 %v5795_v56, 16 }
 0x152   : > { %v2071_v35 = vadd.f32 %v1981_v28, %v1718_v23  ;;  %v2704_v36 = vpop.f32.mrf.mxu0  ;;  %v1220_v51 = vadd.f32 %v1188_v48, %v1132_v21  ;;  %v5858_v23 = vld [vmem:[%s6108_s6 + $0x34] sm:$0xf]  ;;  %v3806_v21 = vor.u32 %v3805_v4, %v6808_v12  ;;  %v4654_v39 = vpack.c.b16 %v4624_v22, %v4623_v20 }
 0x153   : > { %v4525_v14 = vrot.slane %v5858_v23, 5  ;;  %v3797_v42 = vrot.slane %v3796_v60, 4  ;;  %v3819_v22 = vrot.slane %v3817_v9, 5  ;;  %v6843_v23 = vrot.slane %v3823_v10, 5  ;;  %v5861_v60 = vld [vmem:[%s6108_s6 + $0x40] sm:$0xf] }
 0x154   : > { %5657 = vmatmul.msk.bf16.vlgmr.msra.gmra.mxu1 %vm371_vm1, %v3084_v25  ;;  %5770 = vmatmul.msk.bf16.vlgmr.msra.gmra.mxu2 %vm371_vm1, %v5967_v27  ;;  %v2791_v40 = vadd.f32 %v2701_v31, %v2071_v35  ;;  %v3788_v31 = vsel %vm6160_vm6, %v3783_v38, %v3787_v24  ;;  %v2956_v27 = vrot.slane %v5599_v54, 5  ;;  %v5600_v35 = vld [vmem:[%s6108_s6 + $0x2c] sm:$0x1]  ;;  %v3807_v50 = vrot.slane %v3806_v21, 4 }
 0x155   : > { %5835 = vmatmul.msk.bf16.vlgmr.msra.gmra.mxu3 %vm371_vm1, %v4157_v29  ;;  %5916 = vmatmul.msk.bf16.vlgmr.msra.gmra.mxu0 %vm371_vm1, %v4653_v34  ;;  %v4128_v6 = vunpack.c.l.b16 %v3788_v31  ;;  %v5598_v29 = vld [vmem:[%s6108_s6 + $0x24] sm:$0xe]  ;;  %v2959_v48 = vrot.slane %v5600_v35, 5  ;;  %v3811_v38 = vrot.slane %v3809_v30, 5  ;;  %v4527_v52 = vrot.slane %v4525_v14, 4 }
 0x156   : > { %2823 = vst [vmem:[%s6307_s21 + $0x78] sm:$0xff] %v2791_v40  ;;  %v5859_v40 = vld [vmem:[%s6108_s6 + $0x38] sm:$0x1]  ;;  %v5643_v45 = vrot.slane %v5598_v29, 9  ;;  %v2958_v46 = vrot.slane %v2956_v27, 4  ;;  %v3827_v54 = vshrl.u32 %v5796_v44, 16 }
 0x157   : > { %v1631_v55 = vpop.f32.mrf.mxu2  ;;  %v4158_v41 = vpack.c.b16 %v4128_v6, %v4127_v19  ;;  %v4528_v53 = vrot.slane %v5859_v40, 5  ;;  %v3812_v1 = vsel %vm6160_vm6, %v3807_v50, %v3811_v38  ;;  %v5602_v6 = vld [vmem:[%s6108_s6 + $0x34] sm:$0xf] }
 0x158   : > { %v1719_v59 = vadd.f32 %v1631_v55, %v1220_v51  ;;  %v1984_v61 = vpop.f32.mrf.mxu3  ;;  %v5902_v51 = vrot.slane %v5857_v37, 9  ;;  %v2957_v58 = vsel %vm6166_vm7, %v5643_v45, %v2956_v27  ;;  %v4130_v17 = vunpack.c.l.b16 %v3812_v1 }
 0x159   : > { %v1134_v63 = vpop.f32.mrf.mxu1 }
 0x15a   : > { %v2072_v3 = vadd.f32 %v1984_v61, %v1719_v59  ;;  %v2706_v8 = vpop.f32.mrf.mxu0  ;;  %v1221_v25 = vadd.f32 %v1189_v18, %v1134_v63  ;;  %v2960_v59 = vsel %vm6166_vm7, %v2958_v46, %v2959_v48  ;;  %v3802_v61 = vsel %vm6160_vm6, %v3797_v42, %v6808_v12  ;;  %v5862_v48 = vld [vmem:[%s6108_s6 + $0x44] sm:$0x1] }
 0x15b   : > { %v4526_v62 = vsel %vm6166_vm7, %v5902_v51, %v4525_v14  ;;  %v3056_v12 = vunpack.c.l.b16 %v2957_v58  ;;  %v3057_v4 = vunpack.c.l.b16 %v2960_v59  ;;  %v4129_v15 = vunpack.c.l.b16 %v3802_v61  ;;  %v5601_v14 = vld [vmem:[%s6108_s6 + $0x30] sm:$0xe]  ;;  %v5799_v51 = vld [vmem:[%s6108_s6 + $0x4c] sm:$0xf] }
 0x15c   : > { %v2792_v13 = vadd.f32 %v2704_v36, %v2072_v3  ;;  %v4529_v3 = vsel %vm6166_vm7, %v4527_v52, %v4528_v53  ;;  %v4625_v18 = vunpack.c.l.b16 %v4526_v62  ;;  %v4532_v46 = vrot.slane %v5861_v60, 5  ;;  %v1192_v52 = vld [vmem:[%s6307_s21 + $0xa0] sm:$0xff] }
 0x15d   : > { %v4626_v19 = vunpack.c.l.b16 %v4529_v3  ;;  %v3086_v30 = vpack.c.b16 %v3057_v4, %v3056_v12  ;;  %v5644_v50 = vrot.slane %v5601_v14, 9  ;;  %v4535_v59 = vrot.slane %v5862_v48, 5  ;;  %v5863_v48 = vld [vmem:[%s6108_s6 + $0x48] sm:$0xe] }
 0x15e   : > { %2824 = vst [vmem:[%s6307_s21 + $0x80] sm:$0xff] %v2792_v13  ;;  %v4534_v58 = vrot.slane %v4532_v46, 4  ;;  %v3847_v1 = vshll.u32 %v5799_v51, 16  ;;  %v3851_v62 = vshrl.u32 %v5799_v51, 16 }
 0x15f   : > { %v1633_v28 = vpop.f32.mrf.mxu2  ;;  %v4655_v37 = vpack.c.b16 %v4626_v19, %v4625_v18 }
 0x160   : > { %v1720_v32 = vadd.f32 %v1633_v28, %v1221_v25  ;;  %v1986_v34 = vpop.f32.mrf.mxu3  ;;  %v3829_v25 = vrot.slane %v3827_v54, 4  ;;  %v5797_v28 = vld [vmem:[%s6108_s6 + $0x44] sm:$0x1]  ;;  %v6876_v18 = vrot.slane %v3847_v1, 5  ;;  %v3853_v19 = vrot.slane %v3851_v62, 4 }
 0x161   : > { %v1137_v36 = vpop.f32.mrf.mxu1 }
 0x162   : > { %v2073_v43 = vadd.f32 %v1986_v34, %v1720_v32  ;;  %v2709_v47 = vpop.f32.mrf.mxu0  ;;  %v1222_v55 = vadd.f32 %v1190_v49, %v1137_v36  ;;  %v5969_v32 = vld [vmem:[%s6108_s6 + $0x30] sm:$0xff]  ;;  %v2963_v34 = vrot.slane %v5602_v6, 5 }
 0x164   : > { %5658 = vmatmul.msk.bf16.gmra.mxu1 %vm371_vm1, %v3085_v26  ;;  %5771 = vmatmul.msk.bf16.gmra.mxu2 %vm371_vm1, %v5968_v33  ;;  %v2793_v24 = vadd.f32 %v2706_v8, %v2073_v43  ;;  %v3814_v8 = vshrl.u32 %v5795_v56, 16  ;;  %v4159_v33 = vpack.c.b16 %v4130_v17, %v4129_v15  ;;  %v5603_v43 = vld [vmem:[%s6108_s6 + $0x38] sm:$0x1]  ;;  %v2965_v38 = vrot.slane %v2963_v34, 4 }
 0x165   : > { %5836 = vmatmul.msk.bf16.gmra.mxu3 %vm371_vm1, %v4158_v41  ;;  %5917 = vmatmul.msk.bf16.gmra.mxu0 %vm371_vm1, %v4654_v39  ;;  %v3830_v41 = vor.u32 %v3829_v25, %v6843_v23  ;;  %v3833_v39 = vshll.u32 %v5797_v28, 16  ;;  %v2966_v53 = vrot.slane %v5603_v43, 5  ;;  %v2964_v9 = vsel %vm6166_vm7, %v5644_v50, %v2963_v34  ;;  %v1193_v25 = vld [vmem:[%s6307_s21 + $0xa8] sm:$0xff] }
 0x166   : > { %2825 = vst [vmem:[%s6307_s21 + $0x88] sm:$0xff] %v2793_v24  ;;  %v3816_v20 = vrot.slane %v3814_v8, 4  ;;  %v5798_v24 = vld [vmem:[%s6108_s6 + $0x48] sm:$0xf]  ;;  %v4536_v15 = vsel %vm6166_vm7, %v4534_v58, %v4535_v59  ;;  %v3058_v6 = vunpack.c.l.b16 %v2964_v9  ;;  %v1194_v59 = vld [vmem:[%s6307_s21 + $0xb0] sm:$0xff] }
 0x167   : > { %v1636_v57 = vpop.f32.mrf.mxu2  ;;  %v3835_v56 = vrot.slane %v3833_v39, 5  ;;  %v2967_v10 = vsel %vm6166_vm7, %v2965_v38, %v2966_v53  ;;  %v4628_v60 = vunpack.c.l.b16 %v4536_v15  ;;  %v5970_v39 = vld [vmem:[%s6108_s6 + $0x3c] sm:$0xff] }
 0x168   : > { %v1721_v63 = vadd.f32 %v1636_v57, %v1222_v55  ;;  %v1989_v0 = vpop.f32.mrf.mxu3  ;;  %v3820_v36 = vor.u32 %v3819_v22, %v3816_v20  ;;  %v3831_v55 = vrot.slane %v3830_v41, 4  ;;  %v3059_v20 = vunpack.c.l.b16 %v2967_v10 }
 0x169   : > { %v1139_v31 = vpop.f32.mrf.mxu1 }
 0x16a   : > { %v2074_v5 = vadd.f32 %v1989_v0, %v1721_v63  ;;  %v2711_v11 = vpop.f32.mrf.mxu0  ;;  %v1223_v27 = vadd.f32 %v1191_v16, %v1139_v31  ;;  %v3821_v49 = vrot.slane %v3820_v36, 4  ;;  %v3838_v63 = vshrl.u32 %v5798_v24, 16  ;;  %v5605_v16 = vld [vmem:[%s6108_s6 + $0x40] sm:$0xf] }
 0x16b   : > { %v3841_v0 = vshll.u32 %v5798_v24, 16  ;;  %v3087_v41 = vpack.c.b16 %v3059_v20, %v3058_v6  ;;  %v1195_v20 = vld [vmem:[%s6307_s21 + $0xb8] sm:$0xff] }
 0x16c   : > { %v2794_v13 = vadd.f32 %v2709_v47, %v2074_v5  ;;  %v5860_v47 = vld [vmem:[%s6108_s6 + $0x3c] sm:$0xe]  ;;  %v3826_v54 = vsel %vm6160_vm6, %v3821_v49, %v6843_v23  ;;  %v5800_v23 = vld [vmem:[%s6108_s6 + $0x50] sm:$0x1] }
 0x16d   : > { %v5903_v57 = vrot.slane %v5860_v47, 9  ;;  %v3843_v17 = vrot.slane %v3841_v0, 5  ;;  %v3857_v14 = vshll.u32 %v5800_v23, 16  ;;  %v5802_v0 = vld [vmem:[%s6108_s6 + $0x58] sm:$0xf] }
 0x16e   : > { %2826 = vst [vmem:[%s6307_s21 + $0x90] sm:$0xff] %v2794_v13  ;;  %v3840_v13 = vrot.slane %v3838_v63, 4  ;;  %v5801_v63 = vld [vmem:[%s6108_s6 + $0x54] sm:$0xf]  ;;  %v3871_v15 = vshll.u32 %v5802_v0, 16 }
 0x16f   : > { %v1638_v29 = vpop.f32.mrf.mxu2  ;;  %v4533_v4 = vsel %vm6166_vm7, %v5903_v57, %v4532_v46 }
 0x170   : > { %v1722_v21 = vadd.f32 %v1638_v29, %v1223_v27  ;;  %v1991_v26 = vpop.f32.mrf.mxu3  ;;  %v4131_v27 = vunpack.c.l.b16 %v3826_v54  ;;  %v4627_v29 = vunpack.c.l.b16 %v4533_v4  ;;  %v3844_v34 = vor.u32 %v3843_v17, %v3840_v13 }
 0x171   : > { %v1142_v35 = vpop.f32.mrf.mxu1  ;;  %v3865_v4 = vshll.u32 %v5801_v63, 16 }
 0x172   : > { %v2075_v40 = vadd.f32 %v1991_v26, %v1722_v21  ;;  %v2714_v45 = vpop.f32.mrf.mxu0  ;;  %v1224_v44 = vadd.f32 %v1192_v52, %v1142_v35  ;;  %v5864_v21 = vld [vmem:[%s6108_s6 + $0x4c] sm:$0xf]  ;;  %v3854_v35 = vor.u32 %v3853_v19, %v6876_v18  ;;  %v4656_v47 = vpack.c.b16 %v4628_v60, %v4627_v29 }
 0x173   : > { %v4539_v43 = vrot.slane %v5864_v21, 5  ;;  %v3845_v53 = vrot.slane %v3844_v34, 4  ;;  %v3867_v60 = vrot.slane %v3865_v4, 5  ;;  %v6911_v21 = vrot.slane %v3871_v15, 5  ;;  %v5867_v34 = vld [vmem:[%s6108_s6 + $0x58] sm:$0xf] }
 0x174   : > { %5659 = vmatmul.msk.bf16.gmra.mxu1 %vm371_vm1, %v3086_v30  ;;  %5772 = vmatmul.msk.bf16.gmra.mxu2 %vm371_vm1, %v5969_v32  ;;  %v2795_v42 = vadd.f32 %v2711_v11, %v2075_v40  ;;  %v3836_v11 = vsel %vm6160_vm6, %v3831_v55, %v3835_v56  ;;  %v2970_v32 = vrot.slane %v5605_v16, 5  ;;  %v5606_v40 = vld [vmem:[%s6108_s6 + $0x44] sm:$0x1]  ;;  %v3855_v49 = vrot.slane %v3854_v35, 4 }
 0x175   : > { %5837 = vmatmul.msk.bf16.gmra.mxu3 %vm371_vm1, %v4159_v33  ;;  %5918 = vmatmul.msk.bf16.gmra.mxu0 %vm371_vm1, %v4655_v37  ;;  %v4132_v28 = vunpack.c.l.b16 %v3836_v11  ;;  %v5604_v33 = vld [vmem:[%s6108_s6 + $0x3c] sm:$0xe]  ;;  %v2973_v52 = vrot.slane %v5606_v40, 5  ;;  %v3859_v55 = vrot.slane %v3857_v14, 5  ;;  %v4541_v57 = vrot.slane %v4539_v43, 4 }
 0x176   : > { %2827 = vst [vmem:[%s6307_s21 + $0x98] sm:$0xff] %v2795_v42  ;;  %v5865_v42 = vld [vmem:[%s6108_s6 + $0x50] sm:$0x1]  ;;  %v5645_v38 = vrot.slane %v5604_v33, 9  ;;  %v2972_v24 = vrot.slane %v2970_v32, 4  ;;  %v3875_v16 = vshrl.u32 %v5802_v0, 16 }
 0x177   : > { %v1641_v61 = vpop.f32.mrf.mxu2  ;;  %v4160_v46 = vpack.c.b16 %v4132_v28, %v4131_v27  ;;  %v4542_v58 = vrot.slane %v5865_v42, 5  ;;  %v3860_v10 = vsel %vm6160_vm6, %v3855_v49, %v3859_v55  ;;  %v5608_v28 = vld [vmem:[%s6108_s6 + $0x4c] sm:$0xf] }
 0x178   : > { %v1723_v3 = vadd.f32 %v1641_v61, %v1224_v44  ;;  %v1994_v31 = vpop.f32.mrf.mxu3  ;;  %v5904_v44 = vrot.slane %v5863_v48, 9  ;;  %v2971_v62 = vsel %vm6166_vm7, %v5645_v38, %v2970_v32  ;;  %v4134_v23 = vunpack.c.l.b16 %v3860_v10 }
 0x179   : > { %v1144_v8 = vpop.f32.mrf.mxu1 }
 0x17a   : > { %v2076_v5 = vadd.f32 %v1994_v31, %v1723_v3  ;;  %v2716_v12 = vpop.f32.mrf.mxu0  ;;  %v1225_v30 = vadd.f32 %v1193_v25, %v1144_v8  ;;  %v2974_v3 = vsel %vm6166_vm7, %v2972_v24, %v2973_v52  ;;  %v3850_v31 = vsel %vm6160_vm6, %v3845_v53, %v6876_v18  ;;  %v5868_v52 = vld [vmem:[%s6108_s6 + $0x5c] sm:$0x1] }
 0x17b   : > { %v4540_v54 = vsel %vm6166_vm7, %v5904_v44, %v4539_v43  ;;  %v3060_v18 = vunpack.c.l.b16 %v2971_v62  ;;  %v3061_v19 = vunpack.c.l.b16 %v2974_v3  ;;  %v4133_v6 = vunpack.c.l.b16 %v3850_v31  ;;  %v5607_v43 = vld [vmem:[%s6108_s6 + $0x48] sm:$0xe]  ;;  %v5805_v44 = vld [vmem:[%s6108_s6 + $0x64] sm:$0xf] }
 0x17c   : > { %v2796_v22 = vadd.f32 %v2714_v45, %v2076_v5  ;;  %v4543_v5 = vsel %vm6166_vm7, %v4541_v57, %v4542_v58  ;;  %v4629_v25 = vunpack.c.l.b16 %v4540_v54  ;;  %v4546_v24 = vrot.slane %v5867_v34, 5  ;;  %v1196_v57 = vld [vmem:[%s6307_s21 + $0xc0] sm:$0xff] }
 0x17d   : > { %v4630_v27 = vunpack.c.l.b16 %v4543_v5  ;;  %v3088_v14 = vpack.c.b16 %v3061_v19, %v3060_v18  ;;  %v5646_v49 = vrot.slane %v5607_v43, 9  ;;  %v4549_v3 = vrot.slane %v5868_v52, 5  ;;  %v5869_v52 = vld [vmem:[%s6108_s6 + $0x60] sm:$0xe] }
 0x17e   : > { %2828 = vst [vmem:[%s6307_s21 + $0xa0] sm:$0xff] %v2796_v22  ;;  %v4548_v62 = vrot.slane %v4546_v24, 4  ;;  %v3895_v10 = vshll.u32 %v5805_v44, 16  ;;  %v3899_v54 = vshrl.u32 %v5805_v44, 16 }
 0x17f   : > { %v1643_v26 = vpop.f32.mrf.mxu2  ;;  %v4657_v48 = vpack.c.b16 %v4630_v27, %v4629_v25 }
 0x180   : > { %v1724_v36 = vadd.f32 %v1643_v26, %v1225_v30  ;;  %v1996_v37 = vpop.f32.mrf.mxu3  ;;  %v3877_v30 = vrot.slane %v3875_v16, 4  ;;  %v5803_v26 = vld [vmem:[%s6108_s6 + $0x5c] sm:$0x1]  ;;  %v6944_v25 = vrot.slane %v3895_v10, 5  ;;  %v3901_v27 = vrot.slane %v3899_v54, 4 }
 0x181   : > { %v1147_v45 = vpop.f32.mrf.mxu1 }
 0x182   : > { %v2077_v50 = vadd.f32 %v1996_v37, %v1724_v36  ;;  %v2719_v51 = vpop.f32.mrf.mxu0  ;;  %v1226_v61 = vadd.f32 %v1194_v59, %v1147_v45  ;;  %v5971_v36 = vld [vmem:[%s6108_s6 + $0x48] sm:$0xff]  ;;  %v2977_v37 = vrot.slane %v5608_v28, 5 }
 0x184   : > { %5660 = vmatmul.msk.bf16.gmra.mxu1 %vm371_vm1, %v3087_v41  ;;  %5773 = vmatmul.msk.bf16.gmra.mxu2 %vm371_vm1, %v5970_v39  ;;  %v2797_v56 = vadd.f32 %v2716_v12, %v2077_v50  ;;  %v3862_v12 = vshrl.u32 %v5801_v63, 16  ;;  %v4161_v39 = vpack.c.b16 %v4134_v23, %v4133_v6  ;;  %v5609_v50 = vld [vmem:[%s6108_s6 + $0x50] sm:$0x1]  ;;  %v2979_v55 = vrot.slane %v2977_v37, 4 }
 0x185   : > { %5838 = vmatmul.msk.bf16.gmra.mxu3 %vm371_vm1, %v4160_v46  ;;  %5919 = vmatmul.msk.bf16.gmra.mxu0 %vm371_vm1, %v4656_v47  ;;  %v3878_v46 = vor.u32 %v3877_v30, %v6911_v21  ;;  %v3881_v47 = vshll.u32 %v5803_v26, 16  ;;  %v2980_v58 = vrot.slane %v5609_v50, 5  ;;  %v2978_v4 = vsel %vm6166_vm7, %v5646_v49, %v2977_v37  ;;  %v1197_v30 = vld [vmem:[%s6307_s21 + $0xc8] sm:$0xff] }
 0x186   : > { %2829 = vst [vmem:[%s6307_s21 + $0xa8] sm:$0xff] %v2797_v56  ;;  %v3864_v29 = vrot.slane %v3862_v12, 4  ;;  %v5804_v56 = vld [vmem:[%s6108_s6 + $0x60] sm:$0xf]  ;;  %v4550_v6 = vsel %vm6166_vm7, %v4548_v62, %v4549_v3  ;;  %v3062_v28 = vunpack.c.l.b16 %v2978_v4  ;;  %v1198_v3 = vld [vmem:[%s6307_s21 + $0xd0] sm:$0xff] }
 0x187   : > { %v1646_v1 = vpop.f32.mrf.mxu2  ;;  %v3883_v63 = vrot.slane %v3881_v47, 5  ;;  %v2981_v15 = vsel %vm6166_vm7, %v2979_v55, %v2980_v58  ;;  %v4632_v34 = vunpack.c.l.b16 %v4550_v6  ;;  %v5972_v47 = vld [vmem:[%s6108_s6 + $0x54] sm:$0xff] }
 0x188   : > { %v1725_v8 = vadd.f32 %v1646_v1, %v1226_v61  ;;  %v1999_v9 = vpop.f32.mrf.mxu3  ;;  %v3868_v45 = vor.u32 %v3867_v60, %v3864_v29  ;;  %v3879_v61 = vrot.slane %v3878_v46, 4  ;;  %v3063_v29 = vunpack.c.l.b16 %v2981_v15 }
 0x189   : > { %v1149_v11 = vpop.f32.mrf.mxu1 }
 0x18a   : > { %v2078_v13 = vadd.f32 %v1999_v9, %v1725_v8  ;;  %v2721_v17 = vpop.f32.mrf.mxu0  ;;  %v1227_v32 = vadd.f32 %v1195_v20, %v1149_v11  ;;  %v3869_v59 = vrot.slane %v3868_v45, 4  ;;  %v3886_v8 = vshrl.u32 %v5804_v56, 16  ;;  %v5611_v20 = vld [vmem:[%s6108_s6 + $0x58] sm:$0xf] }
 0x18b   : > { %v3889_v9 = vshll.u32 %v5804_v56, 16  ;;  %v3089_v46 = vpack.c.b16 %v3063_v29, %v3062_v28  ;;  %v1199_v29 = vld [vmem:[%s6307_s21 + $0xd8] sm:$0xff] }
 0x18c   : > { %v2798_v22 = vadd.f32 %v2719_v51, %v2078_v13  ;;  %v5866_v51 = vld [vmem:[%s6108_s6 + $0x54] sm:$0xe]  ;;  %v3874_v16 = vsel %vm6160_vm6, %v3869_v59, %v6911_v21  ;;  %v5806_v21 = vld [vmem:[%s6108_s6 + $0x68] sm:$0x1] }
 0x18d   : > { %v5905_v1 = vrot.slane %v5866_v51, 9  ;;  %v3891_v23 = vrot.slane %v3889_v9, 5  ;;  %v3905_v43 = vshll.u32 %v5806_v21, 16  ;;  %v5808_v9 = vld [vmem:[%s6108_s6 + $0x70] sm:$0xf] }
 0x18e   : > { %2830 = vst [vmem:[%s6307_s21 + $0xb0] sm:$0xff] %v2798_v22  ;;  %v3888_v22 = vrot.slane %v3886_v8, 4  ;;  %v5807_v8 = vld [vmem:[%s6108_s6 + $0x6c] sm:$0xf]  ;;  %v3919_v6 = vshll.u32 %v5808_v9, 16 }
 0x18f   : > { %v1648_v33 = vpop.f32.mrf.mxu2  ;;  %v4547_v19 = vsel %vm6166_vm7, %v5905_v1, %v4546_v24 }
 0x190   : > { %v1726_v35 = vadd.f32 %v1648_v33, %v1227_v32  ;;  %v2001_v41 = vpop.f32.mrf.mxu3  ;;  %v4135_v32 = vunpack.c.l.b16 %v3874_v16  ;;  %v4631_v33 = vunpack.c.l.b16 %v4547_v19  ;;  %v3892_v37 = vor.u32 %v3891_v23, %v3888_v22 }
 0x191   : > { %v1152_v40 = vpop.f32.mrf.mxu1  ;;  %v3913_v19 = vshll.u32 %v5807_v8, 16 }
 0x192   : > { %v2079_v42 = vadd.f32 %v2001_v41, %v1726_v35  ;;  %v2724_v38 = vpop.f32.mrf.mxu0  ;;  %v1228_v0 = vadd.f32 %v1196_v57, %v1152_v40  ;;  %v5870_v35 = vld [vmem:[%s6108_s6 + $0x64] sm:$0xf]  ;;  %v3902_v40 = vor.u32 %v3901_v27, %v6944_v25  ;;  %v4658_v51 = vpack.c.b16 %v4632_v34, %v4631_v33 }
 0x193   : > { %v4553_v50 = vrot.slane %v5870_v35, 5  ;;  %v3893_v58 = vrot.slane %v3892_v37, 4  ;;  %v3915_v34 = vrot.slane %v3913_v19, 5  ;;  %v6979_v35 = vrot.slane %v3919_v6, 5  ;;  %v5873_v37 = vld [vmem:[%s6108_s6 + $0x70] sm:$0xf] }
 0x194   : > { %5661 = vmatmul.msk.bf16.gmra.mxu1 %vm371_vm1, %v3088_v14  ;;  %5774 = vmatmul.msk.bf16.gmra.mxu2 %vm371_vm1, %v5971_v36  ;;  %v2799_v53 = vadd.f32 %v2721_v17, %v2079_v42  ;;  %v3884_v17 = vsel %vm6160_vm6, %v3879_v61, %v3883_v63  ;;  %v2984_v36 = vrot.slane %v5611_v20, 5  ;;  %v5612_v42 = vld [vmem:[%s6108_s6 + $0x5c] sm:$0x1]  ;;  %v3903_v59 = vrot.slane %v3902_v40, 4 }
 0x195   : > { %5839 = vmatmul.msk.bf16.gmra.mxu3 %vm371_vm1, %v4161_v39  ;;  %5920 = vmatmul.msk.bf16.gmra.mxu0 %vm371_vm1, %v4657_v48  ;;  %v4136_v26 = vunpack.c.l.b16 %v3884_v17  ;;  %v5610_v39 = vld [vmem:[%s6108_s6 + $0x54] sm:$0xe]  ;;  %v2987_v57 = vrot.slane %v5612_v42, 5  ;;  %v3907_v61 = vrot.slane %v3905_v43, 5  ;;  %v4555_v1 = vrot.slane %v4553_v50, 4 }
 0x196   : > { %2831 = vst [vmem:[%s6307_s21 + $0xb8] sm:$0xff] %v2799_v53  ;;  %v5871_v53 = vld [vmem:[%s6108_s6 + $0x68] sm:$0x1]  ;;  %v5647_v55 = vrot.slane %v5610_v39, 9  ;;  %v2986_v56 = vrot.slane %v2984_v36, 4  ;;  %v3923_v20 = vshrl.u32 %v5808_v9, 16 }
 0x197   : > { %v1651_v31 = vpop.f32.mrf.mxu2  ;;  %v4162_v24 = vpack.c.b16 %v4136_v26, %v4135_v32  ;;  %v4556_v62 = vrot.slane %v5871_v53, 5  ;;  %v3908_v15 = vsel %vm6160_vm6, %v3903_v59, %v3907_v61  ;;  %v5614_v26 = vld [vmem:[%s6108_s6 + $0x64] sm:$0xf] }
 0x198   : > { %v1727_v5 = vadd.f32 %v1651_v31, %v1228_v0  ;;  %v2004_v11 = vpop.f32.mrf.mxu3  ;;  %v5906_v0 = vrot.slane %v5869_v52, 9  ;;  %v2985_v54 = vsel %vm6166_vm7, %v5647_v55, %v2984_v36  ;;  %v4138_v21 = vunpack.c.l.b16 %v3908_v15 }
 0x199   : > { %v1154_v12 = vpop.f32.mrf.mxu1 }
 0x19a   : > { %v2080_v13 = vadd.f32 %v2004_v11, %v1727_v5  ;;  %v2726_v18 = vpop.f32.mrf.mxu0  ;;  %v1229_v14 = vadd.f32 %v1197_v30, %v1154_v12  ;;  %v2988_v5 = vsel %vm6166_vm7, %v2986_v56, %v2987_v57  ;;  %v3898_v11 = vsel %vm6160_vm6, %v3893_v58, %v6944_v25  ;;  %v5874_v57 = vld [vmem:[%s6108_s6 + $0x74] sm:$0x1] }
 0x19b   : > { %v4554_v16 = vsel %vm6166_vm7, %v5906_v0, %v4553_v50  ;;  %v3064_v25 = vunpack.c.l.b16 %v2985_v54  ;;  %v3065_v27 = vunpack.c.l.b16 %v2988_v5  ;;  %v4137_v28 = vunpack.c.l.b16 %v3898_v11  ;;  %v5613_v50 = vld [vmem:[%s6108_s6 + $0x60] sm:$0xe]  ;;  %v5811_v0 = vld [vmem:[%s6108_s6 + $0x7c] sm:$0xf] }
 0x19c   : > { %v2800_v60 = vadd.f32 %v2724_v38, %v2080_v13  ;;  %v4557_v13 = vsel %vm6166_vm7, %v4555_v1, %v4556_v62  ;;  %v4633_v30 = vunpack.c.l.b16 %v4554_v16  ;;  %v4560_v56 = vrot.slane %v5873_v37, 5  ;;  %v1200_v1 = vld [vmem:[%s6307_s21 + $0xe0] sm:$0xff] }
 0x19d   : > { %v4634_v32 = vunpack.c.l.b16 %v4557_v13  ;;  %v3090_v43 = vpack.c.b16 %v3065_v27, %v3064_v25  ;;  %v5648_v59 = vrot.slane %v5613_v50, 9  ;;  %v4563_v5 = vrot.slane %v5874_v57, 5  ;;  %v5875_v57 = vld [vmem:[%s6108_s6 + $0x78] sm:$0xe] }
 0x19e   : > { %2832 = vst [vmem:[%s6307_s21 + $0xc0] sm:$0xff] %v2800_v60  ;;  %v4562_v54 = vrot.slane %v4560_v56, 4  ;;  %v3943_v15 = vshll.u32 %v5811_v0, 16  ;;  %v3947_v16 = vshrl.u32 %v5811_v0, 16 }
 0x19f   : > { %v1653_v41 = vpop.f32.mrf.mxu2  ;;  %v4659_v52 = vpack.c.b16 %v4634_v32, %v4633_v30 }
 0x1a0   : > { %v1728_v45 = vadd.f32 %v1653_v41, %v1229_v14  ;;  %v2006_v48 = vpop.f32.mrf.mxu3  ;;  %v3925_v14 = vrot.slane %v3923_v20, 4  ;;  %v5809_v41 = vld [vmem:[%s6108_s6 + $0x74] sm:$0x1]  ;;  %v7012_v30 = vrot.slane %v3943_v15, 5  ;;  %v3949_v32 = vrot.slane %v3947_v16, 4 }
 0x1a1   : > { %v1157_v38 = vpop.f32.mrf.mxu1 }
 0x1a2   : > { %v2081_v49 = vadd.f32 %v2006_v48, %v1728_v45  ;;  %v2729_v44 = vpop.f32.mrf.mxu0  ;;  %v1230_v31 = vadd.f32 %v1198_v3, %v1157_v38  ;;  %v5973_v45 = vld [vmem:[%s6108_s6 + $0x60] sm:$0xff]  ;;  %v2991_v48 = vrot.slane %v5614_v26, 5 }
 0x1a4   : > { %5662 = vmatmul.msk.bf16.gmra.mxu1 %vm371_vm1, %v3089_v46  ;;  %5775 = vmatmul.msk.bf16.gmra.mxu2 %vm371_vm1, %v5972_v47  ;;  %v2801_v63 = vadd.f32 %v2726_v18, %v2081_v49  ;;  %v3910_v18 = vshrl.u32 %v5807_v8, 16  ;;  %v4163_v47 = vpack.c.b16 %v4138_v21, %v4137_v28  ;;  %v5615_v49 = vld [vmem:[%s6108_s6 + $0x68] sm:$0x1]  ;;  %v2993_v61 = vrot.slane %v2991_v48, 4 }
 0x1a5   : > { %5840 = vmatmul.msk.bf16.gmra.mxu3 %vm371_vm1, %v4162_v24  ;;  %5921 = vmatmul.msk.bf16.gmra.mxu0 %vm371_vm1, %v4658_v51  ;;  %v3926_v24 = vor.u32 %v3925_v14, %v6979_v35  ;;  %v3929_v51 = vshll.u32 %v5809_v41, 16  ;;  %v2994_v62 = vrot.slane %v5615_v49, 5  ;;  %v2992_v19 = vsel %vm6166_vm7, %v5648_v59, %v2991_v48  ;;  %v1201_v14 = vld [vmem:[%s6307_s21 + $0xe8] sm:$0xff] }
 0x1a6   : > { %2833 = vst [vmem:[%s6307_s21 + $0xc8] sm:$0xff] %v2801_v63  ;;  %v3912_v33 = vrot.slane %v3910_v18, 4  ;;  %v5810_v63 = vld [vmem:[%s6108_s6 + $0x78] sm:$0xf]  ;;  %v4564_v28 = vsel %vm6166_vm7, %v4562_v54, %v4563_v5  ;;  %v3066_v26 = vunpack.c.l.b16 %v2992_v19  ;;  %v1202_v5 = vld [vmem:[%s6307_s21 + $0xf0] sm:$0xff] }
 0x1a7   : > { %v1656_v10 = vpop.f32.mrf.mxu2  ;;  %v3931_v8 = vrot.slane %v3929_v51, 5  ;;  %v2995_v6 = vsel %vm6166_vm7, %v2993_v61, %v2994_v62  ;;  %v4636_v37 = vunpack.c.l.b16 %v4564_v28  ;;  %v5974_v51 = vld [vmem:[%s6108_s6 + $0x6c] sm:$0xff] }
 0x1a8   : > { %v1729_v12 = vadd.f32 %v1656_v10, %v1230_v31  ;;  %v2009_v4 = vpop.f32.mrf.mxu3  ;;  %v3916_v38 = vor.u32 %v3915_v34, %v3912_v33  ;;  %v3927_v31 = vrot.slane %v3926_v24, 4  ;;  %v3067_v33 = vunpack.c.l.b16 %v2995_v6 }
 0x1a9   : > { %v1159_v17 = vpop.f32.mrf.mxu1 }
 0x1aa   : > { %v2082_v22 = vadd.f32 %v2009_v4, %v1729_v12  ;;  %v2731_v23 = vpop.f32.mrf.mxu0  ;;  %v1231_v36 = vadd.f32 %v1199_v29, %v1159_v17  ;;  %v3917_v3 = vrot.slane %v3916_v38, 4  ;;  %v3934_v12 = vshrl.u32 %v5810_v63, 16  ;;  %v5617_v29 = vld [vmem:[%s6108_s6 + $0x70] sm:$0xf] }
 0x1ab   : > { %v3937_v4 = vshll.u32 %v5810_v63, 16  ;;  %v3091_v24 = vpack.c.b16 %v3067_v33, %v3066_v26  ;;  %v1203_v33 = vld [vmem:[%s6307_s21 + $0xf8] sm:$0xff] }
 0x1ac   : > { %v2802_v60 = vadd.f32 %v2729_v44, %v2082_v22  ;;  %v5872_v44 = vld [vmem:[%s6108_s6 + $0x6c] sm:$0xe]  ;;  %v3922_v20 = vsel %vm6160_vm6, %v3917_v3, %v6979_v35  ;;  %v5812_v35 = vld [vmem:[%s6108_s6 + $0x80] sm:$0x1] }
 0x1ad   : > { %v5907_v10 = vrot.slane %v5872_v44, 9  ;;  %v3939_v21 = vrot.slane %v3937_v4, 5  ;;  %v3953_v50 = vshll.u32 %v5812_v35, 16  ;;  %v5814_v4 = vld [vmem:[%s6108_s6 + $0x88] sm:$0xf] }
 0x1ae   : > { %2834 = vst [vmem:[%s6307_s21 + $0xd0] sm:$0xff] %v2802_v60  ;;  %v3936_v60 = vrot.slane %v3934_v12, 4  ;;  %v5813_v12 = vld [vmem:[%s6108_s6 + $0x84] sm:$0xf]  ;;  %v3967_v28 = vshll.u32 %v5814_v4, 16 }
 0x1af   : > { %v1658_v39 = vpop.f32.mrf.mxu2  ;;  %v4561_v27 = vsel %vm6166_vm7, %v5907_v10, %v4560_v56 }
 0x1b0   : > { %v1730_v40 = vadd.f32 %v1658_v39, %v1231_v36  ;;  %v2011_v46 = vpop.f32.mrf.mxu3  ;;  %v4139_v36 = vunpack.c.l.b16 %v3922_v20  ;;  %v4635_v39 = vunpack.c.l.b16 %v4561_v27  ;;  %v3940_v48 = vor.u32 %v3939_v21, %v3936_v60 }
 0x1b1   : > { %v1162_v42 = vpop.f32.mrf.mxu1  ;;  %v3961_v27 = vshll.u32 %v5813_v12, 16 }
 0x1b2   : > { %v2083_v53 = vadd.f32 %v2011_v46, %v1730_v40  ;;  %v2734_v55 = vpop.f32.mrf.mxu0  ;;  %v1232_v9 = vadd.f32 %v1200_v1, %v1162_v42  ;;  %v5876_v40 = vld [vmem:[%s6108_s6 + $0x7c] sm:$0xf]  ;;  %v3950_v42 = vor.u32 %v3949_v32, %v7012_v30  ;;  %v4660_v44 = vpack.c.b16 %v4636_v37, %v4635_v39 }
 0x1b3   : > { %v4567_v49 = vrot.slane %v5876_v40, 5  ;;  %v3941_v62 = vrot.slane %v3940_v48, 4  ;;  %v3963_v37 = vrot.slane %v3961_v27, 5  ;;  %v7047_v40 = vrot.slane %v3967_v28, 5  ;;  %v5879_v48 = vld [vmem:[%s6108_s6 + $0x88] sm:$0xf] }
 0x1b4   : > { %5663 = vmatmul.msk.bf16.gmra.mxu1 %vm371_vm1, %v3090_v43  ;;  %5776 = vmatmul.msk.bf16.gmra.mxu2 %vm371_vm1, %v5973_v45  ;;  %v2803_v58 = vadd.f32 %v2731_v23, %v2083_v53  ;;  %v3932_v23 = vsel %vm6160_vm6, %v3927_v31, %v3931_v8  ;;  %v2998_v45 = vrot.slane %v5617_v29, 5  ;;  %v5618_v53 = vld [vmem:[%s6108_s6 + $0x74] sm:$0x1]  ;;  %v3951_v3 = vrot.slane %v3950_v42, 4 }
 0x1b5   : > { %5841 = vmatmul.msk.bf16.gmra.mxu3 %vm371_vm1, %v4163_v47  ;;  %5922 = vmatmul.msk.bf16.gmra.mxu0 %vm371_vm1, %v4659_v52  ;;  %v4140_v41 = vunpack.c.l.b16 %v3932_v23  ;;  %v5616_v47 = vld [vmem:[%s6108_s6 + $0x6c] sm:$0xe]  ;;  %v3001_v1 = vrot.slane %v5618_v53, 5  ;;  %v3955_v31 = vrot.slane %v3953_v50, 5  ;;  %v4569_v10 = vrot.slane %v4567_v49, 4 }
 0x1b6   : > { %2835 = vst [vmem:[%s6307_s21 + $0xd8] sm:$0xff] %v2803_v58  ;;  %v5877_v58 = vld [vmem:[%s6108_s6 + $0x80] sm:$0x1]  ;;  %v5649_v61 = vrot.slane %v5616_v47, 9  ;;  %v3000_v63 = vrot.slane %v2998_v45, 4  ;;  %v3971_v29 = vshrl.u32 %v5814_v4, 16 }
 0x1b7   : > { %v1661_v11 = vpop.f32.mrf.mxu2  ;;  %v4164_v56 = vpack.c.b16 %v4140_v41, %v4139_v36  ;;  %v4570_v54 = vrot.slane %v5877_v58, 5  ;;  %v3956_v6 = vsel %vm6160_vm6, %v3951_v3, %v3955_v31  ;;  %v5620_v41 = vld [vmem:[%s6108_s6 + $0x7c] sm:$0xf] }
 0x1b8   : > { %v1731_v13 = vadd.f32 %v1661_v11, %v1232_v9  ;;  %v2014_v17 = vpop.f32.mrf.mxu3  ;;  %v5908_v9 = vrot.slane %v5875_v57, 9  ;;  %v2999_v16 = vsel %vm6166_vm7, %v5649_v61, %v2998_v45  ;;  %v4142_v35 = vunpack.c.l.b16 %v3956_v6 }
 0x1b9   : > { %v1164_v18 = vpop.f32.mrf.mxu1 }
 0x1ba   : > { %v2084_v22 = vadd.f32 %v2014_v17, %v1731_v13  ;;  %v2736_v25 = vpop.f32.mrf.mxu0  ;;  %v1233_v43 = vadd.f32 %v1201_v14, %v1164_v18  ;;  %v3002_v13 = vsel %vm6166_vm7, %v3000_v63, %v3001_v1  ;;  %v3946_v17 = vsel %vm6160_vm6, %v3941_v62, %v7012_v30  ;;  %v5880_v1 = vld [vmem:[%s6108_s6 + $0x8c] sm:$0x1] }
 0x1bb   : > { %v4568_v20 = vsel %vm6166_vm7, %v5908_v9, %v4567_v49  ;;  %v3068_v30 = vunpack.c.l.b16 %v2999_v16  ;;  %v3069_v32 = vunpack.c.l.b16 %v3002_v13  ;;  %v4141_v26 = vunpack.c.l.b16 %v3946_v17  ;;  %v5619_v49 = vld [vmem:[%s6108_s6 + $0x78] sm:$0xe]  ;;  %v5817_v9 = vld [vmem:[%s6108_s6 + $0x94] sm:$0xf] }
 0x1bc   : > { %v2804_v34 = vadd.f32 %v2734_v55, %v2084_v22  ;;  %v4571_v22 = vsel %vm6166_vm7, %v4569_v10, %v4570_v54  ;;  %v4637_v14 = vunpack.c.l.b16 %v4568_v20  ;;  %v4574_v63 = vrot.slane %v5879_v48, 5  ;;  %v3240_v10 = vld [vmem:[%s6307_s21] sm:$0xff] }
 0x1bd   : > { %v4638_v36 = vunpack.c.l.b16 %v4571_v22  ;;  %v3092_v50 = vpack.c.b16 %v3069_v32, %v3068_v30  ;;  %v5650_v3 = vrot.slane %v5619_v49, 9  ;;  %v4577_v13 = vrot.slane %v5880_v1, 5 }
 0x1be   : > { %2836 = vst [vmem:[%s6307_s21 + $0xe0] sm:$0xff] %v2804_v34  ;;  %v4576_v16 = vrot.slane %v4574_v63, 4  ;;  %v3991_v6 = vshll.u32 %v5817_v9, 16  ;;  %v3995_v20 = vshrl.u32 %v5817_v9, 16 }
 0x1bf   : > { %v1663_v46 = vpop.f32.mrf.mxu2  ;;  %v4661_v57 = vpack.c.b16 %v4638_v36, %v4637_v14 }
 0x1c0   : > { %v1732_v38 = vadd.f32 %v1663_v46, %v1233_v43  ;;  %v2016_v52 = vpop.f32.mrf.mxu3  ;;  %v3973_v43 = vrot.slane %v3971_v29, 4  ;;  %v5815_v46 = vld [vmem:[%s6108_s6 + $0x8c] sm:$0x1]  ;;  %v7087_v36 = vrot.slane %v3991_v6, 5  ;;  %v5819_v6 = vld [vmem:[%s6108_s6 + $0x9c] sm:$0xf] }
 0x1c1   : > { %v1167_v55 = vpop.f32.mrf.mxu1 }
 0x1c2   : > { %v2085_v59 = vadd.f32 %v2016_v52, %v1732_v38  ;;  %v2739_v0 = vpop.f32.mrf.mxu0  ;;  %v1234_v11 = vadd.f32 %v1202_v5, %v1167_v55  ;;  %v5975_v38 = vld [vmem:[%s6108_s6 + $0x78] sm:$0xff]  ;;  %v3005_v52 = vrot.slane %v5620_v41, 5  ;;  %v3997_v41 = vrot.slane %v3995_v20, 4 }
 0x1c4   : > { %5664 = vmatmul.msk.bf16.gmra.mxu1 %vm371_vm1, %v3091_v24  ;;  %5777 = vmatmul.msk.bf16.gmra.mxu2 %vm371_vm1, %v5974_v51  ;;  %v2805_v8 = vadd.f32 %v2736_v25, %v2085_v59  ;;  %v3958_v25 = vshrl.u32 %v5813_v12, 16  ;;  %v4165_v51 = vpack.c.b16 %v4142_v35, %v4141_v26  ;;  %v5621_v59 = vld [vmem:[%s6108_s6 + $0x80] sm:$0x1]  ;;  %v3007_v31 = vrot.slane %v3005_v52, 4  ;;  %v7081_v26 = vld [vmem:[%s6108_s6 + $0x88] sm:$0xf] }
 0x1c5   : > { %5842 = vmatmul.msk.bf16.gmra.mxu3 %vm371_vm1, %v4164_v56  ;;  %5923 = vmatmul.msk.bf16.gmra.mxu0 %vm371_vm1, %v4660_v44  ;;  %v3974_v56 = vor.u32 %v3973_v43, %v7047_v40  ;;  %v3977_v44 = vshll.u32 %v5815_v46, 16  ;;  %v3008_v54 = vrot.slane %v5621_v59, 5  ;;  %v3006_v27 = vsel %vm6166_vm7, %v5650_v3, %v3005_v52  ;;  %v7092_v43 = vld [vmem:[%s7427_s3] ss:$0 sm:$0xff]  ;;  %v5818_v46 = vld [vmem:[%s6108_s6 + $0x98] sm:$0x1] }
 0x1c6   : > { %2837 = vst [vmem:[%s6307_s21 + $0xe8] sm:$0xff] %v2805_v8  ;;  %v3960_v39 = vrot.slane %v3958_v25, 4  ;;  %v5816_v8 = vld [vmem:[%s6108_s6 + $0x90] sm:$0xf]  ;;  %v5622_v52 = vld [vmem:[%s6108_s6 + $0x84] sm:$0xe] }
 0x1c7   : > { %v1666_v15 = vpop.f32.mrf.mxu2  ;;  %v3979_v12 = vrot.slane %v3977_v44, 5  ;;  %v3009_v28 = vsel %vm6166_vm7, %v3007_v31, %v3008_v54  ;;  %v5882_v44 = vld [vmem:[%s6108_s6 + $0x94] sm:$0xf]  ;;  %v5976_v59 = vld [vmem:[%s6108_s6 + $0x84] sm:$0xff]  ;;  %v5651_v3 = vrot.slane %v5622_v52, 9 }
 0x1c8   : > { %v1733_v18 = vadd.f32 %v1666_v15, %v1234_v11  ;;  %v2019_v19 = vpop.f32.mrf.mxu3  ;;  %v3964_v55 = vor.u32 %v3963_v37, %v3960_v39  ;;  %v3975_v11 = vrot.slane %v3974_v56, 4  ;;  %v3070_v39 = vunpack.c.l.b16 %v3006_v27 }
 0x1c9   : > { %v1169_v23 = vpop.f32.mrf.mxu1  ;;  %v3071_v37 = vunpack.c.l.b16 %v3009_v28  ;;  %v4001_v56 = vshll.u32 %v5818_v46, 16 }
 0x1ca   : > { %v2086_v60 = vadd.f32 %v2019_v19, %v1733_v18  ;;  %v2741_v21 = vpop.f32.mrf.mxu0  ;;  %v1235_v45 = vadd.f32 %v1203_v33, %v1169_v23  ;;  %v3965_v5 = vrot.slane %v3964_v55, 4  ;;  %v3982_v18 = vshrl.u32 %v5816_v8, 16 }
 0x1cb   : > { %v3985_v19 = vshll.u32 %v5816_v8, 16  ;;  %v3980_v30 = vsel %vm6160_vm6, %v3975_v11, %v3979_v12  ;;  %v3998_v55 = vor.u32 %v3997_v41, %v7087_v36  ;;  %v4581_v11 = vrot.slane %v5882_v44, 5 }
 0x1cc   : > { %v2806_v34 = vadd.f32 %v2739_v0, %v2086_v60  ;;  %v5878_v0 = vld [vmem:[%s6108_s6 + $0x84] sm:$0xe]  ;;  %v3970_v29 = vsel %vm6160_vm6, %v3965_v5, %v7047_v40  ;;  %v3984_v35 = vrot.slane %v3982_v18, 4  ;;  %v4144_v48 = vunpack.c.l.b16 %v3980_v30  ;;  %v5881_v5 = vld [vmem:[%s6108_s6 + $0x90] sm:$0xe] }
 0x1cd   : > { %v5909_v15 = vrot.slane %v5878_v0, 9  ;;  %v3987_v14 = vrot.slane %v3985_v19, 5  ;;  %v5624_v0 = vld [vmem:[%s6108_s6 + $0x8c] sm:$0x1]  ;;  %v3242_v19 = vld [vmem:[%s6307_s21 + $0x10] sm:$0xff]  ;;  %v5910_v20 = vrot.slane %v5881_v5, 9 }
 0x1ce   : > { %2838 = vst [vmem:[%s6307_s21 + $0xf0] sm:$0xff] %v2806_v34  ;;  %v4578_v34 = vsel %vm6166_vm7, %v4576_v16, %v4577_v13  ;;  %v3015_v12 = vrot.slane %v5624_v0, 5  ;;  %v4003_v16 = vrot.slane %v4001_v56, 5  ;;  %v5883_v13 = vld [vmem:[%s6108_s6 + $0x98] sm:$0x1]  ;;  %v4583_v27 = vrot.slane %v4581_v11, 4 }
 0x1cf   : > { %v1668_v47 = vpop.f32.mrf.mxu2  ;;  %v4575_v33 = vsel %vm6166_vm7, %v5909_v15, %v4574_v63  ;;  %v3988_v49 = vor.u32 %v3987_v14, %v3984_v35  ;;  %v3999_v15 = vrot.slane %v3998_v55, 4  ;;  %v4584_v28 = vrot.slane %v5883_v13, 5  ;;  %v3243_v56 = vld [vmem:[%s6307_s21 + $0x18] sm:$0xff]  ;;  %v5625_v0 = vld [vmem:[%s6108_s6 + $0x90] sm:$0xe] }
 0x1d0   : > { %v1734_v42 = vadd.f32 %v1668_v47, %v1235_v45  ;;  %v2021_v24 = vpop.f32.mrf.mxu3  ;;  %v4143_v45 = vunpack.c.l.b16 %v3970_v29  ;;  %v3241_v47 = vld [vmem:[%s6307_s21 + $0x8] sm:$0xff]  ;;  %v4006_v14 = vshrl.u32 %v5819_v6, 16  ;;  %v4009_v41 = vshll.u32 %v5819_v6, 16 }
 0x1d1   : > { %v3160_v53 = vpop.f32.mrf.mxu1 }
 0x1d2   : > { %v2087_v58 = vadd.f32 %v2021_v24, %v1734_v42  ;;  %v4729_v61 = vpop.f32.mrf.mxu0  ;;  %v3272_v4 = vadd.f32 %v3240_v10, %v3160_v53  ;;  %v3012_v42 = vrot.slane %v7081_v26, 5  ;;  %v4004_v26 = vsel %vm6160_vm6, %v3999_v15, %v4003_v16  ;;  %v5627_v15 = vld [vmem:[%s6108_s6 + $0x98] sm:$0x1] }
 0x1d3   : > { %v4011_v55 = vrot.slane %v4009_v41, 5  ;;  %v5652_v16 = vrot.slane %v5625_v0, 9 }
 0x1d4   : > { %5665 = vmatmul.msk.bf16.gmra.mxu1 %vm371_vm1, %v3092_v50  ;;  %5778 = vmatmul.msk.bf16.gmra.mxu2 %vm371_vm1, %v5975_v38  ;;  %v2807_v62 = vadd.f32 %v2741_v21, %v2087_v58  ;;  %v7076_v21 = vld [vmem:[%s7426_s2] ss:$0 sm:$0xff]  ;;  %v4639_v50 = vunpack.c.l.b16 %v4575_v33  ;;  %v4640_v38 = vunpack.c.l.b16 %v4578_v34  ;;  %v3093_v58 = vpack.c.b16 %v3071_v37, %v3070_v39 }
 0x1d5   : > { %5843 = vmatmul.msk.bf16.gmra.mxu3 %vm371_vm1, %v4165_v51  ;;  %5924 = vmatmul.msk.bf16.gmra.mxu0 %vm371_vm1, %v4661_v57  ;;  %v3014_v31 = vrot.slane %v3012_v42, 4 }
 0x1d6   : > { %2839 = vst [vmem:[%s6307_s21 + $0xf8] sm:$0xff] %v2807_v62  ;;  %v4166_v62 = vpack.c.b16 %v4144_v48, %v4143_v45  ;;  %v4662_v8 = vpack.c.b16 %v4640_v38, %v4639_v50  ;;  %v4582_v45 = vsel %vm6166_vm7, %v5910_v20, %v4581_v11  ;;  %v4585_v48 = vsel %vm6166_vm7, %v4583_v27, %v4584_v28  ;;  %v5886_v27 = vld [vmem:[%s6108_s6 + $0xa4] sm:$0x1] }
 0x1d7   : > { %v3513_v17 = vpop.f32.mrf.mxu2  ;;  %v3016_v30 = vsel %vm6166_vm7, %v3014_v31, %v3015_v12 }
 0x1d8   : > { %v3625_v22 = vadd.f32 %v3513_v17, %v3272_v4  ;;  %v4233_v23 = vpop.f32.mrf.mxu3  ;;  %v3989_v4 = vrot.slane %v3988_v49, 4  ;;  %v3073_v50 = vunpack.c.l.b16 %v3016_v30  ;;  %v4008_v49 = vrot.slane %v4006_v14, 4 }
 0x1d9   : > { %v3162_v25 = vpop.f32.mrf.mxu1 }
 0x1da   : > { %v4345_v60 = vadd.f32 %v4233_v23, %v3625_v22  ;;  %v4731_v32 = vpop.f32.mrf.mxu0  ;;  %v3273_v24 = vadd.f32 %v3241_v47, %v3162_v25  ;;  %v5820_v25 = vld [vmem:[%s6108_s6 + $0xa0] sm:$0xf]  ;;  %v4012_v12 = vor.u32 %v4011_v55, %v4008_v49 }
 0x1db   : > { %v4015_v37 = vshll.u32 %v5820_v25, 16 }
 0x1dc   : > { %v4841_v40 = vadd.f32 %v4729_v61, %v4345_v60  ;;  %v3013_v60 = vsel %vm6166_vm7, %v5651_v3, %v3012_v42  ;;  %v4013_v30 = vrot.slane %v4012_v12, 4 }
 0x1dd   : > { %v3072_v42 = vunpack.c.l.b16 %v3013_v60  ;;  %v7132_v44 = vrot.slane %v4015_v37, 5  ;;  %v3022_v60 = vrot.slane %v5627_v15, 5 }
 0x1de   : > { %v4944_v51 = vmul.f32 %v7076_v21, %v4841_v40  ;;  %v4019_v40 = vshrl.u32 %v5820_v25, 16 }
 0x1df   : > { %v3515_v53 = vpop.f32.mrf.mxu2  ;;  %v3094_v3 = vpack.c.b16 %v3073_v50, %v3072_v42  ;;  %v4018_v49 = vsel %vm6160_vm6, %v4013_v30, %v7132_v44 }
 0x1e0   : > { %v3626_v57 = vadd.f32 %v3515_v53, %v3273_v24  ;;  %v4235_v61 = vpop.f32.mrf.mxu3  ;;  %v4979_v63 = vadd.f32 %v7092_v43, %v4944_v51  ;;  %v4146_v24 = vunpack.c.l.b16 %v4004_v26  ;;  %v5626_v53 = vld [vmem:[%s6108_s6 + $0x94] sm:$0xf]  ;;  %v5823_v26 = vld [vmem:[%s6108_s6 + $0xac] sm:$0xf] }
 0x1e1   : > { %v3165_v1 = vpop.f32.mrf.mxu1  ;;  %v3019_v31 = vrot.slane %v5626_v53, 5  ;;  %v4043_v42 = vshrl.u32 %v5823_v26, 16 }
 0x1e2   : > { %v4346_v9 = vadd.f32 %v4235_v61, %v3626_v57  ;;  %vm5011_vm8 = vcmp.gt.f32.partialorder %v4979_v63, 0.0  ;;  %v5043_v10 = vmul.f32 0.01, %v4979_v63  ;;  %v4734_v54 = vpop.f32.mrf.mxu0  ;;  %v3274_v22 = vadd.f32 %v3242_v19, %v3165_v1  ;;  %v5821_v1 = vld [vmem:[%s6108_s6 + $0xa4] sm:$0x1] }
 0x1e3   : > { %v4021_v57 = vrot.slane %v4019_v40, 4  ;;  %v3021_v25 = vrot.slane %v3019_v31, 4 }
 0x1e4   : > { %5666 = vmatmul.msk.bf16.gmra.mxu1 %vm371_vm1, %v3093_v58  ;;  %5779 = vmatmul.msk.bf16.gmra.mxu2 %vm371_vm1, %v5976_v59  ;;  %v5075_v17 = vsel %vm5011_vm8, %v4979_v63, %v5043_v10  ;;  %v4842_v18 = vadd.f32 %v4731_v32, %v4346_v9  ;;  %v3994_v32 = vsel %vm6160_vm6, %v3989_v4, %v7087_v36  ;;  %v4641_v58 = vunpack.c.l.b16 %v4582_v45  ;;  %v5977_v10 = vld [vmem:[%s6108_s6 + $0x90] sm:$0xff] }
 0x1e5   : > { %5107 = vst [vmem:[%s6307_s21] sm:$0xff] %v5075_v17  ;;  %5844 = vmatmul.msk.bf16.gmra.mxu3 %vm371_vm1, %v4166_v62  ;;  %5925 = vmatmul.msk.bf16.gmra.mxu0 %vm371_vm1, %v4662_v8  ;;  %v4145_v38 = vunpack.c.l.b16 %v3994_v32  ;;  %v4642_v59 = vunpack.c.l.b16 %v4585_v48  ;;  %v5885_v8 = vld [vmem:[%s6108_s6 + $0xa0] sm:$0xf]  ;;  %v4022_v13 = vor.u32 %v4021_v57, %v7132_v44  ;;  %v4025_v17 = vshll.u32 %v5821_v1, 16  ;;  %v5822_v32 = vld [vmem:[%s6108_s6 + $0xa8] sm:$0xf] }
 0x1e6   : > { %v4945_v23 = vmul.f32 %v7076_v21, %v4842_v18  ;;  %v4591_v45 = vrot.slane %v5886_v27, 5  ;;  %v4039_v48 = vshll.u32 %v5823_v26, 16 }
 0x1e7   : > { %v3518_v29 = vpop.f32.mrf.mxu2  ;;  %v4167_v11 = vpack.c.b16 %v4146_v24, %v4145_v38  ;;  %v4663_v18 = vpack.c.b16 %v4642_v59, %v4641_v58  ;;  %v4027_v14 = vrot.slane %v4025_v17, 5 }
 0x1e8   : > { %v3627_v33 = vadd.f32 %v3518_v29, %v3274_v22  ;;  %v4238_v34 = vpop.f32.mrf.mxu3  ;;  %v4980_v35 = vadd.f32 %v7092_v43, %v4945_v23  ;;  %v5884_v22 = vld [vmem:[%s6108_s6 + $0x9c] sm:$0xe]  ;;  %v4588_v23 = vrot.slane %v5885_v8, 5  ;;  %v7170_v1 = vrot.slane %v4039_v48, 5 }
 0x1e9   : > { %v3167_v39 = vpop.f32.mrf.mxu1  ;;  %v5911_v41 = vrot.slane %v5884_v22, 9 }
 0x1ea   : > { %v4347_v46 = vadd.f32 %v4238_v34, %v3627_v33  ;;  %vm5012_vm9 = vcmp.gt.f32.partialorder %v4980_v35, 0.0  ;;  %v5044_v36 = vmul.f32 0.01, %v4980_v35  ;;  %v4736_v47 = vpop.f32.mrf.mxu0  ;;  %v3275_v61 = vadd.f32 %v3243_v56, %v3167_v39  ;;  %v3244_v33 = vld [vmem:[%s6307_s21 + $0x20] sm:$0xff] }
 0x1eb   : > { %v3020_v34 = vsel %vm6166_vm7, %v5652_v16, %v3019_v31  ;;  %v4590_v40 = vrot.slane %v4588_v23, 4  ;;  %v4589_v56 = vsel %vm6166_vm7, %v5911_v41, %v4588_v23  ;;  %v5887_v41 = vld [vmem:[%s6108_s6 + $0xa8] sm:$0xe] }
 0x1ec   : > { %v5076_v51 = vsel %vm5012_vm9, %v4980_v35, %v5044_v36  ;;  %v4843_v52 = vadd.f32 %v4734_v54, %v4347_v46  ;;  %v4023_v35 = vrot.slane %v4022_v13, 4  ;;  %v4030_v36 = vshrl.u32 %v5822_v32, 16  ;;  %v5628_v13 = vld [vmem:[%s6108_s6 + $0x9c] sm:$0xe] }
 0x1ed   : > { %5108 = vst [vmem:[%s6307_s21 + $0x8] sm:$0xff] %v5076_v51  ;;  %v3023_v51 = vsel %vm6166_vm7, %v3021_v25, %v3022_v60  ;;  %v3074_v53 = vunpack.c.l.b16 %v3020_v34  ;;  %v4643_v12 = vunpack.c.l.b16 %v4589_v56  ;;  %v5978_v25 = vld [vmem:[%s6108_s6 + $0x9c] sm:$0xff] }
 0x1ee   : > { %v4946_v63 = vmul.f32 %v7076_v21, %v4843_v52  ;;  %v4028_v55 = vsel %vm6160_vm6, %v4023_v35, %v4027_v14  ;;  %v4032_v0 = vrot.slane %v4030_v36, 4  ;;  %v3075_v31 = vunpack.c.l.b16 %v3023_v51  ;;  %v5889_v36 = vld [vmem:[%s6108_s6 + $0xb0] sm:$0x1] }
 0x1ef   : > { %v3520_v62 = vpop.f32.mrf.mxu2 }
 0x1f0   : > { %v3628_v9 = vadd.f32 %v3520_v62, %v3275_v61  ;;  %v4240_v54 = vpop.f32.mrf.mxu3  ;;  %v4981_v5 = vadd.f32 %v7092_v43, %v4946_v63  ;;  %v7166_v61 = vld [vmem:[%s6108_s6 + $0xa0] sm:$0xf]  ;;  %v4592_v63 = vsel %vm6166_vm7, %v4590_v40, %v4591_v45  ;;  %v4045_v62 = vrot.slane %v4043_v42, 4  ;;  %v3246_v42 = vld [vmem:[%s6307_s21 + $0x30] sm:$0xff] }
 0x1f1   : > { %v3170_v4 = vpop.f32.mrf.mxu1  ;;  %v3095_v23 = vpack.c.b16 %v3075_v31, %v3074_v53 }
 0x1f2   : > { %v4348_v19 = vadd.f32 %v4240_v54, %v3628_v9  ;;  %vm5013_vm10 = vcmp.gt.f32.partialorder %v4981_v5, 0.0  ;;  %v5045_v6 = vmul.f32 0.01, %v4981_v5  ;;  %v4739_v20 = vpop.f32.mrf.mxu0  ;;  %v3276_v39 = vadd.f32 %v3244_v33, %v3170_v4  ;;  %v3245_v54 = vld [vmem:[%s6307_s21 + $0x28] sm:$0xff] }
 0x1f3   : > { %v4147_v9 = vunpack.c.l.b16 %v4018_v49  ;;  %v4644_v4 = vunpack.c.l.b16 %v4592_v63  ;;  %v4598_v49 = vrot.slane %v5889_v36, 5 }
 0x1f4   : > { %5667 = vmatmul.msk.bf16.gmra.mxu1 %vm371_vm1, %v3094_v3  ;;  %5780 = vmatmul.msk.bf16.gmra.mxu2 %vm371_vm1, %v5977_v10  ;;  %v5077_v28 = vsel %vm5013_vm10, %v4981_v5, %v5045_v6  ;;  %v4844_v29 = vadd.f32 %v4736_v47, %v4348_v19  ;;  %v4033_v47 = vshll.u32 %v5822_v32, 16  ;;  %v5824_v10 = vld [vmem:[%s6108_s6 + $0xb0] sm:$0x1]  ;;  %v4148_v5 = vunpack.c.l.b16 %v4028_v55 }
 0x1f5   : > { %5109 = vst [vmem:[%s6307_s21 + $0x10] sm:$0xff] %v5077_v28  ;;  %5845 = vmatmul.msk.bf16.gmra.mxu3 %vm371_vm1, %v4167_v11  ;;  %5926 = vmatmul.msk.bf16.gmra.mxu0 %vm371_vm1, %v4663_v18  ;;  %v3026_v11 = vrot.slane %v7166_v61, 5  ;;  %v4046_v19 = vor.u32 %v4045_v62, %v7170_v1  ;;  %v4049_v6 = vshll.u32 %v5824_v10, 16  ;;  %v5653_v32 = vrot.slane %v5628_v13, 9 }
 0x1f6   : > { %v4947_v37 = vmul.f32 %v7076_v21, %v4844_v29  ;;  %v4035_v44 = vrot.slane %v4033_v47, 5  ;;  %v5630_v29 = vld [vmem:[%s6108_s6 + $0xa4] sm:$0x1]  ;;  %v4168_v30 = vpack.c.b16 %v4148_v5, %v4147_v9  ;;  %v4664_v33 = vpack.c.b16 %v4644_v4, %v4643_v12 }
 0x1f7   : > { %v3523_v46 = vpop.f32.mrf.mxu2  ;;  %v3028_v26 = vrot.slane %v3026_v11, 4  ;;  %v4047_v45 = vrot.slane %v4046_v19, 4  ;;  %v3027_v56 = vsel %vm6166_vm7, %v5653_v32, %v3026_v11  ;;  %v5891_v32 = vld [vmem:[%s6108_s6 + $0xb8] sm:$0xf] }
 0x1f8   : > { %v3629_v50 = vadd.f32 %v3523_v46, %v3276_v39  ;;  %v4243_v38 = vpop.f32.mrf.mxu3  ;;  %v4982_v24 = vadd.f32 %v7092_v43, %v4947_v37  ;;  %v4036_v18 = vor.u32 %v4035_v44, %v4032_v0  ;;  %v3029_v37 = vrot.slane %v5630_v29, 5  ;;  %v5827_v29 = vld [vmem:[%s6108_s6 + $0xbc] sm:$0x1] }
 0x1f9   : > { %v3172_v52 = vpop.f32.mrf.mxu1  ;;  %v4051_v46 = vrot.slane %v4049_v6, 5  ;;  %v3076_v11 = vunpack.c.l.b16 %v3027_v56  ;;  %v3247_v6 = vld [vmem:[%s6307_s21 + $0x38] sm:$0xff]  ;;  %v4073_v36 = vshll.u32 %v5827_v29, 16 }
 0x1fa   : > { %v4349_v57 = vadd.f32 %v4243_v38, %v3629_v50  ;;  %vm5014_vm11 = vcmp.gt.f32.partialorder %v4982_v24, 0.0  ;;  %v5046_v58 = vmul.f32 0.01, %v4982_v24  ;;  %v4741_v59 = vpop.f32.mrf.mxu0  ;;  %v3277_v15 = vadd.f32 %v3245_v54, %v3172_v52  ;;  %v5825_v50 = vld [vmem:[%s6108_s6 + $0xb4] sm:$0xf] }
 0x1fb   : > { %v4037_v40 = vrot.slane %v4036_v18, 4  ;;  %v5912_v38 = vrot.slane %v5887_v41, 9  ;;  %v5826_v52 = vld [vmem:[%s6108_s6 + $0xb8] sm:$0xf]  ;;  %v4054_v44 = vshrl.u32 %v5825_v50, 16  ;;  %v4057_v62 = vshll.u32 %v5825_v50, 16 }
 0x1fc   : > { %v5078_v3 = vsel %vm5014_vm11, %v4982_v24, %v5046_v58  ;;  %v4845_v8 = vadd.f32 %v4739_v20, %v4349_v57  ;;  %v5888_v20 = vld [vmem:[%s6108_s6 + $0xac] sm:$0xf]  ;;  %v3030_v57 = vsel %vm6166_vm7, %v3028_v26, %v3029_v37  ;;  %v4063_v31 = vshll.u32 %v5826_v52, 16  ;;  %v5631_v41 = vld [vmem:[%s6108_s6 + $0xa8] sm:$0xe] }
 0x1fd   : > { %5110 = vst [vmem:[%s6307_s21 + $0x18] sm:$0xff] %v5078_v3  ;;  %v4595_v39 = vrot.slane %v5888_v20, 5  ;;  %v4042_v58 = vsel %vm6160_vm6, %v4037_v40, %v7170_v1  ;;  %v3077_v12 = vunpack.c.l.b16 %v3030_v57  ;;  %v4056_v18 = vrot.slane %v4054_v44, 4 }
 0x1fe   : > { %v4948_v16 = vmul.f32 %v7076_v21, %v4845_v8  ;;  %v4067_v8 = vshrl.u32 %v5826_v52, 16  ;;  %v4149_v4 = vunpack.c.l.b16 %v4042_v58  ;;  %v4059_v19 = vrot.slane %v4057_v62, 5 }
 0x1ff   : > { %v3525_v17 = vpop.f32.mrf.mxu2  ;;  %v4597_v53 = vrot.slane %v4595_v39, 4  ;;  %v4596_v9 = vsel %vm6166_vm7, %v5912_v38, %v4595_v39  ;;  %v7211_v20 = vrot.slane %v4063_v31, 5  ;;  %v5633_v39 = vld [vmem:[%s6108_s6 + $0xb0] sm:$0x1]  ;;  %v5890_v38 = vld [vmem:[%s6108_s6 + $0xb4] sm:$0xe] }
 0x200   : > { %v3630_v22 = vadd.f32 %v3525_v17, %v3277_v15  ;;  %v4245_v27 = vpop.f32.mrf.mxu3  ;;  %v4983_v28 = vadd.f32 %v7092_v43, %v4948_v16  ;;  %v5632_v17 = vld [vmem:[%s6108_s6 + $0xac] sm:$0xf]  ;;  %v4060_v37 = vor.u32 %v4059_v19, %v4056_v18  ;;  %v5913_v44 = vrot.slane %v5890_v38, 9  ;;  %v5980_v38 = vld [vmem:[%s6108_s6 + $0xb4] sm:$0xff] }
 0x201   : > { %v3175_v60 = vpop.f32.mrf.mxu1  ;;  %v4599_v5 = vsel %vm6166_vm7, %v4597_v53, %v4598_v49  ;;  %v3036_v53 = vrot.slane %v5633_v39, 5  ;;  %v5892_v49 = vld [vmem:[%s6108_s6 + $0xbc] sm:$0x1] }
 0x202   : > { %v4350_v34 = vadd.f32 %v4245_v27, %v3630_v22  ;;  %vm5015_vm12 = vcmp.gt.f32.partialorder %v4983_v28, 0.0  ;;  %v5047_v35 = vmul.f32 0.01, %v4983_v28  ;;  %v4744_v14 = vpop.f32.mrf.mxu0  ;;  %v3278_v24 = vadd.f32 %v3246_v42, %v3175_v60 }
 0x203   : > { %v4069_v22 = vrot.slane %v4067_v8, 4  ;;  %v4061_v58 = vrot.slane %v4060_v37, 4  ;;  %v4605_v8 = vrot.slane %v5892_v49, 5 }
 0x204   : > { %5668 = vmatmul.msk.bf16.gmra.mxu1 %vm371_vm1, %v3095_v23  ;;  %5781 = vmatmul.msk.bf16.gmra.mxu2 %vm371_vm1, %v5978_v25  ;;  %v5079_v47 = vsel %vm5015_vm12, %v4983_v28, %v5047_v35  ;;  %v4846_v48 = vadd.f32 %v4741_v59, %v4350_v34  ;;  %v4052_v59 = vsel %vm6160_vm6, %v4047_v45, %v4051_v46  ;;  %v4645_v23 = vunpack.c.l.b16 %v4596_v9  ;;  %v5979_v34 = vld [vmem:[%s6108_s6 + $0xa8] sm:$0xff] }
 0x205   : > { %5111 = vst [vmem:[%s6307_s21 + $0x20] sm:$0xff] %v5079_v47  ;;  %5846 = vmatmul.msk.bf16.gmra.mxu3 %vm371_vm1, %v4168_v30  ;;  %5927 = vmatmul.msk.bf16.gmra.mxu0 %vm371_vm1, %v4664_v33  ;;  %v4150_v15 = vunpack.c.l.b16 %v4052_v59  ;;  %v4646_v25 = vunpack.c.l.b16 %v4599_v5  ;;  %v3033_v30 = vrot.slane %v5632_v17, 5  ;;  %v3096_v33 = vpack.c.b16 %v3077_v12, %v3076_v11  ;;  %v5828_v59 = vld [vmem:[%s6108_s6 + $0xc0] sm:$0xf] }
 0x206   : > { %v4949_v51 = vmul.f32 %v7076_v21, %v4846_v48  ;;  %v4070_v46 = vor.u32 %v4069_v22, %v7211_v20  ;;  %v4081_v5 = vshll.u32 %v5828_v59, 16  ;;  %v4066_v17 = vsel %vm6160_vm6, %v4061_v58, %v7211_v20 }
 0x207   : > { %v3528_v55 = vpop.f32.mrf.mxu2  ;;  %v4169_v45 = vpack.c.b16 %v4150_v15, %v4149_v4  ;;  %v4665_v47 = vpack.c.b16 %v4646_v25, %v4645_v23  ;;  %v3035_v52 = vrot.slane %v3033_v30, 4 }
 0x208   : > { %v3631_v61 = vadd.f32 %v3528_v55, %v3278_v24  ;;  %v4248_v63 = vpop.f32.mrf.mxu3  ;;  %v4984_v0 = vadd.f32 %v7092_v43, %v4949_v51  ;;  %v4602_v24 = vrot.slane %v5891_v32, 5  ;;  %v5654_v51 = vrot.slane %v5631_v41, 9  ;;  %v3248_v55 = vld [vmem:[%s6307_s21 + $0x40] sm:$0xff]  ;;  %v5635_v32 = vld [vmem:[%s6108_s6 + $0xb8] sm:$0xf] }
 0x209   : > { %v3177_v3 = vpop.f32.mrf.mxu1  ;;  %v4083_v20 = vrot.slane %v4081_v5, 5  ;;  %v5830_v41 = vld [vmem:[%s6108_s6 + $0xc8] sm:$0x1] }
 0x20a   : > { %v4351_v10 = vadd.f32 %v4248_v63, %v3631_v61  ;;  %vm5016_vm13 = vcmp.gt.f32.partialorder %v4984_v0, 0.0  ;;  %v5048_v1 = vmul.f32 0.01, %v4984_v0  ;;  %v4746_v54 = vpop.f32.mrf.mxu0  ;;  %v3279_v27 = vadd.f32 %v3247_v6, %v3177_v3 }
 0x20b   : > { %v4071_v61 = vrot.slane %v4070_v46, 4  ;;  %v4075_v63 = vrot.slane %v4073_v36, 5  ;;  %v4604_v31 = vrot.slane %v4602_v24, 4  ;;  %v4603_v19 = vsel %vm6166_vm7, %v5913_v44, %v4602_v24 }
 0x20c   : > { %v5080_v16 = vsel %vm5016_vm13, %v4984_v0, %v5048_v1  ;;  %v4847_v13 = vadd.f32 %v4744_v14, %v4351_v10  ;;  %v5829_v0 = vld [vmem:[%s6108_s6 + $0xc4] sm:$0xf]  ;;  %v3034_v10 = vsel %vm6166_vm7, %v5654_v51, %v3033_v30  ;;  %v3037_v1 = vsel %vm6166_vm7, %v3035_v52, %v3036_v53  ;;  %v5634_v52 = vld [vmem:[%s6108_s6 + $0xb4] sm:$0xe]  ;;  %v5636_v53 = vld [vmem:[%s6108_s6 + $0xbc] sm:$0x1] }
 0x20d   : > { %5112 = vst [vmem:[%s6307_s21 + $0x28] sm:$0xff] %v5080_v16  ;;  %v4087_v15 = vshll.u32 %v5829_v0, 16  ;;  %v4091_v16 = vshrl.u32 %v5829_v0, 16  ;;  %v4076_v18 = vsel %vm6160_vm6, %v4071_v61, %v4075_v63  ;;  %v4606_v25 = vsel %vm6166_vm7, %v4604_v31, %v4605_v8  ;;  %v5893_v0 = vld [vmem:[%s6108_s6 + $0xc0] sm:$0xe] }
 0x20e   : > { %v4950_v28 = vmul.f32 %v7076_v21, %v4847_v13  ;;  %v4647_v39 = vunpack.c.l.b16 %v4603_v19  ;;  %v4648_v37 = vunpack.c.l.b16 %v4606_v25  ;;  %v3043_v31 = vrot.slane %v5636_v53, 5 }
 0x20f   : > { %v3530_v60 = vpop.f32.mrf.mxu2 }
 0x210   : > { %v3632_v26 = vadd.f32 %v3530_v60, %v3279_v27  ;;  %v4250_v35 = vpop.f32.mrf.mxu3  ;;  %v4985_v14 = vadd.f32 %v7092_v43, %v4950_v28  ;;  %v3078_v27 = vunpack.c.l.b16 %v3034_v10  ;;  %v3079_v28 = vunpack.c.l.b16 %v3037_v1 }
 0x211   : > { %v3180_v40 = vpop.f32.mrf.mxu1  ;;  %v4666_v58 = vpack.c.b16 %v4648_v37, %v4647_v39 }
 0x212   : > { %v4352_v48 = vadd.f32 %v4250_v35, %v3632_v26  ;;  %vm5017_vm14 = vcmp.gt.f32.partialorder %v4985_v14, 0.0  ;;  %v5049_v42 = vmul.f32 0.01, %v4985_v14  ;;  %v4749_v50 = vpop.f32.mrf.mxu0  ;;  %v3280_v62 = vadd.f32 %v3248_v55, %v3180_v40 }
 0x213   : > { %v7247_v26 = vrot.slane %v4087_v15, 5  ;;  %v4151_v35 = vunpack.c.l.b16 %v4066_v17  ;;  %v3097_v36 = vpack.c.b16 %v3079_v28, %v3078_v27  ;;  %v4097_v55 = vshll.u32 %v5830_v41, 16 }
 0x214   : > { %5669 = vmatmul.msk.bf16.gmra.mxu1 %vm371_vm1, %v3096_v33  ;;  %5782 = vmatmul.msk.bf16.gmra.mxu2 %vm371_vm1, %v5979_v34  ;;  %v5081_v56 = vsel %vm5017_vm14, %v4985_v14, %v5049_v42  ;;  %v4848_v57 = vadd.f32 %v4746_v54, %v4352_v48  ;;  %v4078_v54 = vshrl.u32 %v5828_v59, 16  ;;  %v4093_v33 = vrot.slane %v4091_v16, 4  ;;  %v3249_v34 = vld [vmem:[%s6307_s21 + $0x48] sm:$0xff]  ;;  %v5894_v42 = vld [vmem:[%s6108_s6 + $0xc4] sm:$0xf] }
 0x215   : > { %5113 = vst [vmem:[%s6307_s21 + $0x30] sm:$0xff] %v5081_v56  ;;  %5847 = vmatmul.msk.bf16.gmra.mxu3 %vm371_vm1, %v4169_v45  ;;  %5928 = vmatmul.msk.bf16.gmra.mxu0 %vm371_vm1, %v4665_v47  ;;  %v4152_v14 = vunpack.c.l.b16 %v4076_v18  ;;  %v3040_v47 = vrot.slane %v5635_v32, 5  ;;  %v4609_v44 = vrot.slane %v5894_v42, 5  ;;  %v4099_v5 = vrot.slane %v4097_v55, 5  ;;  %v5833_v55 = vld [vmem:[%s6108_s6 + $0xd4] sm:$0x1] }
 0x216   : > { %v4951_v3 = vmul.f32 %v7076_v21, %v4848_v57  ;;  %v4080_v29 = vrot.slane %v4078_v54, 4  ;;  %v4094_v49 = vor.u32 %v4093_v33, %v7247_v26 }
 0x217   : > { %v3533_v9 = vpop.f32.mrf.mxu2  ;;  %v4170_v57 = vpack.c.b16 %v4152_v14, %v4151_v35  ;;  %v4611_v17 = vrot.slane %v4609_v44, 4 }
 0x218   : > { %v3633_v11 = vadd.f32 %v3533_v9, %v3280_v62  ;;  %v4253_v12 = vpop.f32.mrf.mxu3  ;;  %v4986_v4 = vadd.f32 %v7092_v43, %v4951_v3  ;;  %v4084_v48 = vor.u32 %v4083_v20, %v4080_v29  ;;  %v5655_v62 = vrot.slane %v5634_v52, 9  ;;  %v5895_v9 = vld [vmem:[%s6108_s6 + $0xc8] sm:$0x1] }
 0x219   : > { %v3182_v13 = vpop.f32.mrf.mxu1  ;;  %v3042_v3 = vrot.slane %v3040_v47, 4  ;;  %v4095_v54 = vrot.slane %v4094_v49, 4  ;;  %v4612_v18 = vrot.slane %v5895_v9, 5 }
 0x21a   : > { %v4353_v6 = vadd.f32 %v4253_v12, %v3633_v11  ;;  %vm5018_vm15 = vcmp.gt.f32.partialorder %v4986_v4, 0.0  ;;  %v5050_v22 = vmul.f32 0.01, %v4986_v4  ;;  %v4751_v23 = vpop.f32.mrf.mxu0  ;;  %v3281_v40 = vadd.f32 %v3249_v34, %v3182_v13  ;;  %v3250_v11 = vld [vmem:[%s6307_s21 + $0x50] sm:$0xff]  ;;  %v5831_v12 = vld [vmem:[%s6108_s6 + $0xcc] sm:$0xf] }
 0x21b   : > { %v4085_v8 = vrot.slane %v4084_v48, 4  ;;  %v5832_v13 = vld [vmem:[%s6108_s6 + $0xd0] sm:$0xf]  ;;  %v4100_v29 = vsel %vm6160_vm6, %v4095_v54, %v4099_v5  ;;  %v4102_v20 = vshrl.u32 %v5831_v12, 16  ;;  %v4613_v41 = vsel %vm6166_vm7, %v4611_v17, %v4612_v18 }
 0x21c   : > { %v5082_v60 = vsel %vm5018_vm15, %v4986_v4, %v5050_v22  ;;  %v4849_v30 = vadd.f32 %v4749_v50, %v4353_v6  ;;  %v5914_v4 = vrot.slane %v5893_v0, 9  ;;  %v3041_v6 = vsel %vm6166_vm7, %v5655_v62, %v3040_v47  ;;  %v5637_v62 = vld [vmem:[%s6108_s6 + $0xc0] sm:$0xe] }
 0x21d   : > { %5114 = vst [vmem:[%s6307_s21 + $0x38] sm:$0xff] %v5082_v60  ;;  %v3044_v22 = vsel %vm6166_vm7, %v3042_v3, %v3043_v31  ;;  %v4111_v32 = vshll.u32 %v5832_v13, 16  ;;  %v4115_v33 = vshrl.u32 %v5832_v13, 16  ;;  %v3080_v39 = vunpack.c.l.b16 %v3041_v6  ;;  %v5898_v13 = vld [vmem:[%s6108_s6 + $0xd4] sm:$0x1] }
 0x21e   : > { %v4952_v45 = vmul.f32 %v7076_v21, %v4849_v30  ;;  %v4105_v30 = vshll.u32 %v5831_v12, 16  ;;  %v4610_v34 = vsel %vm6166_vm7, %v5914_v4, %v4609_v44  ;;  %v3081_v37 = vunpack.c.l.b16 %v3044_v22  ;;  %v5896_v4 = vld [vmem:[%s6108_s6 + $0xcc] sm:$0xe]  ;;  %v3252_v22 = vld [vmem:[%s6307_s21 + $0x60] sm:$0xff] }
 0x21f   : > { %v3535_v46 = vpop.f32.mrf.mxu2  ;;  %v4104_v48 = vrot.slane %v4102_v20, 4  ;;  %v4649_v42 = vunpack.c.l.b16 %v4610_v34  ;;  %v4650_v52 = vunpack.c.l.b16 %v4613_v41 }
 0x220   : > { %v3634_v50 = vadd.f32 %v3535_v46, %v3281_v40  ;;  %v4255_v24 = vpop.f32.mrf.mxu3  ;;  %v4987_v51 = vadd.f32 %v7092_v43, %v4952_v45  ;;  %v4154_v45 = vunpack.c.l.b16 %v4100_v29  ;;  %v3251_v46 = vld [vmem:[%s6307_s21 + $0x58] sm:$0xff] }
 0x221   : > { %v3185_v56 = vpop.f32.mrf.mxu1  ;;  %v4667_v54 = vpack.c.b16 %v4650_v52, %v4649_v42 }
 0x222   : > { %v4354_v59 = vadd.f32 %v4255_v24, %v3634_v50  ;;  %vm5019_vm0 = vcmp.gt.f32.partialorder %v4987_v51, 0.0  ;;  %v5051_v61 = vmul.f32 0.01, %v4987_v51  ;;  %v4754_v63 = vpop.f32.mrf.mxu0  ;;  %v3282_v15 = vadd.f32 %v3250_v11, %v3185_v56  ;;  %v5638_v50 = vld [vmem:[%s6108_s6 + $0xc4] sm:$0xf] }
 0x223   : > { %v7287_v24 = vrot.slane %v4111_v32, 5  ;;  %v3047_v3 = vrot.slane %v5638_v50, 5 }
 0x224   : > { %5670 = vmatmul.msk.bf16.gmra.mxu1 %vm371_vm1, %v3097_v36  ;;  %5783 = vmatmul.msk.bf16.gmra.mxu2 %vm371_vm1, %v5980_v38  ;;  %v5083_v10 = vsel %vm5019_vm0, %v4987_v51, %v5051_v61  ;;  %v4850_v1 = vadd.f32 %v4751_v23, %v4354_v59  ;;  %v4090_v23 = vsel %vm6160_vm6, %v4085_v8, %v7247_v26  ;;  %v4107_v38 = vrot.slane %v4105_v30, 5  ;;  %v5981_v61 = vld [vmem:[%s6108_s6 + $0xc0] sm:$0xff]  ;;  %v5639_v8 = vld [vmem:[%s6108_s6 + $0xc8] sm:$0x1] }
 0x225   : > { %5115 = vst [vmem:[%s6307_s21 + $0x40] sm:$0xff] %v5083_v10  ;;  %5848 = vmatmul.msk.bf16.gmra.mxu3 %vm371_vm1, %v4170_v57  ;;  %5929 = vmatmul.msk.bf16.gmra.mxu0 %vm371_vm1, %v4666_v58  ;;  %v4153_v40 = vunpack.c.l.b16 %v4090_v23  ;;  %v4117_v51 = vrot.slane %v4115_v33, 4  ;;  %v3098_v57 = vpack.c.b16 %v3081_v37, %v3080_v39  ;;  %v5897_v58 = vld [vmem:[%s6108_s6 + $0xd0] sm:$0xf]  ;;  %v3050_v6 = vrot.slane %v5639_v8, 5 }
 0x226   : > { %v4953_v16 = vmul.f32 %v7076_v21, %v4850_v1  ;;  %v4108_v9 = vor.u32 %v4107_v38, %v4104_v48  ;;  %v4121_v1 = vshll.u32 %v5833_v55, 16  ;;  %v4619_v30 = vrot.slane %v5898_v13, 5 }
 0x227   : > { %v3538_v19 = vpop.f32.mrf.mxu2  ;;  %v4171_v44 = vpack.c.b16 %v4154_v45, %v4153_v40  ;;  %v4118_v10 = vor.u32 %v4117_v51, %v7287_v24  ;;  %v3253_v51 = vld [vmem:[%s6307_s21 + $0x68] sm:$0xff] }
 0x228   : > { %v3635_v25 = vadd.f32 %v3538_v19, %v3282_v15  ;;  %v4258_v27 = vpop.f32.mrf.mxu3  ;;  %v4988_v28 = vadd.f32 %v7092_v43, %v4953_v16  ;;  %v4616_v15 = vrot.slane %v5897_v58, 5  ;;  %v5656_v16 = vrot.slane %v5637_v62, 9 }
 0x229   : > { %v3187_v60 = vpop.f32.mrf.mxu1  ;;  %v3049_v19 = vrot.slane %v3047_v3, 4  ;;  %v4109_v23 = vrot.slane %v4108_v9, 4  ;;  %v3254_v9 = vld [vmem:[%s6307_s21 + $0x70] sm:$0xff] }
 0x22a   : > { %v4355_v35 = vadd.f32 %v4258_v27, %v3635_v25  ;;  %vm5020_vm2 = vcmp.gt.f32.partialorder %v4988_v28, 0.0  ;;  %v5052_v26 = vmul.f32 0.01, %v4988_v28  ;;  %v4756_v14 = vpop.f32.mrf.mxu0  ;;  %v3283_v53 = vadd.f32 %v3251_v46, %v3187_v60 }
 0x22b   : > { %v4119_v25 = vrot.slane %v4118_v10, 4  ;;  %v4123_v27 = vrot.slane %v4121_v1, 5  ;;  %v4618_v60 = vrot.slane %v4616_v15, 4  ;;  %v3051_v41 = vsel %vm6166_vm7, %v3049_v19, %v3050_v6  ;;  %v7334_v1 = vld [vmem:[%s7426_s2] ss:$0 sm:$0xff]  ;;  %v3255_v6 = vld [vmem:[%s6307_s21 + $0x78] sm:$0xff] }
 0x22c   : > { %v5084_v36 = vsel %vm5020_vm2, %v4988_v28, %v5052_v26  ;;  %v4851_v47 = vadd.f32 %v4754_v63, %v4355_v35  ;;  %v5915_v28 = vrot.slane %v5896_v4, 9  ;;  %v3048_v26 = vsel %vm6166_vm7, %v5656_v16, %v3047_v3 }
 0x22d   : > { %5116 = vst [vmem:[%s6307_s21 + $0x48] sm:$0xff] %v5084_v36  ;;  %v4114_v39 = vsel %vm6160_vm6, %v4109_v23, %v7287_v24  ;;  %v4124_v37 = vsel %vm6160_vm6, %v4119_v25, %v4123_v27  ;;  %v3082_v42 = vunpack.c.l.b16 %v3048_v26  ;;  %v3083_v50 = vunpack.c.l.b16 %v3051_v41 }
 0x22e   : > { %v4954_v49 = vmul.f32 %v7076_v21, %v4851_v47  ;;  %v4617_v40 = vsel %vm6166_vm7, %v5915_v28, %v4616_v15  ;;  %v4620_v47 = vsel %vm6166_vm7, %v4618_v60, %v4619_v30  ;;  %v4155_v24 = vunpack.c.l.b16 %v4114_v39 }
 0x22f   : > { %v3540_v56 = vpop.f32.mrf.mxu2  ;;  %v4156_v2 = vunpack.c.l.b16 %v4124_v37  ;;  %v4651_v52 = vunpack.c.l.b16 %v4617_v40  ;;  %v3099_v58 = vpack.c.b16 %v3083_v50, %v3082_v42  ;;  %v3257_v50 = vld [vmem:[%s6307_s21 + $0x88] sm:$0xff] }
 0x230   : > { %v3636_v59 = vadd.f32 %v3540_v56, %v3283_v53  ;;  %v4260_v63 = vpop.f32.mrf.mxu3  ;;  %v4989_v0 = vadd.f32 %v7092_v43, %v4954_v49  ;;  %v4652_v53 = vunpack.c.l.b16 %v4620_v47 }
 0x231   : > { %v3190_v31 = vpop.f32.mrf.mxu1 }
 0x232   : > { %v4356_v5 = vadd.f32 %v4260_v63, %v3636_v59  ;;  %vm5021_vm3 = vcmp.gt.f32.partialorder %v4989_v0, 0.0  ;;  %v5053_v11 = vmul.f32 0.01, %v4989_v0  ;;  %v4759_v12 = vpop.f32.mrf.mxu0  ;;  %v3284_v29 = vadd.f32 %v3252_v22, %v3190_v31 }
 0x234   : > { %5671 = vmatmul.msk.bf16.gmra.mxu1 %vm371_vm1, %v3098_v57  ;;  %5784 = vmatmul.msk.bf16.gmra.mxu2 %vm371_vm1, %v5981_v61  ;;  %v5085_v17 = vsel %vm5021_vm3, %v4989_v0, %v5053_v11  ;;  %v4852_v18 = vadd.f32 %v4756_v14, %v4356_v5  ;;  %v4172_v0 = vpack.c.b16 %v4156_v2, %v4155_v24 }
 0x235   : > { %5117 = vst [vmem:[%s6307_s21 + $0x50] sm:$0xff] %v5085_v17  ;;  %5849 = vmatmul.msk.bf16.gmra.mxu3 %vm371_vm1, %v4171_v44  ;;  %5930 = vmatmul.msk.bf16.gmra.mxu0 %vm371_vm1, %v4667_v54  ;;  %v4668_v44 = vpack.c.b16 %v4652_v53, %v4651_v52 }
 0x236   : > { %v4955_v20 = vmul.f32 %v7076_v21, %v4852_v18 }
 0x237   : > { %v3543_v32 = vpop.f32.mrf.mxu2 }
 0x238   : > { %v3637_v33 = vadd.f32 %v3543_v32, %v3284_v29  ;;  %v4263_v34 = vpop.f32.mrf.mxu3  ;;  %v4990_v35 = vadd.f32 %v7092_v43, %v4955_v20 }
 0x239   : > { %v3192_v14 = vpop.f32.mrf.mxu1 }
 0x23a   : > { %v4357_v45 = vadd.f32 %v4263_v34, %v3637_v33  ;;  %vm5022_vm4 = vcmp.gt.f32.partialorder %v4990_v35, 0.0  ;;  %v5054_v46 = vmul.f32 0.01, %v4990_v35  ;;  %v4761_v36 = vpop.f32.mrf.mxu0  ;;  %v3285_v49 = vadd.f32 %v3253_v51, %v3192_v14 }
 0x23c   : > { %v5086_v48 = vsel %vm5022_vm4, %v4990_v35, %v5054_v46  ;;  %v4853_v38 = vadd.f32 %v4759_v12, %v4357_v45  ;;  %v3256_v35 = vld [vmem:[%s6307_s21 + $0x80] sm:$0xff] }
 0x23d   : > { %5118 = vst [vmem:[%s6307_s21 + $0x58] sm:$0xff] %v5086_v48 }
 0x23e   : > { %v4956_v55 = vmul.f32 %v7076_v21, %v4853_v38 }
 0x23f   : > { %v3545_v56 = vpop.f32.mrf.mxu2 }
 0x240   : > { %v3638_v57 = vadd.f32 %v3545_v56, %v3285_v49  ;;  %v4265_v59 = vpop.f32.mrf.mxu3  ;;  %v4991_v61 = vadd.f32 %v7092_v43, %v4956_v55 }
 0x241   : > { %v3195_v63 = vpop.f32.mrf.mxu1 }
 0x242   : > { %v4358_v62 = vadd.f32 %v4265_v59, %v3638_v57  ;;  %vm5023_vm5 = vcmp.gt.f32.partialorder %v4991_v61, 0.0  ;;  %v5055_v3 = vmul.f32 0.01, %v4991_v61  ;;  %v4764_v31 = vpop.f32.mrf.mxu0  ;;  %v3286_v10 = vadd.f32 %v3254_v9, %v3195_v63  ;;  %v3258_v59 = vld [vmem:[%s6307_s21 + $0x90] sm:$0xff] }
 0x244   : > { %5672 = vmatmul.msk.bf16.gmra.mxu1 %vm371_vm1, %v3099_v58  ;;  %5785 = vmatmul.msk.bf16.gmra.mxu2 %vm371_vm1, %v5982_v7  ;;  %v5087_v21 = vsel %vm5023_vm5, %v4991_v61, %v5055_v3  ;;  %v4854_v8 = vadd.f32 %v4761_v36, %v4358_v62 }
 0x245   : > { %5119 = vst [vmem:[%s6307_s21 + $0x60] sm:$0xff] %v5087_v21  ;;  %5850 = vmatmul.msk.bf16.gmra.mxu3 %vm371_vm1, %v4172_v0  ;;  %5931 = vmatmul.msk.bf16.gmra.mxu0 %vm371_vm1, %v4668_v44 }
 0x246   : > { %v4957_v54 = vmul.f32 %v7334_v1, %v4854_v8 }
 0x247   : > { %v3548_v5 = vpop.f32.mrf.mxu2 }
 0x248   : > { %v3639_v11 = vadd.f32 %v3548_v5, %v3286_v10  ;;  %v4268_v12 = vpop.f32.mrf.mxu3  ;;  %v4992_v4 = vadd.f32 %v7092_v43, %v4957_v54  ;;  %v7344_v43 = vld [vmem:[%s7427_s3] ss:$0 sm:$0xff]  ;;  %v3259_v5 = vld [vmem:[%s6307_s21 + $0x98] sm:$0xff] }
 0x249   : > { %v3197_v15 = vpop.f32.mrf.mxu1 }
 0x24a   : > { %v4359_v16 = vadd.f32 %v4268_v12, %v3639_v11  ;;  %vm5024_vm6 = vcmp.gt.f32.partialorder %v4992_v4, 0.0  ;;  %v5056_v13 = vmul.f32 0.01, %v4992_v4  ;;  %v4766_v17 = vpop.f32.mrf.mxu0  ;;  %v3287_v22 = vadd.f32 %v3255_v6, %v3197_v15 }
 0x24c   : > { %v5088_v18 = vsel %vm5024_vm6, %v4992_v4, %v5056_v13  ;;  %v4855_v19 = vadd.f32 %v4764_v31, %v4359_v16 }
 0x24d   : > { %5120 = vst [vmem:[%s6307_s21 + $0x68] sm:$0xff] %v5088_v18 }
 0x24e   : > { %v4958_v23 = vmul.f32 %v7334_v1, %v4855_v19 }
 0x24f   : > { %v3550_v25 = vpop.f32.mrf.mxu2 }
 0x250   : > { %v3640_v27 = vadd.f32 %v3550_v25, %v3287_v22  ;;  %v4270_v28 = vpop.f32.mrf.mxu3  ;;  %v4993_v29 = vadd.f32 %v7344_v43, %v4958_v23  ;;  %v3260_v25 = vld [vmem:[%s6307_s21 + $0xa0] sm:$0xff] }
 0x251   : > { %v3200_v20 = vpop.f32.mrf.mxu1 }
 0x252   : > { %v4360_v60 = vadd.f32 %v4270_v28, %v3640_v27  ;;  %vm5025_vm1 = vcmp.gt.f32.partialorder %v4993_v29, 0.0  ;;  %v5057_v30 = vmul.f32 0.01, %v4993_v29  ;;  %v4769_v32 = vpop.f32.mrf.mxu0  ;;  %v3288_v26 = vadd.f32 %v3256_v35, %v3200_v20 }
 0x254   : > { %v5089_v33 = vsel %vm5025_vm1, %v4993_v29, %v5057_v30  ;;  %v4856_v34 = vadd.f32 %v4766_v17, %v4360_v60 }
 0x255   : > { %5121 = vst [vmem:[%s6307_s21 + $0x70] sm:$0xff] %v5089_v33 }
 0x256   : > { %v4959_v14 = vmul.f32 %v7334_v1, %v4856_v34 }
 0x257   : > { %v3553_v41 = vpop.f32.mrf.mxu2 }
 0x258   : > { %v3641_v39 = vadd.f32 %v3553_v41, %v3288_v26  ;;  %v4273_v37 = vpop.f32.mrf.mxu3  ;;  %v4994_v40 = vadd.f32 %v7344_v43, %v4959_v14  ;;  %v3261_v41 = vld [vmem:[%s6307_s21 + $0xa8] sm:$0xff] }
 0x259   : > { %v3202_v45 = vpop.f32.mrf.mxu1 }
 0x25a   : > { %v4361_v46 = vadd.f32 %v4273_v37, %v3641_v39  ;;  %vm5026_vm7 = vcmp.gt.f32.partialorder %v4994_v40, 0.0  ;;  %v5058_v36 = vmul.f32 0.01, %v4994_v40  ;;  %v4771_v47 = vpop.f32.mrf.mxu0  ;;  %v3289_v38 = vadd.f32 %v3257_v50, %v3202_v45 }
 0x25c   : > { %v5090_v48 = vsel %vm5026_vm7, %v4994_v40, %v5058_v36  ;;  %v4857_v42 = vadd.f32 %v4769_v32, %v4361_v46 }
 0x25d   : > { %5122 = vst [vmem:[%s6307_s21 + $0x78] sm:$0xff] %v5090_v48 }
 0x25e   : > { %v4960_v51 = vmul.f32 %v7334_v1, %v4857_v42 }
 0x25f   : > { %v3555_v24 = vpop.f32.mrf.mxu2 }
 0x260   : > { %v3642_v2 = vadd.f32 %v3555_v24, %v3289_v38  ;;  %v4275_v52 = vpop.f32.mrf.mxu3  ;;  %v4995_v53 = vadd.f32 %v7344_v43, %v4960_v51  ;;  %v3262_v24 = vld [vmem:[%s6307_s21 + $0xb0] sm:$0xff] }
 0x261   : > { %v3205_v49 = vpop.f32.mrf.mxu1 }
 0x262   : > { %v4362_v55 = vadd.f32 %v4275_v52, %v3642_v2  ;;  %vm5027_vm8 = vcmp.gt.f32.partialorder %v4995_v53, 0.0  ;;  %v5059_v56 = vmul.f32 0.01, %v4995_v53  ;;  %v4774_v57 = vpop.f32.mrf.mxu0  ;;  %v3290_v61 = vadd.f32 %v3258_v59, %v3205_v49 }
 0x264   : > { %v5091_v58 = vsel %vm5027_vm8, %v4995_v53, %v5059_v56  ;;  %v4858_v7 = vadd.f32 %v4771_v47, %v4362_v55 }
 0x265   : > { %5123 = vst [vmem:[%s6307_s21 + $0x80] sm:$0xff] %v5091_v58 }
 0x266   : > { %v4961_v63 = vmul.f32 %v7334_v1, %v4858_v7 }
 0x267   : > { %v3558_v0 = vpop.f32.mrf.mxu2 }
 0x268   : > { %v3643_v44 = vadd.f32 %v3558_v0, %v3290_v61  ;;  %v4278_v62 = vpop.f32.mrf.mxu3  ;;  %v4996_v3 = vadd.f32 %v7344_v43, %v4961_v63  ;;  %v3263_v0 = vld [vmem:[%s6307_s21 + $0xb8] sm:$0xff] }
 0x269   : > { %v3207_v31 = vpop.f32.mrf.mxu1 }
 0x26a   : > { %v4363_v21 = vadd.f32 %v4278_v62, %v3643_v44  ;;  %vm5028_vm9 = vcmp.gt.f32.partialorder %v4996_v3, 0.0  ;;  %v5060_v8 = vmul.f32 0.01, %v4996_v3  ;;  %v4776_v9 = vpop.f32.mrf.mxu0  ;;  %v3291_v11 = vadd.f32 %v3259_v5, %v3207_v31 }
 0x26c   : > { %v5092_v10 = vsel %vm5028_vm9, %v4996_v3, %v5060_v8  ;;  %v4859_v54 = vadd.f32 %v4774_v57, %v4363_v21 }
 0x26d   : > { %5124 = vst [vmem:[%s6307_s21 + $0x88] sm:$0xff] %v5092_v10 }
 0x26e   : > { %v4962_v12 = vmul.f32 %v7334_v1, %v4859_v54 }
 0x26f   : > { %v3560_v4 = vpop.f32.mrf.mxu2 }
 0x270   : > { %v3644_v15 = vadd.f32 %v3560_v4, %v3291_v11  ;;  %v4280_v16 = vpop.f32.mrf.mxu3  ;;  %v4997_v13 = vadd.f32 %v7344_v43, %v4962_v12  ;;  %v3264_v4 = vld [vmem:[%s6307_s21 + $0xc0] sm:$0xff] }
 0x271   : > { %v3210_v17 = vpop.f32.mrf.mxu1 }
 0x272   : > { %v4364_v18 = vadd.f32 %v4280_v16, %v3644_v15  ;;  %vm5029_vm10 = vcmp.gt.f32.partialorder %v4997_v13, 0.0  ;;  %v5061_v19 = vmul.f32 0.01, %v4997_v13  ;;  %v4779_v6 = vpop.f32.mrf.mxu0  ;;  %v3292_v27 = vadd.f32 %v3260_v25, %v3210_v17 }
 0x274   : > { %v5093_v22 = vsel %vm5029_vm10, %v4997_v13, %v5061_v19  ;;  %v4860_v23 = vadd.f32 %v4776_v9, %v4364_v18 }
 0x275   : > { %5125 = vst [vmem:[%s6307_s21 + $0x90] sm:$0xff] %v5093_v22 }
 0x276   : > { %v4963_v28 = vmul.f32 %v7334_v1, %v4860_v23 }
 0x277   : > { %v3563_v29 = vpop.f32.mrf.mxu2 }
 0x278   : > { %v3645_v20 = vadd.f32 %v3563_v29, %v3292_v27  ;;  %v4283_v60 = vpop.f32.mrf.mxu3  ;;  %v4998_v30 = vadd.f32 %v7344_v43, %v4963_v28  ;;  %v3265_v29 = vld [vmem:[%s6307_s21 + $0xc8] sm:$0xff] }
 0x279   : > { %v3212_v32 = vpop.f32.mrf.mxu1 }
 0x27a   : > { %v4365_v33 = vadd.f32 %v4283_v60, %v3645_v20  ;;  %vm5030_vm11 = vcmp.gt.f32.partialorder %v4998_v30, 0.0  ;;  %v5062_v34 = vmul.f32 0.01, %v4998_v30  ;;  %v4781_v35 = vpop.f32.mrf.mxu0  ;;  %v3293_v39 = vadd.f32 %v3261_v41, %v3212_v32 }
 0x27c   : > { %v5094_v26 = vsel %vm5030_vm11, %v4998_v30, %v5062_v34  ;;  %v4861_v14 = vadd.f32 %v4779_v6, %v4365_v33 }
 0x27d   : > { %5126 = vst [vmem:[%s6307_s21 + $0x98] sm:$0xff] %v5094_v26 }
 0x27e   : > { %v4964_v37 = vmul.f32 %v7334_v1, %v4861_v14 }
 0x27f   : > { %v3565_v40 = vpop.f32.mrf.mxu2 }
 0x280   : > { %v3646_v45 = vadd.f32 %v3565_v40, %v3293_v39  ;;  %v4285_v46 = vpop.f32.mrf.mxu3  ;;  %v4999_v36 = vadd.f32 %v7344_v43, %v4964_v37  ;;  %v3266_v40 = vld [vmem:[%s6307_s21 + $0xd0] sm:$0xff] }
 0x281   : > { %v3215_v47 = vpop.f32.mrf.mxu1 }
 0x282   : > { %v4366_v48 = vadd.f32 %v4285_v46, %v3646_v45  ;;  %vm5031_vm12 = vcmp.gt.f32.partialorder %v4999_v36, 0.0  ;;  %v5063_v42 = vmul.f32 0.01, %v4999_v36  ;;  %v4784_v50 = vpop.f32.mrf.mxu0  ;;  %v3294_v2 = vadd.f32 %v3262_v24, %v3215_v47 }
 0x284   : > { %v5095_v38 = vsel %vm5031_vm12, %v4999_v36, %v5063_v42  ;;  %v4862_v51 = vadd.f32 %v4781_v35, %v4366_v48 }
 0x285   : > { %5127 = vst [vmem:[%s6307_s21 + $0xa0] sm:$0xff] %v5095_v38 }
 0x286   : > { %v4965_v52 = vmul.f32 %v7334_v1, %v4862_v51 }
 0x287   : > { %v3568_v53 = vpop.f32.mrf.mxu2 }
 0x288   : > { %v3647_v49 = vadd.f32 %v3568_v53, %v3294_v2  ;;  %v4288_v55 = vpop.f32.mrf.mxu3  ;;  %v5000_v56 = vadd.f32 %v7344_v43, %v4965_v52  ;;  %v3267_v53 = vld [vmem:[%s6307_s21 + $0xd8] sm:$0xff] }
 0x289   : > { %v3217_v57 = vpop.f32.mrf.mxu1 }
 0x28a   : > { %v4367_v58 = vadd.f32 %v4288_v55, %v3647_v49  ;;  %vm5032_vm13 = vcmp.gt.f32.partialorder %v5000_v56, 0.0  ;;  %v5064_v7 = vmul.f32 0.01, %v5000_v56  ;;  %v4786_v59 = vpop.f32.mrf.mxu0  ;;  %v3295_v44 = vadd.f32 %v3263_v0, %v3217_v57 }
 0x28c   : > { %v5096_v61 = vsel %vm5032_vm13, %v5000_v56, %v5064_v7  ;;  %v4863_v63 = vadd.f32 %v4784_v50, %v4367_v58 }
 0x28d   : > { %5128 = vst [vmem:[%s6307_s21 + $0xa8] sm:$0xff] %v5096_v61 }
 0x28e   : > { %v4966_v62 = vmul.f32 %v7334_v1, %v4863_v63 }
 0x28f   : > { %v3570_v3 = vpop.f32.mrf.mxu2 }
 0x290   : > { %v3648_v31 = vadd.f32 %v3570_v3, %v3295_v44  ;;  %v4290_v21 = vpop.f32.mrf.mxu3  ;;  %v5001_v8 = vadd.f32 %v7344_v43, %v4966_v62  ;;  %v3268_v62 = vld [vmem:[%s6307_s21 + $0xe0] sm:$0xff] }
 0x291   : > { %v3220_v9 = vpop.f32.mrf.mxu1 }
 0x292   : > { %v4368_v10 = vadd.f32 %v4290_v21, %v3648_v31  ;;  %vm5033_vm14 = vcmp.gt.f32.partialorder %v5001_v8, 0.0  ;;  %v5065_v54 = vmul.f32 0.01, %v5001_v8  ;;  %v4789_v5 = vpop.f32.mrf.mxu0  ;;  %v3296_v15 = vadd.f32 %v3264_v4, %v3220_v9 }
 0x294   : > { %v5097_v11 = vsel %vm5033_vm14, %v5001_v8, %v5065_v54  ;;  %v4864_v12 = vadd.f32 %v4786_v59, %v4368_v10 }
 0x295   : > { %5129 = vst [vmem:[%s6307_s21 + $0xb0] sm:$0xff] %v5097_v11 }
 0x296   : > { %v4967_v16 = vmul.f32 %v7334_v1, %v4864_v12 }
 0x297   : > { %v3573_v13 = vpop.f32.mrf.mxu2 }
 0x298   : > { %v3649_v17 = vadd.f32 %v3573_v13, %v3296_v15  ;;  %v4293_v18 = vpop.f32.mrf.mxu3  ;;  %v5002_v19 = vadd.f32 %v7344_v43, %v4967_v16  ;;  %v3269_v16 = vld [vmem:[%s6307_s21 + $0xe8] sm:$0xff] }
 0x299   : > { %v3222_v6 = vpop.f32.mrf.mxu1 }
 0x29a   : > { %v4369_v22 = vadd.f32 %v4293_v18, %v3649_v17  ;;  %vm5034_vm15 = vcmp.gt.f32.partialorder %v5002_v19, 0.0  ;;  %v5066_v23 = vmul.f32 0.01, %v5002_v19  ;;  %v4791_v25 = vpop.f32.mrf.mxu0  ;;  %v3297_v20 = vadd.f32 %v3265_v29, %v3222_v6 }
 0x29c   : > { %v5098_v27 = vsel %vm5034_vm15, %v5002_v19, %v5066_v23  ;;  %v4865_v28 = vadd.f32 %v4789_v5, %v4369_v22 }
 0x29d   : > { %5130 = vst [vmem:[%s6307_s21 + $0xb8] sm:$0xff] %v5098_v27 }
 0x29e   : > { %v4968_v60 = vmul.f32 %v7334_v1, %v4865_v28 }
 0x29f   : > { %v3575_v30 = vpop.f32.mrf.mxu2 }
 0x2a0   : > { %v3650_v32 = vadd.f32 %v3575_v30, %v3297_v20  ;;  %v4295_v33 = vpop.f32.mrf.mxu3  ;;  %v5003_v34 = vadd.f32 %v7344_v43, %v4968_v60  ;;  %v3270_v60 = vld [vmem:[%s6307_s21 + $0xf0] sm:$0xff] }
 0x2a1   : > { %v3225_v35 = vpop.f32.mrf.mxu1 }
 0x2a2   : > { %v4370_v26 = vadd.f32 %v4295_v33, %v3650_v32  ;;  %vm5035_vm0 = vcmp.gt.f32.partialorder %v5003_v34, 0.0  ;;  %v5067_v14 = vmul.f32 0.01, %v5003_v34  ;;  %v4794_v41 = vpop.f32.mrf.mxu0  ;;  %v3298_v45 = vadd.f32 %v3266_v40, %v3225_v35 }
 0x2a4   : > { %v5099_v39 = vsel %vm5035_vm0, %v5003_v34, %v5067_v14  ;;  %v4866_v37 = vadd.f32 %v4791_v25, %v4370_v26 }
 0x2a5   : > { %5131 = vst [vmem:[%s6307_s21 + $0xc0] sm:$0xff] %v5099_v39 }
 0x2a6   : > { %v4969_v46 = vmul.f32 %v7334_v1, %v4866_v37 }
 0x2a7   : > { %v3578_v36 = vpop.f32.mrf.mxu2 }
 0x2a8   : > { %v3651_v47 = vadd.f32 %v3578_v36, %v3298_v45  ;;  %v4298_v48 = vpop.f32.mrf.mxu3  ;;  %v5004_v42 = vadd.f32 %v7344_v43, %v4969_v46  ;;  %v3271_v46 = vld [vmem:[%s6307_s21 + $0xf8] sm:$0xff] }
 0x2a9   : > { %v3227_v50 = vpop.f32.mrf.mxu1 }
 0x2aa   : > { %v4371_v38 = vadd.f32 %v4298_v48, %v3651_v47  ;;  %vm5036_vm2 = vcmp.gt.f32.partialorder %v5004_v42, 0.0  ;;  %v5068_v51 = vmul.f32 0.01, %v5004_v42  ;;  %v4796_v24 = vpop.f32.mrf.mxu0  ;;  %v3299_v49 = vadd.f32 %v3267_v53, %v3227_v50 }
 0x2ac   : > { %v5100_v2 = vsel %vm5036_vm2, %v5004_v42, %v5068_v51  ;;  %v4867_v52 = vadd.f32 %v4794_v41, %v4371_v38 }
 0x2ad   : > { %5132 = vst [vmem:[%s6307_s21 + $0xc8] sm:$0xff] %v5100_v2 }
 0x2ae   : > { %v4970_v55 = vmul.f32 %v7334_v1, %v4867_v52 }
 0x2af   : > { %v3580_v56 = vpop.f32.mrf.mxu2 }
 0x2b0   : > { %v3652_v57 = vadd.f32 %v3580_v56, %v3299_v49  ;;  %v4300_v58 = vpop.f32.mrf.mxu3  ;;  %v5005_v7 = vadd.f32 %v7344_v43, %v4970_v55 }
 0x2b1   : > { %v3230_v59 = vpop.f32.mrf.mxu1 }
 0x2b2   : > { %v4372_v61 = vadd.f32 %v4300_v58, %v3652_v57  ;;  %vm5037_vm3 = vcmp.gt.f32.partialorder %v5005_v7, 0.0  ;;  %v5069_v63 = vmul.f32 0.01, %v5005_v7  ;;  %v4799_v3 = vpop.f32.mrf.mxu0  ;;  %v3300_v31 = vadd.f32 %v3268_v62, %v3230_v59 }
 0x2b4   : > { %v5101_v0 = vsel %vm5037_vm3, %v5005_v7, %v5069_v63  ;;  %v4868_v44 = vadd.f32 %v4796_v24, %v4372_v61 }
 0x2b5   : > { %5133 = vst [vmem:[%s6307_s21 + $0xd0] sm:$0xff] %v5101_v0 }
 0x2b6   : > { %v4971_v21 = vmul.f32 %v7334_v1, %v4868_v44 }
 0x2b7   : > { %v3583_v8 = vpop.f32.mrf.mxu2 }
 0x2b8   : > { %v3653_v9 = vadd.f32 %v3583_v8, %v3300_v31  ;;  %v4303_v10 = vpop.f32.mrf.mxu3  ;;  %v5006_v54 = vadd.f32 %v7344_v43, %v4971_v21 }
 0x2b9   : > { %v3232_v5 = vpop.f32.mrf.mxu1 }
 0x2ba   : > { %v4373_v11 = vadd.f32 %v4303_v10, %v3653_v9  ;;  %vm5038_vm4 = vcmp.gt.f32.partialorder %v5006_v54, 0.0  ;;  %v5070_v12 = vmul.f32 0.01, %v5006_v54  ;;  %v3301_v13 = vadd.f32 %v3269_v16, %v3232_v5  ;;  %v4801_v19 = vpop.f32.mrf.mxu0 }
 0x2bc   : > { %v5102_v4 = vsel %vm5038_vm4, %v5006_v54, %v5070_v12  ;;  %v4869_v15 = vadd.f32 %v4799_v3, %v4373_v11 }
 0x2bd   : > { %5134 = vst [vmem:[%s6307_s21 + $0xd8] sm:$0xff] %v5102_v4 }
 0x2be   : > { %v4972_v17 = vmul.f32 %v7334_v1, %v4869_v15 }
 0x2bf   : > { %v3585_v18 = vpop.f32.mrf.mxu2 }
 0x2c0   : > { %v3654_v6 = vadd.f32 %v3585_v18, %v3301_v13  ;;  %v4305_v22 = vpop.f32.mrf.mxu3  ;;  %v5007_v23 = vadd.f32 %v7344_v43, %v4972_v17 }
 0x2c1   : > { %v3235_v25 = vpop.f32.mrf.mxu1 }
 0x2c2   : > { %v4374_v27 = vadd.f32 %v4305_v22, %v3654_v6  ;;  %vm5039_vm5 = vcmp.gt.f32.partialorder %v5007_v23, 0.0  ;;  %v5071_v28 = vmul.f32 0.01, %v5007_v23  ;;  %v3302_v30 = vadd.f32 %v3270_v60, %v3235_v25  ;;  %v4804_v14 = vpop.f32.mrf.mxu0 }
 0x2c4   : > { %v5103_v29 = vsel %vm5039_vm5, %v5007_v23, %v5071_v28  ;;  %v4870_v20 = vadd.f32 %v4801_v19, %v4374_v27 }
 0x2c5   : > { %5135 = vst [vmem:[%s6307_s21 + $0xe0] sm:$0xff] %v5103_v29 }
 0x2c6   : > { %v4973_v32 = vmul.f32 %v7334_v1, %v4870_v20 }
 0x2c7   : > { %v3588_v33 = vpop.f32.mrf.mxu2 }
 0x2c8   : > { %v3655_v34 = vadd.f32 %v3588_v33, %v3302_v30  ;;  %v4308_v35 = vpop.f32.mrf.mxu3  ;;  %v5008_v26 = vadd.f32 %v7344_v43, %v4973_v32 }
 0x2c9   : > { %v3237_v37 = vpop.f32.mrf.mxu1 }
 0x2ca   : > { %v4375_v41 = vadd.f32 %v4308_v35, %v3655_v34  ;;  %vm5040_vm6 = vcmp.gt.f32.partialorder %v5008_v26, 0.0  ;;  %v5072_v39 = vmul.f32 0.01, %v5008_v26  ;;  %v3303_v36 = vadd.f32 %v3271_v46, %v3237_v37  ;;  %v4806_v2 = vpop.f32.mrf.mxu0 }
 0x2cc   : > { %v5104_v40 = vsel %vm5040_vm6, %v5008_v26, %v5072_v39  ;;  %v4871_v45 = vadd.f32 %v4804_v14, %v4375_v41 }
 0x2cd   : > { %5136 = vst [vmem:[%s6307_s21 + $0xe8] sm:$0xff] %v5104_v40 }
 0x2ce   : > { %v4974_v47 = vmul.f32 %v7334_v1, %v4871_v45 }
 0x2cf   : > { %v3590_v48 = vpop.f32.mrf.mxu2 }
 0x2d0   : > { %v3656_v42 = vadd.f32 %v3590_v48, %v3303_v36  ;;  %v5009_v50 = vadd.f32 %v7344_v43, %v4974_v47  ;;  %v4310_v38 = vpop.f32.mrf.mxu3 }
 0x2d2   : > { %v4376_v51 = vadd.f32 %v4310_v38, %v3656_v42  ;;  %vm5041_vm1 = vcmp.gt.f32.partialorder %v5009_v50, 0.0  ;;  %v5073_v24 = vmul.f32 0.01, %v5009_v50 }
 0x2d4   : > { %v5105_v52 = vsel %vm5041_vm1, %v5009_v50, %v5073_v24  ;;  %v4872_v53 = vadd.f32 %v4806_v2, %v4376_v51 }
 0x2d5   : > { %5137 = vst [vmem:[%s6307_s21 + $0xf0] sm:$0xff] %v5105_v52 }
 0x2d6   : > { %v4975_v49 = vmul.f32 %v7334_v1, %v4872_v53 }
 0x2d8   : > { %v5010_v55 = vadd.f32 %v7344_v43, %v4975_v49 }
 0x2da   : > { %vm5042_vm7 = vcmp.gt.f32.partialorder %v5010_v55, 0.0  ;;  %v5074_v56 = vmul.f32 0.01, %v5010_v55 }
 0x2dc   : > { %v5106_v57 = vsel %vm5042_vm7, %v5010_v55, %v5074_v56 }
 0x2dd   : > { %5138 = vst [vmem:[%s6307_s21 + $0xf8] sm:$0xff] %v5106_v57 }
 0x2de PF: > { %s14_s17 = sadd.s32 1, %s6037_s17   ;;  %s7433_s15 = smov %s6033_s16 }
 0x2df   : > { %p11_p5 = scmp.ge.s32.totalorder %s14_s17, 4   ;;  %s7434_s16 = smov %s7436_s18 }
 0x2e1   :  { %13 = sbr.rel (!%p11_p5) target bundleno = 2 (0x2), region = 79 }

</bundles_post_ra>
